<compile_context>
chip_gen: v7x
topology: tpu7x:2x2x1
jax: 0.10.0
libtpu: 0.0.40
codegen_flags: <defaults>
</compile_context>

<pallas_src>
import functools
import math

import numpy as np
import jax
import jax.numpy as jnp
from jax.experimental import pallas as pl
from jax.experimental.pallas import tpu as pltpu


# ----------------------------- in-kernel helpers ------------------------------------

def _layer_norm(x, g, b, eps=1e-5):
    mu = jnp.mean(x, axis=-1, keepdims=True)
    var = jnp.mean((x - mu) ** 2, axis=-1, keepdims=True)
    return (x - mu) * jax.lax.rsqrt(var + eps) * g + b


def _mha(q_in, kv_in, wq, bq, wk, bk, wv, bv, wo, bo, bias, heads, head_dim):
    """q_in: (Tq, H), kv_in: (Tk, H), bias broadcastable to (heads, Tq, Tk)."""
    Tq, H = q_in.shape
    Tk = kv_in.shape[0]
    Q = jnp.dot(q_in, wq, preferred_element_type=jnp.float32) + bq
    K = jnp.dot(kv_in, wk, preferred_element_type=jnp.float32) + bk
    V = jnp.dot(kv_in, wv, preferred_element_type=jnp.float32) + bv
    # heads as a leading batch dim -> one batched dot_general per product
    Qh = Q.reshape(Tq, heads, head_dim).transpose(1, 0, 2)    # (h, Tq, d)
    Kh = K.reshape(Tk, heads, head_dim).transpose(1, 0, 2)    # (h, Tk, d)
    Vh = V.reshape(Tk, heads, head_dim).transpose(1, 0, 2)    # (h, Tk, d)
    energy = jnp.einsum("hqd,hkd->hqk", Qh, Kh,
                        preferred_element_type=jnp.float32) * (1.0 / math.sqrt(head_dim))
    energy = energy + bias[None, :, :]                        # additive mask bias
    m = jnp.max(energy, axis=-1, keepdims=True)
    p = jnp.exp(energy - m)
    attn = p / jnp.sum(p, axis=-1, keepdims=True)             # (h, Tq, Tk)
    ctx = jnp.einsum("hqk,hkd->hqd", attn, Vh, preferred_element_type=jnp.float32)
    ctx = ctx.transpose(1, 0, 2).reshape(Tq, H)
    out = jnp.dot(ctx, wo, preferred_element_type=jnp.float32) + bo
    return out, attn


# ----------------------------- fused decoder-stack kernel ---------------------------

def decoder_stack_kernel(x_ref, enc_ref, tmask_ref, smask_ref,
                         w_attn_ref, b_attn_ref,
                         w_ff1_ref, b_ff1_ref, w_ff2_ref, b_ff2_ref,
                         ln_g_ref, ln_b_ref,
                         out_w_ref, out_b_ref,
                         logits_ref, attn_ref,
                         *, layers, heads):
    H = x_ref.shape[-1]
    head_dim = H // heads

    x = x_ref[0]                # (T, H)   resident in VMEM for the whole stack
    enc = enc_ref[0]            # (S, H)

    # mask -> additive bias (computed once per program, not per head / per layer)
    tbias = jnp.where(tmask_ref[0, 0] == 0.0, -1e10, 0.0)     # (T, T)
    sbias = jnp.where(smask_ref[0, 0] == 0.0, -1e10, 0.0)     # (1, S)

    for l in range(layers):                                   # static, unrolled
        b_l = b_attn_ref[l]     # (8, H)  [sa_q, sa_k, sa_v, sa_o, ca_q, ca_k, ca_v, ca_o]
        g_l = ln_g_ref[l]       # (3, H)
        e_l = ln_b_ref[l]       # (3, H)

        # masked self attention + residual + layernorm
        sa, _ = _mha(x, x,
                     w_attn_ref[l, 0], b_l[0:1], w_attn_ref[l, 1], b_l[1:2],
                     w_attn_ref[l, 2], b_l[2:3], w_attn_ref[l, 3], b_l[3:4],
                     tbias, heads, head_dim)
        x = _layer_norm(x + sa, g_l[0:1], e_l[0:1])

        # encoder (cross) attention + residual + layernorm
        ca, attn = _mha(x, enc,
                        w_attn_ref[l, 4], b_l[4:5], w_attn_ref[l, 5], b_l[5:6],
                        w_attn_ref[l, 6], b_l[6:7], w_attn_ref[l, 7], b_l[7:8],
                        sbias, heads, head_dim)
        if l == layers - 1:                 # only the last layer's attention is returned
            attn_ref[0] = attn              # single (heads, T, S) store
        x = _layer_norm(x + ca, g_l[1:2], e_l[1:2])

        # position-wise feed forward + residual + layernorm
        h1 = jnp.maximum(
            jnp.dot(x, w_ff1_ref[l], preferred_element_type=jnp.float32) + b_ff1_ref[l],
            0.0)
        ff = jnp.dot(h1, w_ff2_ref[l], preferred_element_type=jnp.float32) + b_ff2_ref[l]
        x = _layer_norm(x + ff, g_l[2:3], e_l[2:3])

    # fused, lane-padded vocabulary projection (full-lane store, pad sliced off outside)
    logits_ref[0] = (jnp.dot(x, out_w_ref[...], preferred_element_type=jnp.float32)
                     + out_b_ref[...])


# ----------------------------- wrappers ---------------------------------------------

def pack_decoder_params(params, lane=128):
    """Stack per-layer weights along a leading L axis; pad the vocab projection."""
    layers = params["layers"]
    V = params["out_w"].shape[1]
    Vp = -(-V // lane) * lane

    def vec(a):
        return a.reshape(-1)

    proj = [(p, n) for p in ("sa", "ca") for n in ("q", "k", "v", "o")]
    w_attn = jnp.stack([jnp.stack([lp[f"{p}_w{n}"] for p, n in proj]) for lp in layers])
    b_attn = jnp.stack([jnp.stack([vec(lp[f"{p}_b{n}"]) for p, n in proj]) for lp in layers])
    w_ff1 = jnp.stack([lp["ff_w1"] for lp in layers])
    b_ff1 = jnp.stack([lp["ff_b1"].reshape(1, -1) for lp in layers])
    w_ff2 = jnp.stack([lp["ff_w2"] for lp in layers])
    b_ff2 = jnp.stack([lp["ff_b2"].reshape(1, -1) for lp in layers])
    ln_g = jnp.stack([jnp.stack([vec(lp[f"ln{i}_g"]) for i in (1, 2, 3)]) for lp in layers])
    ln_b = jnp.stack([jnp.stack([vec(lp[f"ln{i}_b"]) for i in (1, 2, 3)]) for lp in layers])
    out_w = jnp.pad(params["out_w"], ((0, 0), (0, Vp - V)))
    out_b = jnp.pad(params["out_b"].reshape(1, -1), ((0, 0), (0, Vp - V)))
    packed = (w_attn, b_attn, w_ff1, b_ff1, w_ff2, b_ff2, ln_g, ln_b, out_w, out_b)
    return packed, Vp


def run_decoder_stack(x, enc, tmask, smask, packed, heads, layers, v_pad):
    B, T, H = x.shape
    S = enc.shape[1]

    def full_spec(a):
        nd = a.ndim
        return pl.BlockSpec(a.shape, lambda b, _nd=nd: (0,) * _nd)

    in_specs = [
        pl.BlockSpec((1, T, H), lambda b: (b, 0, 0)),
        pl.BlockSpec((1, S, H), lambda b: (b, 0, 0)),
        pl.BlockSpec((1, 1, T, T), lambda b: (b, 0, 0, 0)),
        pl.BlockSpec((1, 1, 1, S), lambda b: (b, 0, 0, 0)),
    ] + [full_spec(a) for a in packed]

    out_shape = (jax.ShapeDtypeStruct((B, T, v_pad), jnp.float32),
                 jax.ShapeDtypeStruct((B, heads, T, S), jnp.float32))
    out_specs = (pl.BlockSpec((1, T, v_pad), lambda b: (b, 0, 0)),
                 pl.BlockSpec((1, heads, T, S), lambda b: (b, 0, 0, 0)))

    kernel = functools.partial(decoder_stack_kernel, layers=layers, heads=heads)
    return pl.pallas_call(
        kernel,
        grid=(B,),
        in_specs=in_specs,
        out_specs=out_specs,
        out_shape=out_shape,
        compiler_params=pltpu.CompilerParams(dimension_semantics=("parallel",)),
    )(x, enc, tmask, smask, *packed)


def decoder_forward(params, trg_tokens, enc_src, trg_mask, src_mask, heads_num):
    B, T = trg_tokens.shape
    H = params["tok_emb"].shape[1]
    V = params["out_w"].shape[1]
    layers = len(params["layers"])
    # embedding gather + scale + position embedding (plain-JAX glue; dropout = identity)
    x = params["tok_emb"][trg_tokens] * math.sqrt(H) + params["pos_emb"][:T][None, :, :]
    packed, v_pad = pack_decoder_params(params)
    logits_pad, attention = run_decoder_stack(x, enc_src, trg_mask, src_mask,
                                              packed, heads_num, layers, v_pad)
    return logits_pad[..., :V], attention


# ----------------------------- pure-JAX reference -----------------------------------

def _ref_mha(q, k, v, mask, wq, bq, wk, bk, wv, bv, wo, bo, heads):
    B, Tq, H = q.shape
    Tk = k.shape[1]
    dh = H // heads
    Q = (q @ wq + bq).reshape(B, Tq, heads, dh).transpose(0, 2, 1, 3)
    K = (k @ wk + bk).reshape(B, Tk, heads, dh).transpose(0, 2, 1, 3)
    V = (v @ wv + bv).reshape(B, Tk, heads, dh).transpose(0, 2, 1, 3)
    energy = jnp.einsum("bhqd,bhkd->bhqk", Q, K) / math.sqrt(dh)
    energy = jnp.where(mask == 0.0, -1e10, energy)
    attn = jax.nn.softmax(energy, axis=-1)
    x = jnp.einsum("bhqk,bhkd->bhqd", attn, V)
    x = x.transpose(0, 2, 1, 3).reshape(B, Tq, H)
    return x @ wo + bo, attn


def _ref_ln(x, g, b, eps=1e-5):
    mu = jnp.mean(x, axis=-1, keepdims=True)
    var = jnp.mean((x - mu) ** 2, axis=-1, keepdims=True)
    return (x - mu) / jnp.sqrt(var + eps) * g + b


def reference_forward(params, trg_tokens, enc_src, trg_mask, src_mask, heads_num):
    H = params["tok_emb"].shape[1]
    T = trg_tokens.shape[1]
    x = params["tok_emb"][trg_tokens] * math.sqrt(H) + params["pos_emb"][:T][None]
    attention = None
    for p in params["layers"]:
        sa, _ = _ref_mha(x, x, x, trg_mask,
                         p["sa_wq"], p["sa_bq"], p["sa_wk"], p["sa_bk"],
                         p["sa_wv"], p["sa_bv"], p["sa_wo"], p["sa_bo"], heads_num)
        x = _ref_ln(x + sa, p["ln1_g"], p["ln1_b"])
        ca, attention = _ref_mha(x, enc_src, enc_src, src_mask,
                                 p["ca_wq"], p["ca_bq"], p["ca_wk"], p["ca_bk"],
                                 p["ca_wv"], p["ca_bv"], p["ca_wo"], p["ca_bo"], heads_num)
        x = _ref_ln(x + ca, p["ln2_g"], p["ln2_b"])
        ff = jnp.maximum(x @ p["ff_w1"] + p["ff_b1"], 0.0) @ p["ff_w2"] + p["ff_b2"]
        x = _ref_ln(x + ff, p["ln3_g"], p["ln3_b"])
    out = x @ params["out_w"] + params["out_b"]
    return out, attention


# ----------------------------- parameter init ---------------------------------------

def init_decoder_params(key, output_dim, hidden_dim, ff_dim, layers_num, max_length):
    def nxt():
        nonlocal key
        key, sub = jax.random.split(key)
        return sub

    def lin(din, dout):
        w = jax.random.normal(nxt(), (din, dout), jnp.float32) * 0.08
        b = jax.random.normal(nxt(), (1, dout), jnp.float32) * 0.02
        return w, b

    params = {
        "tok_emb": jax.random.normal(nxt(), (output_dim, hidden_dim), jnp.float32) * 0.1,
        "pos_emb": jax.random.normal(nxt(), (max_length, hidden_dim), jnp.float32) * 0.1,
        "layers": [],
    }
    for _ in range(layers_num):
        lp = {}
        for pre in ("sa", "ca"):
            for nm in ("q", "k", "v", "o"):
                w, b = lin(hidden_dim, hidden_dim)
                lp[f"{pre}_w{nm}"] = w
                lp[f"{pre}_b{nm}"] = b
        lp["ff_w1"], lp["ff_b1"] = lin(hidden_dim, ff_dim)
        lp["ff_w2"], lp["ff_b2"] = lin(ff_dim, hidden_dim)
        for i in (1, 2, 3):
            lp[f"ln{i}_g"] = jnp.ones((1, hidden_dim), jnp.float32)
            lp[f"ln{i}_b"] = jnp.zeros((1, hidden_dim), jnp.float32)
        params["layers"].append(lp)
    params["out_w"], params["out_b"] = lin(hidden_dim, output_dim)
    return params


# ----------------------------- main --------------------------------------------------

if __name__ == "__main__":
    output_dim, hidden_dim, ff_dim = 50, 32, 64
    layers_num, heads_num, max_length = 2, 4, 16
    B, T, S = 2, 8, 8

    key = jax.random.PRNGKey(0)
    kp, kt, ke = jax.random.split(key, 3)
    params = init_decoder_params(kp, output_dim, hidden_dim, ff_dim, layers_num, max_length)

    trg_tokens = jax.random.randint(kt, (B, T), 0, output_dim, dtype=jnp.int32)
    enc_src = jax.random.normal(ke, (B, S, hidden_dim), jnp.float32)

    # causal target mask [B, 1, T, T]; padded source mask [B, 1, 1, S]
    trg_mask = jnp.broadcast_to(jnp.tril(jnp.ones((T, T), jnp.float32)), (B, 1, T, T))
    src_lens = jnp.array([S, 5], dtype=jnp.int32)
    src_mask = (jnp.arange(S)[None, :] < src_lens[:, None]).astype(jnp.float32)
    src_mask = src_mask[:, None, None, :]

    out, attn = decoder_forward(params, trg_tokens, enc_src, trg_mask, src_mask, heads_num)
    out = jax.block_until_ready(out)
    attn = jax.block_until_ready(attn)

    ref_out, ref_attn = reference_forward(params, trg_tokens, enc_src,
                                          trg_mask, src_mask, heads_num)

    assert out.shape == (B, T, output_dim)
    assert attn.shape == (B, heads_num, T, S)
    np.testing.assert_allclose(np.asarray(out), np.asarray(ref_out), rtol=2e-4, atol=2e-4)
    np.testing.assert_allclose(np.asarray(attn), np.asarray(ref_attn), rtol=2e-4, atol=2e-4)

    print("KERNEL_OK")
</pallas_src>

<mosaic_0001>
module attributes {stable_mosaic.version = 11 : i64} {
  func.func @decoder_stack_kernel(%arg0: i32, %arg1: memref<1x8x32xf32, #tpu.memory_space<vmem>>, %arg2: memref<1x8x32xf32, #tpu.memory_space<vmem>>, %arg3: memref<1x1x8x8xf32, #tpu.memory_space<vmem>>, %arg4: memref<1x1x1x8xf32, #tpu.memory_space<vmem>>, %arg5: memref<2x8x32x32xf32, #tpu.memory_space<vmem>>, %arg6: memref<2x8x32xf32, #tpu.memory_space<vmem>>, %arg7: memref<2x32x64xf32, #tpu.memory_space<vmem>>, %arg8: memref<2x1x64xf32, #tpu.memory_space<vmem>>, %arg9: memref<2x64x32xf32, #tpu.memory_space<vmem>>, %arg10: memref<2x1x32xf32, #tpu.memory_space<vmem>>, %arg11: memref<2x3x32xf32, #tpu.memory_space<vmem>>, %arg12: memref<2x3x32xf32, #tpu.memory_space<vmem>>, %arg13: memref<32x128xf32, #tpu.memory_space<vmem>>, %arg14: memref<1x128xf32, #tpu.memory_space<vmem>>, %arg15: memref<1x8x128xf32, #tpu.memory_space<vmem>>, %arg16: memref<1x4x8x8xf32, #tpu.memory_space<vmem>>) attributes {dimension_semantics = [#tpu.dimension_semantics<parallel>], iteration_bounds = array<i64: 2>, scalar_prefetch = 0 : i64, scratch_operands = 0 : i64, tpu.core_type = #tpu.core_type<tc>, window_params = [{transform_indices = @transform_0, window_bounds = array<i64: 1, 8, 32>}, {transform_indices = @transform_1, window_bounds = array<i64: 1, 8, 32>}, {transform_indices = @transform_2, window_bounds = array<i64: 1, 1, 8, 8>}, {transform_indices = @transform_3, window_bounds = array<i64: 1, 1, 1, 8>}, {pipeline_mode = #tpu.pipeline_mode<synchronous>, transform_indices = @transform_4, window_bounds = array<i64: 2, 8, 32, 32>}, {pipeline_mode = #tpu.pipeline_mode<synchronous>, transform_indices = @transform_5, window_bounds = array<i64: 2, 8, 32>}, {pipeline_mode = #tpu.pipeline_mode<synchronous>, transform_indices = @transform_6, window_bounds = array<i64: 2, 32, 64>}, {pipeline_mode = #tpu.pipeline_mode<synchronous>, transform_indices = @transform_7, window_bounds = array<i64: 2, 1, 64>}, {pipeline_mode = #tpu.pipeline_mode<synchronous>, transform_indices = @transform_8, window_bounds = array<i64: 2, 64, 32>}, {pipeline_mode = #tpu.pipeline_mode<synchronous>, transform_indices = @transform_9, window_bounds = array<i64: 2, 1, 32>}, {pipeline_mode = #tpu.pipeline_mode<synchronous>, transform_indices = @transform_10, window_bounds = array<i64: 2, 3, 32>}, {pipeline_mode = #tpu.pipeline_mode<synchronous>, transform_indices = @transform_11, window_bounds = array<i64: 2, 3, 32>}, {pipeline_mode = #tpu.pipeline_mode<synchronous>, transform_indices = @transform_12, window_bounds = array<i64: 32, 128>}, {pipeline_mode = #tpu.pipeline_mode<synchronous>, transform_indices = @transform_13, window_bounds = array<i64: 1, 128>}, {transform_indices = @transform_14, window_bounds = array<i64: 1, 8, 128>}, {transform_indices = @transform_15, window_bounds = array<i64: 1, 4, 8, 8>}]} {
    %c0 = arith.constant 0 : index
    %c0_0 = arith.constant 0 : index
    %c0_1 = arith.constant 0 : index
    %0 = vector.load %arg1[%c0, %c0_0, %c0_1] : memref<1x8x32xf32, #tpu.memory_space<vmem>>, vector<1x8x32xf32>
    %1 = vector.shape_cast %0 : vector<1x8x32xf32> to vector<8x32xf32>
    %c0_2 = arith.constant 0 : index
    %c0_3 = arith.constant 0 : index
    %c0_4 = arith.constant 0 : index
    %2 = vector.load %arg2[%c0_2, %c0_3, %c0_4] : memref<1x8x32xf32, #tpu.memory_space<vmem>>, vector<1x8x32xf32>
    %3 = vector.shape_cast %2 : vector<1x8x32xf32> to vector<8x32xf32>
    %c0_5 = arith.constant 0 : index
    %c0_6 = arith.constant 0 : index
    %c0_7 = arith.constant 0 : index
    %c0_8 = arith.constant 0 : index
    %4 = vector.load %arg3[%c0_5, %c0_6, %c0_7, %c0_8] : memref<1x1x8x8xf32, #tpu.memory_space<vmem>>, vector<1x1x8x8xf32>
    %5 = vector.shape_cast %4 : vector<1x1x8x8xf32> to vector<8x8xf32>
    %cst = arith.constant 0.000000e+00 : f32
    %6 = vector.broadcast %cst : f32 to vector<8x8xf32>
    %7 = arith.cmpf oeq, %5, %6 : vector<8x8xf32>
    %cst_9 = arith.constant -1.000000e+10 : f32
    %cst_10 = arith.constant 0.000000e+00 : f32
    %8 = vector.broadcast %cst_9 : f32 to vector<8x8xf32>
    %9 = vector.broadcast %cst_10 : f32 to vector<8x8xf32>
    %10 = arith.select %7, %8, %9 : vector<8x8xi1>, vector<8x8xf32>
    %c0_11 = arith.constant 0 : index
    %c0_12 = arith.constant 0 : index
    %c0_13 = arith.constant 0 : index
    %c0_14 = arith.constant 0 : index
    %11 = vector.load %arg4[%c0_11, %c0_12, %c0_13, %c0_14] : memref<1x1x1x8xf32, #tpu.memory_space<vmem>>, vector<1x1x1x8xf32>
    %12 = vector.shape_cast %11 : vector<1x1x1x8xf32> to vector<1x8xf32>
    %cst_15 = arith.constant 0.000000e+00 : f32
    %13 = vector.broadcast %cst_15 : f32 to vector<1x8xf32>
    %14 = arith.cmpf oeq, %12, %13 : vector<1x8xf32>
    %cst_16 = arith.constant -1.000000e+10 : f32
    %cst_17 = arith.constant 0.000000e+00 : f32
    %15 = vector.broadcast %cst_16 : f32 to vector<1x8xf32>
    %16 = vector.broadcast %cst_17 : f32 to vector<1x8xf32>
    %17 = arith.select %14, %15, %16 : vector<1x8xi1>, vector<1x8xf32>
    %c0_18 = arith.constant 0 : index
    %c0_19 = arith.constant 0 : index
    %c0_20 = arith.constant 0 : index
    %18 = vector.load %arg6[%c0_18, %c0_19, %c0_20] : memref<2x8x32xf32, #tpu.memory_space<vmem>>, vector<1x8x32xf32>
    %19 = vector.shape_cast %18 : vector<1x8x32xf32> to vector<8x32xf32>
    %c0_21 = arith.constant 0 : index
    %c0_22 = arith.constant 0 : index
    %c0_23 = arith.constant 0 : index
    %20 = vector.load %arg11[%c0_21, %c0_22, %c0_23] : memref<2x3x32xf32, #tpu.memory_space<vmem>>, vector<1x3x32xf32>
    %21 = vector.shape_cast %20 : vector<1x3x32xf32> to vector<3x32xf32>
    %c0_24 = arith.constant 0 : index
    %c0_25 = arith.constant 0 : index
    %c0_26 = arith.constant 0 : index
    %22 = vector.load %arg12[%c0_24, %c0_25, %c0_26] : memref<2x3x32xf32, #tpu.memory_space<vmem>>, vector<1x3x32xf32>
    %23 = vector.shape_cast %22 : vector<1x3x32xf32> to vector<3x32xf32>
    %c0_27 = arith.constant 0 : index
    %c0_28 = arith.constant 0 : index
    %c0_29 = arith.constant 0 : index
    %c0_30 = arith.constant 0 : index
    %24 = vector.load %arg5[%c0_27, %c0_28, %c0_29, %c0_30] : memref<2x8x32x32xf32, #tpu.memory_space<vmem>>, vector<1x1x32x32xf32>
    %25 = vector.shape_cast %24 : vector<1x1x32x32xf32> to vector<32x32xf32>
    %26 = vector.extract_strided_slice %19 {offsets = [0, 0], sizes = [1, 32], strides = [1, 1]} : vector<8x32xf32> to vector<1x32xf32>
    %c0_31 = arith.constant 0 : index
    %c1 = arith.constant 1 : index
    %c0_32 = arith.constant 0 : index
    %c0_33 = arith.constant 0 : index
    %27 = vector.load %arg5[%c0_31, %c1, %c0_32, %c0_33] : memref<2x8x32x32xf32, #tpu.memory_space<vmem>>, vector<1x1x32x32xf32>
    %28 = vector.shape_cast %27 : vector<1x1x32x32xf32> to vector<32x32xf32>
    %29 = vector.extract_strided_slice %19 {offsets = [1, 0], sizes = [1, 32], strides = [1, 1]} : vector<8x32xf32> to vector<1x32xf32>
    %c0_34 = arith.constant 0 : index
    %c2 = arith.constant 2 : index
    %c0_35 = arith.constant 0 : index
    %c0_36 = arith.constant 0 : index
    %30 = vector.load %arg5[%c0_34, %c2, %c0_35, %c0_36] : memref<2x8x32x32xf32, #tpu.memory_space<vmem>>, vector<1x1x32x32xf32>
    %31 = vector.shape_cast %30 : vector<1x1x32x32xf32> to vector<32x32xf32>
    %32 = vector.extract_strided_slice %19 {offsets = [2, 0], sizes = [1, 32], strides = [1, 1]} : vector<8x32xf32> to vector<1x32xf32>
    %c0_37 = arith.constant 0 : index
    %c3 = arith.constant 3 : index
    %c0_38 = arith.constant 0 : index
    %c0_39 = arith.constant 0 : index
    %33 = vector.load %arg5[%c0_37, %c3, %c0_38, %c0_39] : memref<2x8x32x32xf32, #tpu.memory_space<vmem>>, vector<1x1x32x32xf32>
    %34 = vector.shape_cast %33 : vector<1x1x32x32xf32> to vector<32x32xf32>
    %35 = vector.extract_strided_slice %19 {offsets = [3, 0], sizes = [1, 32], strides = [1, 1]} : vector<8x32xf32> to vector<1x32xf32>
    %cst_40 = arith.constant dense<0.000000e+00> : vector<8x32xf32>
    %36 = tpu.matmul %1, %25, %cst_40 {dimension_numbers = #tpu.dot_dimension_numbers<[1], [0], [0], [1], [0, 0, 1, 1], [], []>} : vector<8x32xf32>, vector<32x32xf32>, vector<8x32xf32> -> vector<8x32xf32>
    %37 = vector.broadcast %26 : vector<1x32xf32> to vector<8x32xf32>
    %38 = arith.addf %36, %37 : vector<8x32xf32>
    %cst_41 = arith.constant dense<0.000000e+00> : vector<8x32xf32>
    %39 = tpu.matmul %1, %28, %cst_41 {dimension_numbers = #tpu.dot_dimension_numbers<[1], [0], [0], [1], [0, 0, 1, 1], [], []>} : vector<8x32xf32>, vector<32x32xf32>, vector<8x32xf32> -> vector<8x32xf32>
    %40 = vector.broadcast %29 : vector<1x32xf32> to vector<8x32xf32>
    %41 = arith.addf %39, %40 : vector<8x32xf32>
    %cst_42 = arith.constant dense<0.000000e+00> : vector<8x32xf32>
    %42 = tpu.matmul %1, %31, %cst_42 {dimension_numbers = #tpu.dot_dimension_numbers<[1], [0], [0], [1], [0, 0, 1, 1], [], []>} : vector<8x32xf32>, vector<32x32xf32>, vector<8x32xf32> -> vector<8x32xf32>
    %43 = vector.broadcast %32 : vector<1x32xf32> to vector<8x32xf32>
    %44 = arith.addf %42, %43 : vector<8x32xf32>
    %45 = vector.shape_cast %38 : vector<8x32xf32> to vector<8x4x8xf32>
    %46 = tpu.transpose %45, [1, 0, 2] : vector<8x4x8xf32> -> vector<4x8x8xf32>
    %47 = vector.shape_cast %41 : vector<8x32xf32> to vector<8x4x8xf32>
    %48 = tpu.transpose %47, [1, 0, 2] : vector<8x4x8xf32> -> vector<4x8x8xf32>
    %49 = vector.shape_cast %44 : vector<8x32xf32> to vector<8x4x8xf32>
    %50 = tpu.transpose %49, [1, 0, 2] : vector<8x4x8xf32> -> vector<4x8x8xf32>
    "tpu.trace_start"() <{level = 10 : i32, message = "hqd,hkd->hqk"}> : () -> ()
    %cst_43 = arith.constant dense<0.000000e+00> : vector<4x8x8xf32>
    %51 = tpu.matmul %46, %48, %cst_43 {dimension_numbers = #tpu.dot_dimension_numbers<[2], [2], [1], [1], [0, 0, 0, 1, 1, 1], [0], [0]>} : vector<4x8x8xf32>, vector<4x8x8xf32>, vector<4x8x8xf32> -> vector<4x8x8xf32>
    "tpu.trace_stop"() : () -> ()
    %cst_44 = arith.constant 0.353553385 : f32
    %52 = vector.broadcast %cst_44 : f32 to vector<4x8x8xf32>
    %53 = arith.mulf %51, %52 : vector<4x8x8xf32>
    %54 = vector.shape_cast %10 : vector<8x8xf32> to vector<1x8x8xf32>
    %55 = vector.broadcast %54 : vector<1x8x8xf32> to vector<4x8x8xf32>
    %56 = arith.addf %53, %55 : vector<4x8x8xf32>
    %cst_45 = arith.constant dense<0xFF800000> : vector<4x8xf32>
    %57 = vector.multi_reduction <maximumf>, %56, %cst_45 [2] : vector<4x8x8xf32> to vector<4x8xf32>
    %58 = vector.shape_cast %57 : vector<4x8xf32> to vector<4x8x1xf32>
    %59 = vector.broadcast %58 : vector<4x8x1xf32> to vector<4x8x8xf32>
    %60 = arith.subf %56, %59 : vector<4x8x8xf32>
    %61 = math.exp %60 : vector<4x8x8xf32>
    %cst_46 = arith.constant dense<0.000000e+00> : vector<4x8xf32>
    %62 = vector.multi_reduction <add>, %61, %cst_46 [2] : vector<4x8x8xf32> to vector<4x8xf32>
    %63 = vector.shape_cast %62 : vector<4x8xf32> to vector<4x8x1xf32>
    %64 = vector.broadcast %63 : vector<4x8x1xf32> to vector<4x8x8xf32>
    %65 = arith.divf %61, %64 : vector<4x8x8xf32>
    "tpu.trace_start"() <{level = 10 : i32, message = "hqk,hkd->hqd"}> : () -> ()
    %cst_47 = arith.constant dense<0.000000e+00> : vector<4x8x8xf32>
    %66 = tpu.matmul %65, %50, %cst_47 {dimension_numbers = #tpu.dot_dimension_numbers<[2], [1], [1], [2], [0, 0, 0, 1, 1, 2], [0], [0]>} : vector<4x8x8xf32>, vector<4x8x8xf32>, vector<4x8x8xf32> -> vector<4x8x8xf32>
    "tpu.trace_stop"() : () -> ()
    %67 = tpu.transpose %66, [1, 0, 2] : vector<4x8x8xf32> -> vector<8x4x8xf32>
    %68 = vector.shape_cast %67 : vector<8x4x8xf32> to vector<8x32xf32>
    %cst_48 = arith.constant dense<0.000000e+00> : vector<8x32xf32>
    %69 = tpu.matmul %68, %34, %cst_48 {dimension_numbers = #tpu.dot_dimension_numbers<[1], [0], [0], [1], [0, 0, 1, 1], [], []>} : vector<8x32xf32>, vector<32x32xf32>, vector<8x32xf32> -> vector<8x32xf32>
    %70 = vector.broadcast %35 : vector<1x32xf32> to vector<8x32xf32>
    %71 = arith.addf %69, %70 : vector<8x32xf32>
    %72 = arith.addf %1, %71 : vector<8x32xf32>
    %73 = vector.extract_strided_slice %21 {offsets = [0, 0], sizes = [1, 32], strides = [1, 1]} : vector<3x32xf32> to vector<1x32xf32>
    %74 = vector.extract_strided_slice %23 {offsets = [0, 0], sizes = [1, 32], strides = [1, 1]} : vector<3x32xf32> to vector<1x32xf32>
    %cst_49 = arith.constant dense<0.000000e+00> : vector<8xf32>
    %75 = vector.multi_reduction <add>, %72, %cst_49 [1] : vector<8x32xf32> to vector<8xf32>
    %76 = vector.shape_cast %75 : vector<8xf32> to vector<8x1xf32>
    %cst_50 = arith.constant 3.200000e+01 : f32
    %77 = vector.broadcast %cst_50 : f32 to vector<8x1xf32>
    %78 = arith.divf %76, %77 : vector<8x1xf32>
    %79 = vector.broadcast %78 : vector<8x1xf32> to vector<8x32xf32>
    %80 = arith.subf %72, %79 : vector<8x32xf32>
    %81 = arith.mulf %80, %80 : vector<8x32xf32>
    %cst_51 = arith.constant dense<0.000000e+00> : vector<8xf32>
    %82 = vector.multi_reduction <add>, %81, %cst_51 [1] : vector<8x32xf32> to vector<8xf32>
    %83 = vector.shape_cast %82 : vector<8xf32> to vector<8x1xf32>
    %cst_52 = arith.constant 3.200000e+01 : f32
    %84 = vector.broadcast %cst_52 : f32 to vector<8x1xf32>
    %85 = arith.divf %83, %84 : vector<8x1xf32>
    %86 = vector.broadcast %78 : vector<8x1xf32> to vector<8x32xf32>
    %87 = arith.subf %72, %86 : vector<8x32xf32>
    %cst_53 = arith.constant 9.99999974E-6 : f32
    %88 = vector.broadcast %cst_53 : f32 to vector<8x1xf32>
    %89 = arith.addf %85, %88 : vector<8x1xf32>
    %90 = math.rsqrt %89 : vector<8x1xf32>
    %91 = vector.broadcast %90 : vector<8x1xf32> to vector<8x32xf32>
    %92 = arith.mulf %87, %91 : vector<8x32xf32>
    %93 = vector.broadcast %73 : vector<1x32xf32> to vector<8x32xf32>
    %94 = arith.mulf %92, %93 : vector<8x32xf32>
    %95 = vector.broadcast %74 : vector<1x32xf32> to vector<8x32xf32>
    %96 = arith.addf %94, %95 : vector<8x32xf32>
    %c0_54 = arith.constant 0 : index
    %c4 = arith.constant 4 : index
    %c0_55 = arith.constant 0 : index
    %c0_56 = arith.constant 0 : index
    %97 = vector.load %arg5[%c0_54, %c4, %c0_55, %c0_56] : memref<2x8x32x32xf32, #tpu.memory_space<vmem>>, vector<1x1x32x32xf32>
    %98 = vector.shape_cast %97 : vector<1x1x32x32xf32> to vector<32x32xf32>
    %99 = vector.extract_strided_slice %19 {offsets = [4, 0], sizes = [1, 32], strides = [1, 1]} : vector<8x32xf32> to vector<1x32xf32>
    %c0_57 = arith.constant 0 : index
    %c5 = arith.constant 5 : index
    %c0_58 = arith.constant 0 : index
    %c0_59 = arith.constant 0 : index
    %100 = vector.load %arg5[%c0_57, %c5, %c0_58, %c0_59] : memref<2x8x32x32xf32, #tpu.memory_space<vmem>>, vector<1x1x32x32xf32>
    %101 = vector.shape_cast %100 : vector<1x1x32x32xf32> to vector<32x32xf32>
    %102 = vector.extract_strided_slice %19 {offsets = [5, 0], sizes = [1, 32], strides = [1, 1]} : vector<8x32xf32> to vector<1x32xf32>
    %c0_60 = arith.constant 0 : index
    %c6 = arith.constant 6 : index
    %c0_61 = arith.constant 0 : index
    %c0_62 = arith.constant 0 : index
    %103 = vector.load %arg5[%c0_60, %c6, %c0_61, %c0_62] : memref<2x8x32x32xf32, #tpu.memory_space<vmem>>, vector<1x1x32x32xf32>
    %104 = vector.shape_cast %103 : vector<1x1x32x32xf32> to vector<32x32xf32>
    %105 = vector.extract_strided_slice %19 {offsets = [6, 0], sizes = [1, 32], strides = [1, 1]} : vector<8x32xf32> to vector<1x32xf32>
    %c0_63 = arith.constant 0 : index
    %c7 = arith.constant 7 : index
    %c0_64 = arith.constant 0 : index
    %c0_65 = arith.constant 0 : index
    %106 = vector.load %arg5[%c0_63, %c7, %c0_64, %c0_65] : memref<2x8x32x32xf32, #tpu.memory_space<vmem>>, vector<1x1x32x32xf32>
    %107 = vector.shape_cast %106 : vector<1x1x32x32xf32> to vector<32x32xf32>
    %108 = vector.extract_strided_slice %19 {offsets = [7, 0], sizes = [1, 32], strides = [1, 1]} : vector<8x32xf32> to vector<1x32xf32>
    %cst_66 = arith.constant dense<0.000000e+00> : vector<8x32xf32>
    %109 = tpu.matmul %96, %98, %cst_66 {dimension_numbers = #tpu.dot_dimension_numbers<[1], [0], [0], [1], [0, 0, 1, 1], [], []>} : vector<8x32xf32>, vector<32x32xf32>, vector<8x32xf32> -> vector<8x32xf32>
    %110 = vector.broadcast %99 : vector<1x32xf32> to vector<8x32xf32>
    %111 = arith.addf %109, %110 : vector<8x32xf32>
    %cst_67 = arith.constant dense<0.000000e+00> : vector<8x32xf32>
    %112 = tpu.matmul %3, %101, %cst_67 {dimension_numbers = #tpu.dot_dimension_numbers<[1], [0], [0], [1], [0, 0, 1, 1], [], []>} : vector<8x32xf32>, vector<32x32xf32>, vector<8x32xf32> -> vector<8x32xf32>
    %113 = vector.broadcast %102 : vector<1x32xf32> to vector<8x32xf32>
    %114 = arith.addf %112, %113 : vector<8x32xf32>
    %cst_68 = arith.constant dense<0.000000e+00> : vector<8x32xf32>
    %115 = tpu.matmul %3, %104, %cst_68 {dimension_numbers = #tpu.dot_dimension_numbers<[1], [0], [0], [1], [0, 0, 1, 1], [], []>} : vector<8x32xf32>, vector<32x32xf32>, vector<8x32xf32> -> vector<8x32xf32>
    %116 = vector.broadcast %105 : vector<1x32xf32> to vector<8x32xf32>
    %117 = arith.addf %115, %116 : vector<8x32xf32>
    %118 = vector.shape_cast %111 : vector<8x32xf32> to vector<8x4x8xf32>
    %119 = tpu.transpose %118, [1, 0, 2] : vector<8x4x8xf32> -> vector<4x8x8xf32>
    %120 = vector.shape_cast %114 : vector<8x32xf32> to vector<8x4x8xf32>
    %121 = tpu.transpose %120, [1, 0, 2] : vector<8x4x8xf32> -> vector<4x8x8xf32>
    %122 = vector.shape_cast %117 : vector<8x32xf32> to vector<8x4x8xf32>
    %123 = tpu.transpose %122, [1, 0, 2] : vector<8x4x8xf32> -> vector<4x8x8xf32>
    "tpu.trace_start"() <{level = 10 : i32, message = "hqd,hkd->hqk"}> : () -> ()
    %cst_69 = arith.constant dense<0.000000e+00> : vector<4x8x8xf32>
    %124 = tpu.matmul %119, %121, %cst_69 {dimension_numbers = #tpu.dot_dimension_numbers<[2], [2], [1], [1], [0, 0, 0, 1, 1, 1], [0], [0]>} : vector<4x8x8xf32>, vector<4x8x8xf32>, vector<4x8x8xf32> -> vector<4x8x8xf32>
    "tpu.trace_stop"() : () -> ()
    %cst_70 = arith.constant 0.353553385 : f32
    %125 = vector.broadcast %cst_70 : f32 to vector<4x8x8xf32>
    %126 = arith.mulf %124, %125 : vector<4x8x8xf32>
    %127 = vector.shape_cast %17 : vector<1x8xf32> to vector<1x1x8xf32>
    %128 = vector.broadcast %127 : vector<1x1x8xf32> to vector<4x8x8xf32>
    %129 = arith.addf %126, %128 : vector<4x8x8xf32>
    %cst_71 = arith.constant dense<0xFF800000> : vector<4x8xf32>
    %130 = vector.multi_reduction <maximumf>, %129, %cst_71 [2] : vector<4x8x8xf32> to vector<4x8xf32>
    %131 = vector.shape_cast %130 : vector<4x8xf32> to vector<4x8x1xf32>
    %132 = vector.broadcast %131 : vector<4x8x1xf32> to vector<4x8x8xf32>
    %133 = arith.subf %129, %132 : vector<4x8x8xf32>
    %134 = math.exp %133 : vector<4x8x8xf32>
    %cst_72 = arith.constant dense<0.000000e+00> : vector<4x8xf32>
    %135 = vector.multi_reduction <add>, %134, %cst_72 [2] : vector<4x8x8xf32> to vector<4x8xf32>
    %136 = vector.shape_cast %135 : vector<4x8xf32> to vector<4x8x1xf32>
    %137 = vector.broadcast %136 : vector<4x8x1xf32> to vector<4x8x8xf32>
    %138 = arith.divf %134, %137 : vector<4x8x8xf32>
    "tpu.trace_start"() <{level = 10 : i32, message = "hqk,hkd->hqd"}> : () -> ()
    %cst_73 = arith.constant dense<0.000000e+00> : vector<4x8x8xf32>
    %139 = tpu.matmul %138, %123, %cst_73 {dimension_numbers = #tpu.dot_dimension_numbers<[2], [1], [1], [2], [0, 0, 0, 1, 1, 2], [0], [0]>} : vector<4x8x8xf32>, vector<4x8x8xf32>, vector<4x8x8xf32> -> vector<4x8x8xf32>
    "tpu.trace_stop"() : () -> ()
    %140 = tpu.transpose %139, [1, 0, 2] : vector<4x8x8xf32> -> vector<8x4x8xf32>
    %141 = vector.shape_cast %140 : vector<8x4x8xf32> to vector<8x32xf32>
    %cst_74 = arith.constant dense<0.000000e+00> : vector<8x32xf32>
    %142 = tpu.matmul %141, %107, %cst_74 {dimension_numbers = #tpu.dot_dimension_numbers<[1], [0], [0], [1], [0, 0, 1, 1], [], []>} : vector<8x32xf32>, vector<32x32xf32>, vector<8x32xf32> -> vector<8x32xf32>
    %143 = vector.broadcast %108 : vector<1x32xf32> to vector<8x32xf32>
    %144 = arith.addf %142, %143 : vector<8x32xf32>
    %145 = arith.addf %96, %144 : vector<8x32xf32>
    %146 = vector.extract_strided_slice %21 {offsets = [1, 0], sizes = [1, 32], strides = [1, 1]} : vector<3x32xf32> to vector<1x32xf32>
    %147 = vector.extract_strided_slice %23 {offsets = [1, 0], sizes = [1, 32], strides = [1, 1]} : vector<3x32xf32> to vector<1x32xf32>
    %cst_75 = arith.constant dense<0.000000e+00> : vector<8xf32>
    %148 = vector.multi_reduction <add>, %145, %cst_75 [1] : vector<8x32xf32> to vector<8xf32>
    %149 = vector.shape_cast %148 : vector<8xf32> to vector<8x1xf32>
    %cst_76 = arith.constant 3.200000e+01 : f32
    %150 = vector.broadcast %cst_76 : f32 to vector<8x1xf32>
    %151 = arith.divf %149, %150 : vector<8x1xf32>
    %152 = vector.broadcast %151 : vector<8x1xf32> to vector<8x32xf32>
    %153 = arith.subf %145, %152 : vector<8x32xf32>
    %154 = arith.mulf %153, %153 : vector<8x32xf32>
    %cst_77 = arith.constant dense<0.000000e+00> : vector<8xf32>
    %155 = vector.multi_reduction <add>, %154, %cst_77 [1] : vector<8x32xf32> to vector<8xf32>
    %156 = vector.shape_cast %155 : vector<8xf32> to vector<8x1xf32>
    %cst_78 = arith.constant 3.200000e+01 : f32
    %157 = vector.broadcast %cst_78 : f32 to vector<8x1xf32>
    %158 = arith.divf %156, %157 : vector<8x1xf32>
    %159 = vector.broadcast %151 : vector<8x1xf32> to vector<8x32xf32>
    %160 = arith.subf %145, %159 : vector<8x32xf32>
    %cst_79 = arith.constant 9.99999974E-6 : f32
    %161 = vector.broadcast %cst_79 : f32 to vector<8x1xf32>
    %162 = arith.addf %158, %161 : vector<8x1xf32>
    %163 = math.rsqrt %162 : vector<8x1xf32>
    %164 = vector.broadcast %163 : vector<8x1xf32> to vector<8x32xf32>
    %165 = arith.mulf %160, %164 : vector<8x32xf32>
    %166 = vector.broadcast %146 : vector<1x32xf32> to vector<8x32xf32>
    %167 = arith.mulf %165, %166 : vector<8x32xf32>
    %168 = vector.broadcast %147 : vector<1x32xf32> to vector<8x32xf32>
    %169 = arith.addf %167, %168 : vector<8x32xf32>
    %c0_80 = arith.constant 0 : index
    %c0_81 = arith.constant 0 : index
    %c0_82 = arith.constant 0 : index
    %170 = vector.load %arg7[%c0_80, %c0_81, %c0_82] : memref<2x32x64xf32, #tpu.memory_space<vmem>>, vector<1x32x64xf32>
    %171 = vector.shape_cast %170 : vector<1x32x64xf32> to vector<32x64xf32>
    %cst_83 = arith.constant dense<0.000000e+00> : vector<8x64xf32>
    %172 = tpu.matmul %169, %171, %cst_83 {dimension_numbers = #tpu.dot_dimension_numbers<[1], [0], [0], [1], [0, 0, 1, 1], [], []>} : vector<8x32xf32>, vector<32x64xf32>, vector<8x64xf32> -> vector<8x64xf32>
    %c0_84 = arith.constant 0 : index
    %c0_85 = arith.constant 0 : index
    %c0_86 = arith.constant 0 : index
    %173 = vector.load %arg8[%c0_84, %c0_85, %c0_86] : memref<2x1x64xf32, #tpu.memory_space<vmem>>, vector<1x1x64xf32>
    %174 = vector.shape_cast %173 : vector<1x1x64xf32> to vector<1x64xf32>
    %175 = vector.broadcast %174 : vector<1x64xf32> to vector<8x64xf32>
    %176 = arith.addf %172, %175 : vector<8x64xf32>
    %cst_87 = arith.constant 0.000000e+00 : f32
    %177 = vector.broadcast %cst_87 : f32 to vector<8x64xf32>
    %178 = arith.maximumf %176, %177 : vector<8x64xf32>
    %c0_88 = arith.constant 0 : index
    %c0_89 = arith.constant 0 : index
    %c0_90 = arith.constant 0 : index
    %179 = vector.load %arg9[%c0_88, %c0_89, %c0_90] : memref<2x64x32xf32, #tpu.memory_space<vmem>>, vector<1x64x32xf32>
    %180 = vector.shape_cast %179 : vector<1x64x32xf32> to vector<64x32xf32>
    %cst_91 = arith.constant dense<0.000000e+00> : vector<8x32xf32>
    %181 = tpu.matmul %178, %180, %cst_91 {dimension_numbers = #tpu.dot_dimension_numbers<[1], [0], [0], [1], [0, 0, 1, 1], [], []>} : vector<8x64xf32>, vector<64x32xf32>, vector<8x32xf32> -> vector<8x32xf32>
    %c0_92 = arith.constant 0 : index
    %c0_93 = arith.constant 0 : index
    %c0_94 = arith.constant 0 : index
    %182 = vector.load %arg10[%c0_92, %c0_93, %c0_94] : memref<2x1x32xf32, #tpu.memory_space<vmem>>, vector<1x1x32xf32>
    %183 = vector.shape_cast %182 : vector<1x1x32xf32> to vector<1x32xf32>
    %184 = vector.broadcast %183 : vector<1x32xf32> to vector<8x32xf32>
    %185 = arith.addf %181, %184 : vector<8x32xf32>
    %186 = arith.addf %169, %185 : vector<8x32xf32>
    %187 = vector.extract_strided_slice %21 {offsets = [2, 0], sizes = [1, 32], strides = [1, 1]} : vector<3x32xf32> to vector<1x32xf32>
    %188 = vector.extract_strided_slice %23 {offsets = [2, 0], sizes = [1, 32], strides = [1, 1]} : vector<3x32xf32> to vector<1x32xf32>
    %cst_95 = arith.constant dense<0.000000e+00> : vector<8xf32>
    %189 = vector.multi_reduction <add>, %186, %cst_95 [1] : vector<8x32xf32> to vector<8xf32>
    %190 = vector.shape_cast %189 : vector<8xf32> to vector<8x1xf32>
    %cst_96 = arith.constant 3.200000e+01 : f32
    %191 = vector.broadcast %cst_96 : f32 to vector<8x1xf32>
    %192 = arith.divf %190, %191 : vector<8x1xf32>
    %193 = vector.broadcast %192 : vector<8x1xf32> to vector<8x32xf32>
    %194 = arith.subf %186, %193 : vector<8x32xf32>
    %195 = arith.mulf %194, %194 : vector<8x32xf32>
    %cst_97 = arith.constant dense<0.000000e+00> : vector<8xf32>
    %196 = vector.multi_reduction <add>, %195, %cst_97 [1] : vector<8x32xf32> to vector<8xf32>
    %197 = vector.shape_cast %196 : vector<8xf32> to vector<8x1xf32>
    %cst_98 = arith.constant 3.200000e+01 : f32
    %198 = vector.broadcast %cst_98 : f32 to vector<8x1xf32>
    %199 = arith.divf %197, %198 : vector<8x1xf32>
    %200 = vector.broadcast %192 : vector<8x1xf32> to vector<8x32xf32>
    %201 = arith.subf %186, %200 : vector<8x32xf32>
    %cst_99 = arith.constant 9.99999974E-6 : f32
    %202 = vector.broadcast %cst_99 : f32 to vector<8x1xf32>
    %203 = arith.addf %199, %202 : vector<8x1xf32>
    %204 = math.rsqrt %203 : vector<8x1xf32>
    %205 = vector.broadcast %204 : vector<8x1xf32> to vector<8x32xf32>
    %206 = arith.mulf %201, %205 : vector<8x32xf32>
    %207 = vector.broadcast %187 : vector<1x32xf32> to vector<8x32xf32>
    %208 = arith.mulf %206, %207 : vector<8x32xf32>
    %209 = vector.broadcast %188 : vector<1x32xf32> to vector<8x32xf32>
    %210 = arith.addf %208, %209 : vector<8x32xf32>
    %c1_100 = arith.constant 1 : index
    %c0_101 = arith.constant 0 : index
    %c0_102 = arith.constant 0 : index
    %211 = vector.load %arg6[%c1_100, %c0_101, %c0_102] : memref<2x8x32xf32, #tpu.memory_space<vmem>>, vector<1x8x32xf32>
    %212 = vector.shape_cast %211 : vector<1x8x32xf32> to vector<8x32xf32>
    %c1_103 = arith.constant 1 : index
    %c0_104 = arith.constant 0 : index
    %c0_105 = arith.constant 0 : index
    %213 = vector.load %arg11[%c1_103, %c0_104, %c0_105] : memref<2x3x32xf32, #tpu.memory_space<vmem>>, vector<1x3x32xf32>
    %214 = vector.shape_cast %213 : vector<1x3x32xf32> to vector<3x32xf32>
    %c1_106 = arith.constant 1 : index
    %c0_107 = arith.constant 0 : index
    %c0_108 = arith.constant 0 : index
    %215 = vector.load %arg12[%c1_106, %c0_107, %c0_108] : memref<2x3x32xf32, #tpu.memory_space<vmem>>, vector<1x3x32xf32>
    %216 = vector.shape_cast %215 : vector<1x3x32xf32> to vector<3x32xf32>
    %c1_109 = arith.constant 1 : index
    %c0_110 = arith.constant 0 : index
    %c0_111 = arith.constant 0 : index
    %c0_112 = arith.constant 0 : index
    %217 = vector.load %arg5[%c1_109, %c0_110, %c0_111, %c0_112] : memref<2x8x32x32xf32, #tpu.memory_space<vmem>>, vector<1x1x32x32xf32>
    %218 = vector.shape_cast %217 : vector<1x1x32x32xf32> to vector<32x32xf32>
    %219 = vector.extract_strided_slice %212 {offsets = [0, 0], sizes = [1, 32], strides = [1, 1]} : vector<8x32xf32> to vector<1x32xf32>
    %c1_113 = arith.constant 1 : index
    %c1_114 = arith.constant 1 : index
    %c0_115 = arith.constant 0 : index
    %c0_116 = arith.constant 0 : index
    %220 = vector.load %arg5[%c1_113, %c1_114, %c0_115, %c0_116] : memref<2x8x32x32xf32, #tpu.memory_space<vmem>>, vector<1x1x32x32xf32>
    %221 = vector.shape_cast %220 : vector<1x1x32x32xf32> to vector<32x32xf32>
    %222 = vector.extract_strided_slice %212 {offsets = [1, 0], sizes = [1, 32], strides = [1, 1]} : vector<8x32xf32> to vector<1x32xf32>
    %c1_117 = arith.constant 1 : index
    %c2_118 = arith.constant 2 : index
    %c0_119 = arith.constant 0 : index
    %c0_120 = arith.constant 0 : index
    %223 = vector.load %arg5[%c1_117, %c2_118, %c0_119, %c0_120] : memref<2x8x32x32xf32, #tpu.memory_space<vmem>>, vector<1x1x32x32xf32>
    %224 = vector.shape_cast %223 : vector<1x1x32x32xf32> to vector<32x32xf32>
    %225 = vector.extract_strided_slice %212 {offsets = [2, 0], sizes = [1, 32], strides = [1, 1]} : vector<8x32xf32> to vector<1x32xf32>
    %c1_121 = arith.constant 1 : index
    %c3_122 = arith.constant 3 : index
    %c0_123 = arith.constant 0 : index
    %c0_124 = arith.constant 0 : index
    %226 = vector.load %arg5[%c1_121, %c3_122, %c0_123, %c0_124] : memref<2x8x32x32xf32, #tpu.memory_space<vmem>>, vector<1x1x32x32xf32>
    %227 = vector.shape_cast %226 : vector<1x1x32x32xf32> to vector<32x32xf32>
    %228 = vector.extract_strided_slice %212 {offsets = [3, 0], sizes = [1, 32], strides = [1, 1]} : vector<8x32xf32> to vector<1x32xf32>
    %cst_125 = arith.constant dense<0.000000e+00> : vector<8x32xf32>
    %229 = tpu.matmul %210, %218, %cst_125 {dimension_numbers = #tpu.dot_dimension_numbers<[1], [0], [0], [1], [0, 0, 1, 1], [], []>} : vector<8x32xf32>, vector<32x32xf32>, vector<8x32xf32> -> vector<8x32xf32>
    %230 = vector.broadcast %219 : vector<1x32xf32> to vector<8x32xf32>
    %231 = arith.addf %229, %230 : vector<8x32xf32>
    %cst_126 = arith.constant dense<0.000000e+00> : vector<8x32xf32>
    %232 = tpu.matmul %210, %221, %cst_126 {dimension_numbers = #tpu.dot_dimension_numbers<[1], [0], [0], [1], [0, 0, 1, 1], [], []>} : vector<8x32xf32>, vector<32x32xf32>, vector<8x32xf32> -> vector<8x32xf32>
    %233 = vector.broadcast %222 : vector<1x32xf32> to vector<8x32xf32>
    %234 = arith.addf %232, %233 : vector<8x32xf32>
    %cst_127 = arith.constant dense<0.000000e+00> : vector<8x32xf32>
    %235 = tpu.matmul %210, %224, %cst_127 {dimension_numbers = #tpu.dot_dimension_numbers<[1], [0], [0], [1], [0, 0, 1, 1], [], []>} : vector<8x32xf32>, vector<32x32xf32>, vector<8x32xf32> -> vector<8x32xf32>
    %236 = vector.broadcast %225 : vector<1x32xf32> to vector<8x32xf32>
    %237 = arith.addf %235, %236 : vector<8x32xf32>
    %238 = vector.shape_cast %231 : vector<8x32xf32> to vector<8x4x8xf32>
    %239 = tpu.transpose %238, [1, 0, 2] : vector<8x4x8xf32> -> vector<4x8x8xf32>
    %240 = vector.shape_cast %234 : vector<8x32xf32> to vector<8x4x8xf32>
    %241 = tpu.transpose %240, [1, 0, 2] : vector<8x4x8xf32> -> vector<4x8x8xf32>
    %242 = vector.shape_cast %237 : vector<8x32xf32> to vector<8x4x8xf32>
    %243 = tpu.transpose %242, [1, 0, 2] : vector<8x4x8xf32> -> vector<4x8x8xf32>
    "tpu.trace_start"() <{level = 10 : i32, message = "hqd,hkd->hqk"}> : () -> ()
    %cst_128 = arith.constant dense<0.000000e+00> : vector<4x8x8xf32>
    %244 = tpu.matmul %239, %241, %cst_128 {dimension_numbers = #tpu.dot_dimension_numbers<[2], [2], [1], [1], [0, 0, 0, 1, 1, 1], [0], [0]>} : vector<4x8x8xf32>, vector<4x8x8xf32>, vector<4x8x8xf32> -> vector<4x8x8xf32>
    "tpu.trace_stop"() : () -> ()
    %cst_129 = arith.constant 0.353553385 : f32
    %245 = vector.broadcast %cst_129 : f32 to vector<4x8x8xf32>
    %246 = arith.mulf %244, %245 : vector<4x8x8xf32>
    %247 = vector.shape_cast %10 : vector<8x8xf32> to vector<1x8x8xf32>
    %248 = vector.broadcast %247 : vector<1x8x8xf32> to vector<4x8x8xf32>
    %249 = arith.addf %246, %248 : vector<4x8x8xf32>
    %cst_130 = arith.constant dense<0xFF800000> : vector<4x8xf32>
    %250 = vector.multi_reduction <maximumf>, %249, %cst_130 [2] : vector<4x8x8xf32> to vector<4x8xf32>
    %251 = vector.shape_cast %250 : vector<4x8xf32> to vector<4x8x1xf32>
    %252 = vector.broadcast %251 : vector<4x8x1xf32> to vector<4x8x8xf32>
    %253 = arith.subf %249, %252 : vector<4x8x8xf32>
    %254 = math.exp %253 : vector<4x8x8xf32>
    %cst_131 = arith.constant dense<0.000000e+00> : vector<4x8xf32>
    %255 = vector.multi_reduction <add>, %254, %cst_131 [2] : vector<4x8x8xf32> to vector<4x8xf32>
    %256 = vector.shape_cast %255 : vector<4x8xf32> to vector<4x8x1xf32>
    %257 = vector.broadcast %256 : vector<4x8x1xf32> to vector<4x8x8xf32>
    %258 = arith.divf %254, %257 : vector<4x8x8xf32>
    "tpu.trace_start"() <{level = 10 : i32, message = "hqk,hkd->hqd"}> : () -> ()
    %cst_132 = arith.constant dense<0.000000e+00> : vector<4x8x8xf32>
    %259 = tpu.matmul %258, %243, %cst_132 {dimension_numbers = #tpu.dot_dimension_numbers<[2], [1], [1], [2], [0, 0, 0, 1, 1, 2], [0], [0]>} : vector<4x8x8xf32>, vector<4x8x8xf32>, vector<4x8x8xf32> -> vector<4x8x8xf32>
    "tpu.trace_stop"() : () -> ()
    %260 = tpu.transpose %259, [1, 0, 2] : vector<4x8x8xf32> -> vector<8x4x8xf32>
    %261 = vector.shape_cast %260 : vector<8x4x8xf32> to vector<8x32xf32>
    %cst_133 = arith.constant dense<0.000000e+00> : vector<8x32xf32>
    %262 = tpu.matmul %261, %227, %cst_133 {dimension_numbers = #tpu.dot_dimension_numbers<[1], [0], [0], [1], [0, 0, 1, 1], [], []>} : vector<8x32xf32>, vector<32x32xf32>, vector<8x32xf32> -> vector<8x32xf32>
    %263 = vector.broadcast %228 : vector<1x32xf32> to vector<8x32xf32>
    %264 = arith.addf %262, %263 : vector<8x32xf32>
    %265 = arith.addf %210, %264 : vector<8x32xf32>
    %266 = vector.extract_strided_slice %214 {offsets = [0, 0], sizes = [1, 32], strides = [1, 1]} : vector<3x32xf32> to vector<1x32xf32>
    %267 = vector.extract_strided_slice %216 {offsets = [0, 0], sizes = [1, 32], strides = [1, 1]} : vector<3x32xf32> to vector<1x32xf32>
    %cst_134 = arith.constant dense<0.000000e+00> : vector<8xf32>
    %268 = vector.multi_reduction <add>, %265, %cst_134 [1] : vector<8x32xf32> to vector<8xf32>
    %269 = vector.shape_cast %268 : vector<8xf32> to vector<8x1xf32>
    %cst_135 = arith.constant 3.200000e+01 : f32
    %270 = vector.broadcast %cst_135 : f32 to vector<8x1xf32>
    %271 = arith.divf %269, %270 : vector<8x1xf32>
    %272 = vector.broadcast %271 : vector<8x1xf32> to vector<8x32xf32>
    %273 = arith.subf %265, %272 : vector<8x32xf32>
    %274 = arith.mulf %273, %273 : vector<8x32xf32>
    %cst_136 = arith.constant dense<0.000000e+00> : vector<8xf32>
    %275 = vector.multi_reduction <add>, %274, %cst_136 [1] : vector<8x32xf32> to vector<8xf32>
    %276 = vector.shape_cast %275 : vector<8xf32> to vector<8x1xf32>
    %cst_137 = arith.constant 3.200000e+01 : f32
    %277 = vector.broadcast %cst_137 : f32 to vector<8x1xf32>
    %278 = arith.divf %276, %277 : vector<8x1xf32>
    %279 = vector.broadcast %271 : vector<8x1xf32> to vector<8x32xf32>
    %280 = arith.subf %265, %279 : vector<8x32xf32>
    %cst_138 = arith.constant 9.99999974E-6 : f32
    %281 = vector.broadcast %cst_138 : f32 to vector<8x1xf32>
    %282 = arith.addf %278, %281 : vector<8x1xf32>
    %283 = math.rsqrt %282 : vector<8x1xf32>
    %284 = vector.broadcast %283 : vector<8x1xf32> to vector<8x32xf32>
    %285 = arith.mulf %280, %284 : vector<8x32xf32>
    %286 = vector.broadcast %266 : vector<1x32xf32> to vector<8x32xf32>
    %287 = arith.mulf %285, %286 : vector<8x32xf32>
    %288 = vector.broadcast %267 : vector<1x32xf32> to vector<8x32xf32>
    %289 = arith.addf %287, %288 : vector<8x32xf32>
    %c1_139 = arith.constant 1 : index
    %c4_140 = arith.constant 4 : index
    %c0_141 = arith.constant 0 : index
    %c0_142 = arith.constant 0 : index
    %290 = vector.load %arg5[%c1_139, %c4_140, %c0_141, %c0_142] : memref<2x8x32x32xf32, #tpu.memory_space<vmem>>, vector<1x1x32x32xf32>
    %291 = vector.shape_cast %290 : vector<1x1x32x32xf32> to vector<32x32xf32>
    %292 = vector.extract_strided_slice %212 {offsets = [4, 0], sizes = [1, 32], strides = [1, 1]} : vector<8x32xf32> to vector<1x32xf32>
    %c1_143 = arith.constant 1 : index
    %c5_144 = arith.constant 5 : index
    %c0_145 = arith.constant 0 : index
    %c0_146 = arith.constant 0 : index
    %293 = vector.load %arg5[%c1_143, %c5_144, %c0_145, %c0_146] : memref<2x8x32x32xf32, #tpu.memory_space<vmem>>, vector<1x1x32x32xf32>
    %294 = vector.shape_cast %293 : vector<1x1x32x32xf32> to vector<32x32xf32>
    %295 = vector.extract_strided_slice %212 {offsets = [5, 0], sizes = [1, 32], strides = [1, 1]} : vector<8x32xf32> to vector<1x32xf32>
    %c1_147 = arith.constant 1 : index
    %c6_148 = arith.constant 6 : index
    %c0_149 = arith.constant 0 : index
    %c0_150 = arith.constant 0 : index
    %296 = vector.load %arg5[%c1_147, %c6_148, %c0_149, %c0_150] : memref<2x8x32x32xf32, #tpu.memory_space<vmem>>, vector<1x1x32x32xf32>
    %297 = vector.shape_cast %296 : vector<1x1x32x32xf32> to vector<32x32xf32>
    %298 = vector.extract_strided_slice %212 {offsets = [6, 0], sizes = [1, 32], strides = [1, 1]} : vector<8x32xf32> to vector<1x32xf32>
    %c1_151 = arith.constant 1 : index
    %c7_152 = arith.constant 7 : index
    %c0_153 = arith.constant 0 : index
    %c0_154 = arith.constant 0 : index
    %299 = vector.load %arg5[%c1_151, %c7_152, %c0_153, %c0_154] : memref<2x8x32x32xf32, #tpu.memory_space<vmem>>, vector<1x1x32x32xf32>
    %300 = vector.shape_cast %299 : vector<1x1x32x32xf32> to vector<32x32xf32>
    %301 = vector.extract_strided_slice %212 {offsets = [7, 0], sizes = [1, 32], strides = [1, 1]} : vector<8x32xf32> to vector<1x32xf32>
    %cst_155 = arith.constant dense<0.000000e+00> : vector<8x32xf32>
    %302 = tpu.matmul %289, %291, %cst_155 {dimension_numbers = #tpu.dot_dimension_numbers<[1], [0], [0], [1], [0, 0, 1, 1], [], []>} : vector<8x32xf32>, vector<32x32xf32>, vector<8x32xf32> -> vector<8x32xf32>
    %303 = vector.broadcast %292 : vector<1x32xf32> to vector<8x32xf32>
    %304 = arith.addf %302, %303 : vector<8x32xf32>
    %cst_156 = arith.constant dense<0.000000e+00> : vector<8x32xf32>
    %305 = tpu.matmul %3, %294, %cst_156 {dimension_numbers = #tpu.dot_dimension_numbers<[1], [0], [0], [1], [0, 0, 1, 1], [], []>} : vector<8x32xf32>, vector<32x32xf32>, vector<8x32xf32> -> vector<8x32xf32>
    %306 = vector.broadcast %295 : vector<1x32xf32> to vector<8x32xf32>
    %307 = arith.addf %305, %306 : vector<8x32xf32>
    %cst_157 = arith.constant dense<0.000000e+00> : vector<8x32xf32>
    %308 = tpu.matmul %3, %297, %cst_157 {dimension_numbers = #tpu.dot_dimension_numbers<[1], [0], [0], [1], [0, 0, 1, 1], [], []>} : vector<8x32xf32>, vector<32x32xf32>, vector<8x32xf32> -> vector<8x32xf32>
    %309 = vector.broadcast %298 : vector<1x32xf32> to vector<8x32xf32>
    %310 = arith.addf %308, %309 : vector<8x32xf32>
    %311 = vector.shape_cast %304 : vector<8x32xf32> to vector<8x4x8xf32>
    %312 = tpu.transpose %311, [1, 0, 2] : vector<8x4x8xf32> -> vector<4x8x8xf32>
    %313 = vector.shape_cast %307 : vector<8x32xf32> to vector<8x4x8xf32>
    %314 = tpu.transpose %313, [1, 0, 2] : vector<8x4x8xf32> -> vector<4x8x8xf32>
    %315 = vector.shape_cast %310 : vector<8x32xf32> to vector<8x4x8xf32>
    %316 = tpu.transpose %315, [1, 0, 2] : vector<8x4x8xf32> -> vector<4x8x8xf32>
    "tpu.trace_start"() <{level = 10 : i32, message = "hqd,hkd->hqk"}> : () -> ()
    %cst_158 = arith.constant dense<0.000000e+00> : vector<4x8x8xf32>
    %317 = tpu.matmul %312, %314, %cst_158 {dimension_numbers = #tpu.dot_dimension_numbers<[2], [2], [1], [1], [0, 0, 0, 1, 1, 1], [0], [0]>} : vector<4x8x8xf32>, vector<4x8x8xf32>, vector<4x8x8xf32> -> vector<4x8x8xf32>
    "tpu.trace_stop"() : () -> ()
    %cst_159 = arith.constant 0.353553385 : f32
    %318 = vector.broadcast %cst_159 : f32 to vector<4x8x8xf32>
    %319 = arith.mulf %317, %318 : vector<4x8x8xf32>
    %320 = vector.shape_cast %17 : vector<1x8xf32> to vector<1x1x8xf32>
    %321 = vector.broadcast %320 : vector<1x1x8xf32> to vector<4x8x8xf32>
    %322 = arith.addf %319, %321 : vector<4x8x8xf32>
    %cst_160 = arith.constant dense<0xFF800000> : vector<4x8xf32>
    %323 = vector.multi_reduction <maximumf>, %322, %cst_160 [2] : vector<4x8x8xf32> to vector<4x8xf32>
    %324 = vector.shape_cast %323 : vector<4x8xf32> to vector<4x8x1xf32>
    %325 = vector.broadcast %324 : vector<4x8x1xf32> to vector<4x8x8xf32>
    %326 = arith.subf %322, %325 : vector<4x8x8xf32>
    %327 = math.exp %326 : vector<4x8x8xf32>
    %cst_161 = arith.constant dense<0.000000e+00> : vector<4x8xf32>
    %328 = vector.multi_reduction <add>, %327, %cst_161 [2] : vector<4x8x8xf32> to vector<4x8xf32>
    %329 = vector.shape_cast %328 : vector<4x8xf32> to vector<4x8x1xf32>
    %330 = vector.broadcast %329 : vector<4x8x1xf32> to vector<4x8x8xf32>
    %331 = arith.divf %327, %330 : vector<4x8x8xf32>
    "tpu.trace_start"() <{level = 10 : i32, message = "hqk,hkd->hqd"}> : () -> ()
    %cst_162 = arith.constant dense<0.000000e+00> : vector<4x8x8xf32>
    %332 = tpu.matmul %331, %316, %cst_162 {dimension_numbers = #tpu.dot_dimension_numbers<[2], [1], [1], [2], [0, 0, 0, 1, 1, 2], [0], [0]>} : vector<4x8x8xf32>, vector<4x8x8xf32>, vector<4x8x8xf32> -> vector<4x8x8xf32>
    "tpu.trace_stop"() : () -> ()
    %333 = tpu.transpose %332, [1, 0, 2] : vector<4x8x8xf32> -> vector<8x4x8xf32>
    %334 = vector.shape_cast %333 : vector<8x4x8xf32> to vector<8x32xf32>
    %cst_163 = arith.constant dense<0.000000e+00> : vector<8x32xf32>
    %335 = tpu.matmul %334, %300, %cst_163 {dimension_numbers = #tpu.dot_dimension_numbers<[1], [0], [0], [1], [0, 0, 1, 1], [], []>} : vector<8x32xf32>, vector<32x32xf32>, vector<8x32xf32> -> vector<8x32xf32>
    %336 = vector.broadcast %301 : vector<1x32xf32> to vector<8x32xf32>
    %337 = arith.addf %335, %336 : vector<8x32xf32>
    %c0_164 = arith.constant 0 : index
    %c0_165 = arith.constant 0 : index
    %c0_166 = arith.constant 0 : index
    %c0_167 = arith.constant 0 : index
    %338 = vector.load %arg16[%c0_164, %c0_165, %c0_166, %c0_167] : memref<1x4x8x8xf32, #tpu.memory_space<vmem>>, vector<1x4x8x8xf32>
    %339 = vector.shape_cast %338 : vector<1x4x8x8xf32> to vector<4x8x8xf32>
    %340 = vector.shape_cast %331 : vector<4x8x8xf32> to vector<1x4x8x8xf32>
    tpu.vector_store %arg16[%c0_164, %c0_165, %c0_166, %c0_167], %340 {strides = array<i32>} : memref<1x4x8x8xf32, #tpu.memory_space<vmem>>, vector<1x4x8x8xf32>,
    %341 = arith.addf %289, %337 : vector<8x32xf32>
    %342 = vector.extract_strided_slice %214 {offsets = [1, 0], sizes = [1, 32], strides = [1, 1]} : vector<3x32xf32> to vector<1x32xf32>
    %343 = vector.extract_strided_slice %216 {offsets = [1, 0], sizes = [1, 32], strides = [1, 1]} : vector<3x32xf32> to vector<1x32xf32>
    %cst_168 = arith.constant dense<0.000000e+00> : vector<8xf32>
    %344 = vector.multi_reduction <add>, %341, %cst_168 [1] : vector<8x32xf32> to vector<8xf32>
    %345 = vector.shape_cast %344 : vector<8xf32> to vector<8x1xf32>
    %cst_169 = arith.constant 3.200000e+01 : f32
    %346 = vector.broadcast %cst_169 : f32 to vector<8x1xf32>
    %347 = arith.divf %345, %346 : vector<8x1xf32>
    %348 = vector.broadcast %347 : vector<8x1xf32> to vector<8x32xf32>
    %349 = arith.subf %341, %348 : vector<8x32xf32>
    %350 = arith.mulf %349, %349 : vector<8x32xf32>
    %cst_170 = arith.constant dense<0.000000e+00> : vector<8xf32>
    %351 = vector.multi_reduction <add>, %350, %cst_170 [1] : vector<8x32xf32> to vector<8xf32>
    %352 = vector.shape_cast %351 : vector<8xf32> to vector<8x1xf32>
    %cst_171 = arith.constant 3.200000e+01 : f32
    %353 = vector.broadcast %cst_171 : f32 to vector<8x1xf32>
    %354 = arith.divf %352, %353 : vector<8x1xf32>
    %355 = vector.broadcast %347 : vector<8x1xf32> to vector<8x32xf32>
    %356 = arith.subf %341, %355 : vector<8x32xf32>
    %cst_172 = arith.constant 9.99999974E-6 : f32
    %357 = vector.broadcast %cst_172 : f32 to vector<8x1xf32>
    %358 = arith.addf %354, %357 : vector<8x1xf32>
    %359 = math.rsqrt %358 : vector<8x1xf32>
    %360 = vector.broadcast %359 : vector<8x1xf32> to vector<8x32xf32>
    %361 = arith.mulf %356, %360 : vector<8x32xf32>
    %362 = vector.broadcast %342 : vector<1x32xf32> to vector<8x32xf32>
    %363 = arith.mulf %361, %362 : vector<8x32xf32>
    %364 = vector.broadcast %343 : vector<1x32xf32> to vector<8x32xf32>
    %365 = arith.addf %363, %364 : vector<8x32xf32>
    %c1_173 = arith.constant 1 : index
    %c0_174 = arith.constant 0 : index
    %c0_175 = arith.constant 0 : index
    %366 = vector.load %arg7[%c1_173, %c0_174, %c0_175] : memref<2x32x64xf32, #tpu.memory_space<vmem>>, vector<1x32x64xf32>
    %367 = vector.shape_cast %366 : vector<1x32x64xf32> to vector<32x64xf32>
    %cst_176 = arith.constant dense<0.000000e+00> : vector<8x64xf32>
    %368 = tpu.matmul %365, %367, %cst_176 {dimension_numbers = #tpu.dot_dimension_numbers<[1], [0], [0], [1], [0, 0, 1, 1], [], []>} : vector<8x32xf32>, vector<32x64xf32>, vector<8x64xf32> -> vector<8x64xf32>
    %c1_177 = arith.constant 1 : index
    %c0_178 = arith.constant 0 : index
    %c0_179 = arith.constant 0 : index
    %369 = vector.load %arg8[%c1_177, %c0_178, %c0_179] : memref<2x1x64xf32, #tpu.memory_space<vmem>>, vector<1x1x64xf32>
    %370 = vector.shape_cast %369 : vector<1x1x64xf32> to vector<1x64xf32>
    %371 = vector.broadcast %370 : vector<1x64xf32> to vector<8x64xf32>
    %372 = arith.addf %368, %371 : vector<8x64xf32>
    %cst_180 = arith.constant 0.000000e+00 : f32
    %373 = vector.broadcast %cst_180 : f32 to vector<8x64xf32>
    %374 = arith.maximumf %372, %373 : vector<8x64xf32>
    %c1_181 = arith.constant 1 : index
    %c0_182 = arith.constant 0 : index
    %c0_183 = arith.constant 0 : index
    %375 = vector.load %arg9[%c1_181, %c0_182, %c0_183] : memref<2x64x32xf32, #tpu.memory_space<vmem>>, vector<1x64x32xf32>
    %376 = vector.shape_cast %375 : vector<1x64x32xf32> to vector<64x32xf32>
    %cst_184 = arith.constant dense<0.000000e+00> : vector<8x32xf32>
    %377 = tpu.matmul %374, %376, %cst_184 {dimension_numbers = #tpu.dot_dimension_numbers<[1], [0], [0], [1], [0, 0, 1, 1], [], []>} : vector<8x64xf32>, vector<64x32xf32>, vector<8x32xf32> -> vector<8x32xf32>
    %c1_185 = arith.constant 1 : index
    %c0_186 = arith.constant 0 : index
    %c0_187 = arith.constant 0 : index
    %378 = vector.load %arg10[%c1_185, %c0_186, %c0_187] : memref<2x1x32xf32, #tpu.memory_space<vmem>>, vector<1x1x32xf32>
    %379 = vector.shape_cast %378 : vector<1x1x32xf32> to vector<1x32xf32>
    %380 = vector.broadcast %379 : vector<1x32xf32> to vector<8x32xf32>
    %381 = arith.addf %377, %380 : vector<8x32xf32>
    %382 = arith.addf %365, %381 : vector<8x32xf32>
    %383 = vector.extract_strided_slice %214 {offsets = [2, 0], sizes = [1, 32], strides = [1, 1]} : vector<3x32xf32> to vector<1x32xf32>
    %384 = vector.extract_strided_slice %216 {offsets = [2, 0], sizes = [1, 32], strides = [1, 1]} : vector<3x32xf32> to vector<1x32xf32>
    %cst_188 = arith.constant dense<0.000000e+00> : vector<8xf32>
    %385 = vector.multi_reduction <add>, %382, %cst_188 [1] : vector<8x32xf32> to vector<8xf32>
    %386 = vector.shape_cast %385 : vector<8xf32> to vector<8x1xf32>
    %cst_189 = arith.constant 3.200000e+01 : f32
    %387 = vector.broadcast %cst_189 : f32 to vector<8x1xf32>
    %388 = arith.divf %386, %387 : vector<8x1xf32>
    %389 = vector.broadcast %388 : vector<8x1xf32> to vector<8x32xf32>
    %390 = arith.subf %382, %389 : vector<8x32xf32>
    %391 = arith.mulf %390, %390 : vector<8x32xf32>
    %cst_190 = arith.constant dense<0.000000e+00> : vector<8xf32>
    %392 = vector.multi_reduction <add>, %391, %cst_190 [1] : vector<8x32xf32> to vector<8xf32>
    %393 = vector.shape_cast %392 : vector<8xf32> to vector<8x1xf32>
    %cst_191 = arith.constant 3.200000e+01 : f32
    %394 = vector.broadcast %cst_191 : f32 to vector<8x1xf32>
    %395 = arith.divf %393, %394 : vector<8x1xf32>
    %396 = vector.broadcast %388 : vector<8x1xf32> to vector<8x32xf32>
    %397 = arith.subf %382, %396 : vector<8x32xf32>
    %cst_192 = arith.constant 9.99999974E-6 : f32
    %398 = vector.broadcast %cst_192 : f32 to vector<8x1xf32>
    %399 = arith.addf %395, %398 : vector<8x1xf32>
    %400 = math.rsqrt %399 : vector<8x1xf32>
    %401 = vector.broadcast %400 : vector<8x1xf32> to vector<8x32xf32>
    %402 = arith.mulf %397, %401 : vector<8x32xf32>
    %403 = vector.broadcast %383 : vector<1x32xf32> to vector<8x32xf32>
    %404 = arith.mulf %402, %403 : vector<8x32xf32>
    %405 = vector.broadcast %384 : vector<1x32xf32> to vector<8x32xf32>
    %406 = arith.addf %404, %405 : vector<8x32xf32>
    %c0_193 = arith.constant 0 : index
    %c0_194 = arith.constant 0 : index
    %407 = vector.load %arg13[%c0_193, %c0_194] : memref<32x128xf32, #tpu.memory_space<vmem>>, vector<32x128xf32>
    %cst_195 = arith.constant dense<0.000000e+00> : vector<8x128xf32>
    %408 = tpu.matmul %406, %407, %cst_195 {dimension_numbers = #tpu.dot_dimension_numbers<[1], [0], [0], [1], [0, 0, 1, 1], [], []>} : vector<8x32xf32>, vector<32x128xf32>, vector<8x128xf32> -> vector<8x128xf32>
    %c0_196 = arith.constant 0 : index
    %c0_197 = arith.constant 0 : index
    %409 = vector.load %arg14[%c0_196, %c0_197] : memref<1x128xf32, #tpu.memory_space<vmem>>, vector<1x128xf32>
    %410 = vector.broadcast %409 : vector<1x128xf32> to vector<8x128xf32>
    %411 = arith.addf %408, %410 : vector<8x128xf32>
    %c0_198 = arith.constant 0 : index
    %c0_199 = arith.constant 0 : index
    %c0_200 = arith.constant 0 : index
    %412 = vector.load %arg15[%c0_198, %c0_199, %c0_200] : memref<1x8x128xf32, #tpu.memory_space<vmem>>, vector<1x8x128xf32>
    %413 = vector.shape_cast %412 : vector<1x8x128xf32> to vector<8x128xf32>
    %414 = vector.shape_cast %411 : vector<8x128xf32> to vector<1x8x128xf32>
    tpu.vector_store %arg15[%c0_198, %c0_199, %c0_200], %414 {strides = array<i32>} : memref<1x8x128xf32, #tpu.memory_space<vmem>>, vector<1x8x128xf32>,
    return
  }
  func.func @transform_0(%arg0: i32) -> (i32, i32, i32) {
    %c0_i32 = arith.constant 0 : i32
    %c0_i32_0 = arith.constant 0 : i32
    %c0_i32_1 = arith.constant 0 : i32
    return %arg0, %c0_i32, %c0_i32_0 : i32, i32, i32
  }
  func.func @transform_1(%arg0: i32) -> (i32, i32, i32) {
    %c0_i32 = arith.constant 0 : i32
    %c0_i32_0 = arith.constant 0 : i32
    %c0_i32_1 = arith.constant 0 : i32
    return %arg0, %c0_i32, %c0_i32_0 : i32, i32, i32
  }
  func.func @transform_2(%arg0: i32) -> (i32, i32, i32, i32) {
    %c0_i32 = arith.constant 0 : i32
    %c0_i32_0 = arith.constant 0 : i32
    %c0_i32_1 = arith.constant 0 : i32
    %c0_i32_2 = arith.constant 0 : i32
    return %arg0, %c0_i32, %c0_i32_0, %c0_i32_1 : i32, i32, i32, i32
  }
  func.func @transform_3(%arg0: i32) -> (i32, i32, i32, i32) {
    %c0_i32 = arith.constant 0 : i32
    %c0_i32_0 = arith.constant 0 : i32
    %c0_i32_1 = arith.constant 0 : i32
    %c0_i32_2 = arith.constant 0 : i32
    return %arg0, %c0_i32, %c0_i32_0, %c0_i32_1 : i32, i32, i32, i32
  }
  func.func @transform_4(%arg0: i32) -> (i32, i32, i32, i32) {
    %c0_i32 = arith.constant 0 : i32
    %c0_i32_0 = arith.constant 0 : i32
    %c0_i32_1 = arith.constant 0 : i32
    %c0_i32_2 = arith.constant 0 : i32
    %c0_i32_3 = arith.constant 0 : i32
    return %c0_i32, %c0_i32_0, %c0_i32_1, %c0_i32_2 : i32, i32, i32, i32
  }
  func.func @transform_5(%arg0: i32) -> (i32, i32, i32) {
    %c0_i32 = arith.constant 0 : i32
    %c0_i32_0 = arith.constant 0 : i32
    %c0_i32_1 = arith.constant 0 : i32
    %c0_i32_2 = arith.constant 0 : i32
    return %c0_i32, %c0_i32_0, %c0_i32_1 : i32, i32, i32
  }
  func.func @transform_6(%arg0: i32) -> (i32, i32, i32) {
    %c0_i32 = arith.constant 0 : i32
    %c0_i32_0 = arith.constant 0 : i32
    %c0_i32_1 = arith.constant 0 : i32
    %c0_i32_2 = arith.constant 0 : i32
    return %c0_i32, %c0_i32_0, %c0_i32_1 : i32, i32, i32
  }
  func.func @transform_7(%arg0: i32) -> (i32, i32, i32) {
    %c0_i32 = arith.constant 0 : i32
    %c0_i32_0 = arith.constant 0 : i32
    %c0_i32_1 = arith.constant 0 : i32
    %c0_i32_2 = arith.constant 0 : i32
    return %c0_i32, %c0_i32_0, %c0_i32_1 : i32, i32, i32
  }
  func.func @transform_8(%arg0: i32) -> (i32, i32, i32) {
    %c0_i32 = arith.constant 0 : i32
    %c0_i32_0 = arith.constant 0 : i32
    %c0_i32_1 = arith.constant 0 : i32
    %c0_i32_2 = arith.constant 0 : i32
    return %c0_i32, %c0_i32_0, %c0_i32_1 : i32, i32, i32
  }
  func.func @transform_9(%arg0: i32) -> (i32, i32, i32) {
    %c0_i32 = arith.constant 0 : i32
    %c0_i32_0 = arith.constant 0 : i32
    %c0_i32_1 = arith.constant 0 : i32
    %c0_i32_2 = arith.constant 0 : i32
    return %c0_i32, %c0_i32_0, %c0_i32_1 : i32, i32, i32
  }
  func.func @transform_10(%arg0: i32) -> (i32, i32, i32) {
    %c0_i32 = arith.constant 0 : i32
    %c0_i32_0 = arith.constant 0 : i32
    %c0_i32_1 = arith.constant 0 : i32
    %c0_i32_2 = arith.constant 0 : i32
    return %c0_i32, %c0_i32_0, %c0_i32_1 : i32, i32, i32
  }
  func.func @transform_11(%arg0: i32) -> (i32, i32, i32) {
    %c0_i32 = arith.constant 0 : i32
    %c0_i32_0 = arith.constant 0 : i32
    %c0_i32_1 = arith.constant 0 : i32
    %c0_i32_2 = arith.constant 0 : i32
    return %c0_i32, %c0_i32_0, %c0_i32_1 : i32, i32, i32
  }
  func.func @transform_12(%arg0: i32) -> (i32, i32) {
    %c0_i32 = arith.constant 0 : i32
    %c0_i32_0 = arith.constant 0 : i32
    %c0_i32_1 = arith.constant 0 : i32
    return %c0_i32, %c0_i32_0 : i32, i32
  }
  func.func @transform_13(%arg0: i32) -> (i32, i32) {
    %c0_i32 = arith.constant 0 : i32
    %c0_i32_0 = arith.constant 0 : i32
    %c0_i32_1 = arith.constant 0 : i32
    return %c0_i32, %c0_i32_0 : i32, i32
  }
  func.func @transform_14(%arg0: i32) -> (i32, i32, i32) {
    %c0_i32 = arith.constant 0 : i32
    %c0_i32_0 = arith.constant 0 : i32
    %c0_i32_1 = arith.constant 0 : i32
    return %arg0, %c0_i32, %c0_i32_0 : i32, i32, i32
  }
  func.func @transform_15(%arg0: i32) -> (i32, i32, i32, i32) {
    %c0_i32 = arith.constant 0 : i32
    %c0_i32_0 = arith.constant 0 : i32
    %c0_i32_1 = arith.constant 0 : i32
    %c0_i32_2 = arith.constant 0 : i32
    return %arg0, %c0_i32, %c0_i32_0, %c0_i32_1 : i32, i32, i32, i32
  }
}

</mosaic_0001>

<bundles_post_ra>
// kernel: tpu_custom_call.1
= control target key start
LH: loop header
LB: loop body
LE: loop exit
PB: predicated region body
PF: predicated region fallthrough
CT: control target
= control target key end

     0   :  { %s9957_s0 = inlined_call_operand.vmem [shape: f32[2,8,32], index: 0, kind: input, shape index: {}]   ;;  %s9958_s1 = inlined_call_operand.vmem [shape: f32[2,8,32], index: 1, kind: input, shape index: {}]   ;;  %s9959_s2 = inlined_call_operand.vmem [shape: f32[2,1,8,8], index: 2, kind: input, shape index: {}]   ;;  %s9960_s3 = inlined_call_operand.vmem [shape: f32[2,1,1,8], index: 3, kind: input, shape index: {}]   ;;  %s9961_s4 = inlined_call_operand.hbm [shape: f32[2,8,32,32], index: 4, kind: input, shape index: {}]   ;;  %s9962_s5 = inlined_call_operand.vmem [shape: f32[2,8,32], index: 5, kind: input, shape index: {}]   ;;  %s9963_s6 = inlined_call_operand.vmem [shape: f32[2,32,64], index: 6, kind: input, shape index: {}]   ;;  %s9964_s7 = inlined_call_operand.vmem [shape: f32[2,1,64], index: 7, kind: input, shape index: {}]   ;;  %s9965_s8 = inlined_call_operand.vmem [shape: f32[2,64,32], index: 8, kind: input, shape index: {}]   ;;  %s9966_s9 = inlined_call_operand.vmem [shape: f32[2,1,32], index: 9, kind: input, shape index: {}]   ;;  %s9967_s10 = inlined_call_operand.vmem [shape: f32[2,3,32], index: 10, kind: input, shape index: {}]   ;;  %s9968_s11 = inlined_call_operand.vmem [shape: f32[2,3,32], index: 11, kind: input, shape index: {}]   ;;  %s9969_s12 = inlined_call_operand.vmem [shape: f32[32,128], index: 12, kind: input, shape index: {}]   ;;  %s9970_s13 = inlined_call_operand.vmem [shape: f32[1,128], index: 13, kind: input, shape index: {}]   ;;  %s9971_s14 = inlined_call_operand.hbm [shape: f32[2,8,128], index: 14, kind: output, shape index: {0}]   ;;  %s9972_s15 = inlined_call_operand.hbm [shape: f32[2,4,8,8], index: 15, kind: output, shape index: {1}]  }
   0x1   :  { %9993 = sst [smem:[#allocation16_spill]] %s9957_s0 }
   0x2   :  { %9994 = sst [smem:[#allocation17_spill]] %s9958_s1 }
   0x3   :  { %9995 = sst [smem:[#allocation18_spill]] %s9959_s2 }
   0x4   :  { %9996 = sst [smem:[#allocation19_spill]] %s9960_s3 }
   0x5   :  { %21 = vsyncpa [#allocation3], 0 }
   0x6   :  { %22 = vsyncpa [#allocation4], 0 }
   0x7   :  { %24 = vsyncpa [#allocation4 + $0x1], 0 }
   0x8   :  { %25 = vsyncpa [#allocation7], 0 }
   0x9   :  { %27 = vsyncpa [#allocation7 + $0x1], 0  ;;  %s8822_s18 = smov 0   ;;  %s8824_s19 = smov 0  }
   0xa   :  { %s8826_s20 = smov 0   ;;  %s8828_s21 = smov 0  }
   0xb LB: > { %9997 = sst [smem:[#allocation11_spill]] %s8711_s18  ;;  %s8843_s22 = sadd.s32 4294967295, %s8723_s21   ;;  %s8723_s21 = sphi %s8828_s21, %s10023_s21   ;;  %s8719_s20 = sphi %s8826_s20, %s10025_s20   ;;  %s8715_s19 = sphi %s8824_s19, %s10027_s19   ;;  %s8711_s18 = sphi %s8822_s18, %s10026_s18  }
   0xc   : > { %9998 = sst [smem:[#allocation12_spill]] %s8719_s20  ;;  %s7585_s23 = sadd.s32 4294967294, %s8723_s21  }
   0xd   : > { %s8847_s24 = sadd.s32 1, %s8723_s21   ;;  %s354_s25 = sadd.s32 1, %s8719_s20 }
   0xe   : > { %9999 = sst [smem:[#allocation13_spill]] %s8847_s24  ;;  %s351_s26 = ssub.s32 %s8723_s21, %s8847_s24 }
   0xf   : > { %p364_p0 = scmp.ne.s32.totalorder %s8719_s20, %s8715_s19  ;;  %p352_p1 = scmp.eq.s32.totalorder %s351_s26, 0 }
  0x10   : > { %p365_p2 = scmp.eq.s32.totalorder %s8843_s22, 1  ;;  %p370_p3 = scmp.ne.s32.totalorder %s8715_s19, %s8711_s18 }
  0x11   : > { %p371_p4 = scmp.eq.s32.totalorder %s7585_s23, 1  ;;  %p7586_p7 = scmp.ge.s32.totalorder %s8723_s21, 1 }
  0x12   : > { %s8858_s27 = scalar_select %p352_p1, %s8719_s20, %s354_s25  }
  0x13   : > { %p8860_p5 = por %p365_p2, %p364_p0  ;;  %p8864_p6 = por %p371_p4, %p370_p3 }
  0x14   : > { %10000 = sst [smem:[#allocation14_spill]] %s8858_s27  ;;  %p404_p8 = scmp.lt.s32.totalorder %s8723_s21, 3 }
  0x15   : > { %s10001_s28 = scalar_select %p8860_p5, 1, 0 }
  0x16   : > { %s10002_s29 = scalar_select %p8864_p6, 1, 0 }
  0x17   : > { %p9978_p9 = scmp.eq.s32.totalorder %s8843_s22, 0  ;;  %p8871_p10 = pnand %p7586_p7, %p404_p8 }
  0x18   : > { %10003 = sst [smem:[#allocation15_spill]] %s10002_s29  ;;  %s8725_s16 = smov [#allocation2]  }
  0x19   : > { %s10004_s30 = scalar_select %p8871_p10, 1, 0 }
  0x1a   : > { %s416_s17 = sshll.u32 %s8725_s16, 4  ;;  %p8457_p11 = pneg %p8871_p10  ;;  %s417_s17 = int_to_ptr.vmem [resolvable:$true] %s416_s17 }
  0x1b   : > { %s8597_s27 = scalar_lea.hbm %s9961_s4, 8192 }
  0x1c   : > { %p8879_p12 = pnand %p9978_p9, %p8457_p11  ;;  %p8598_p13 = scmp.ne.s32.totalorder %s9961_s4, %s8597_s27 }
  0x1d   : > { %p8604_p3 = scmp.lt.u32.totalorder %s8597_s27, %s9961_s4 }
  0x1e   : > { %p8599_p0 = pneg %p8879_p12 }
  0x20   : > { %p8600_p1 = pnand %p8599_p0, %p8598_p13 }
  0x22   : > { %p8601_p2 = pneg %p8600_p1 }
  0x24   : > { %p8606_p4 = pnand %p8604_p3, %p8601_p2 }
  0x26   : > { %8609 = shalt.err (!%p8606_p4)
}
  0x27   : > { %s8610_s18 = scalar_lea.vmem %s417_s17, 8192  ;;  %p8618_p9 = scmp.lt.s32.totalorder %s417_s17, %s417_s17 }
  0x28   : > { %p8611_p7 = scmp.ne.s32.totalorder %s417_s17, %s8610_s18  ;;  %p8619_p6 = scmp.lt.s32.totalorder %s8610_s18, %s8610_s18 }
  0x2a   : > { %p8613_p8 = pnand %p8611_p7, %p8599_p0  ;;  %p8620_p5 = por %p8619_p6, %p8618_p9 }
  0x2c   : > { %p8614_p11 = pneg %p8613_p8 }
  0x2e   : > { %p8621_p10 = pnand %p8620_p5, %p8614_p11 }
  0x30   : > { %8624 = shalt.err (!%p8621_p10)
}
  0x31   : > { %s8726_s20 = smov 128   ;;  %s8727_s24 = smov 8  }
  0x32   : > { %8460 = dma.hbm_to_vmem [thread:$0]  (!%p8879_p12), %s9961_s4, 8192, %s417_s17, [#allocation3], %s8726_s20, %s8726_s20, %s8727_s24  }
  0x33   : > { %p10006_p13 = scmp.ne.s32.totalorder %s10004_s30, 0 }
  0x34   : > { %p10007_p1 = scmp.eq.s32.totalorder (!%p10006_p13), %s8843_s22, 0 }
  0x35   : > { %486 = sbr.rel (%p10006_p13) target bundleno = 8942 (0x22ee), region = 76 }
  0x3c   : > { %8698 = dma.done.wait (%p10007_p1), [#allocation3], 8192   ;;  %p10008_p0 = pmov %p10007_p1 }
  0x3d   : > { %p549_p5 = scmp.lt.s32.totalorder %s8843_s22, 1  ;;  %v8728_v0 = vmov 0.0|0.0   ;;  %vm8729_vm0 = vmmov 0   ;;  %v8730_v1 = vmov 0.0   ;;  %v580_v2 = vld [vmem:[#allocation2 + $0x20] sm:$0xff]  ;;  %v581_v3 = vld [vmem:[#allocation2 + $0x28] sm:$0xff]  ;;  %v594_v15 = vlaneseq }
  0x3e   : > { %8700 = vsyncadd (%p10008_p0), [#allocation3], 4294959104  ;;  %8317 = vmatprep.subr.bf16.mxu1 %v8728_v0  ;;  %8311 = vmatprep.subr.bf16.mxu0 %v8728_v0  ;;  %v575_v4 = vld [vmem:[#allocation2] sm:$0xff]  ;;  %v8318_v5 = vpack.c.bf16 %v581_v3, %v580_v2  ;;  %v576_v6 = vld [vmem:[#allocation2 + $0x8] sm:$0xff]  ;;  %s10009_s0 = sld [smem:[#allocation16_spill]]  ;;  %vm598_vm1 = vcmask 261120  }
  0x3f   : > { %7923 = vmatprep.mubr.msk.f32.mxu1 %vm8729_vm0, %v8730_v1  ;;  %7912 = vmatprep.mubr.msk.f32.mxu0 %vm8729_vm0, %v8730_v1  ;;  %s8913_s18 = scalar_select %p549_p5, %s8843_s22, 1  ;;  %v582_v7 = vld [vmem:[#allocation2 + $0x30] sm:$0xff]  ;;  %v583_v8 = vld [vmem:[#allocation2 + $0x38] sm:$0xff]  ;;  %v8312_v9 = vpack.c.bf16 %v576_v6, %v575_v4  ;;  %v8936_v16 = vshrl.u32 %v594_v15, 7  ;;  %v8944_v18 = vld [vmem:[%s9962_s5] sm:$0xff]  ;;  %vm1258_vm2 = vcmask 64512  }
  0x40   : > { %v577_v10 = vld [vmem:[#allocation2 + $0x10] sm:$0xff]  ;;  %v578_v11 = vld [vmem:[#allocation2 + $0x18] sm:$0xff]  ;;  %8319 = vmatpush3.bf16.msra.mxu1 %v8318_v5  ;;  %v8321_v12 = vpack.c.bf16 %v583_v8, %v582_v7  ;;  %s9987_s20 = smov 104   ;;  %s9991_s24 = smov 120   ;;  %v585_v28 = vld [vmem:[#allocation2 + $0x40] sm:$0xff]  ;;  %vm2056_vm4 = vcmask 130048  }
  0x41   : > { %s8916_s27 = sshll.u32 %s8913_s18, 3  ;;  %8313 = vmatpush3.bf16.msra.mxu0 %v8312_v9  ;;  %8320 = vmatprep.subr.bf16.mxu1 %v8728_v0  ;;  %v8315_v13 = vpack.c.bf16 %v578_v11, %v577_v10  ;;  %v8939_v17 = vsub.s32 1, %v8936_v16  ;;  %v8947_v19 = vsub.s32 0, %v8936_v16  ;;  %s9989_s25 = smov 112   ;;  %v586_v29 = vld [vmem:[#allocation2 + $0x48] sm:$0xff]  ;;  %v587_v30 = vld [vmem:[#allocation2 + $0x50] sm:$0xff] }
  0x42   : > { %8314 = vmatprep.subr.bf16.mxu0 %v8728_v0  ;;  %v8324_v31 = vpack.c.bf16 %v586_v29, %v585_v28  ;;  %v588_v32 = vld [vmem:[#allocation2 + $0x58] sm:$0xff]  ;;  %v8734_v34 = vmov 1983009808   ;;  %v8735_v36 = vmov 1934713408   ;;  %s10010_s2 = sld [smem:[#allocation18_spill]] }
  0x43   : > { %v675_v20 = vrot.slane %v8944_v18, %v8939_v17  ;;  %v597_v21 = vrot.slane %v8944_v18, %v8947_v19  ;;  %v8327_v33 = vpack.c.bf16 %v588_v32, %v587_v30  ;;  %v833_v35 = vunpack.c.l.s4 %v8734_v34  ;;  %s9983_s23 = smov 8   ;;  %s9981_s16 = smov 24  }
  0x44   : > { %s552_s17 = scalar_lea.vmem %s10009_s0, %s8916_s27  ;;  %8322 = vmatpush3.bf16.msra.mxu1 %v8321_v12  ;;  %v865_v37 = vunpack.c.l.s4 %v8735_v36  ;;  %vm2058_vm5 = vcmask 195584   ;;  %s10011_s1 = sld [smem:[#allocation17_spill]]  ;;  %vm3854_vm7 = vcmask 523264  }
  0x45   : > { %v8924_v14 = vld [vmem:[%s552_s17] sm:$0xff]  ;;  %8316 = vmatpush3.bf16.msra.mxu0 %v8315_v13  ;;  %7937 = vmatprep.subr.mxu1 %v8730_v1  ;;  %v834_v38 = vunpack.c.0.s8 %v833_v35  ;;  %s9985_s17 = smov 16   ;;  %s10012_s3 = sld [smem:[#allocation19_spill]] }
  0x46   : > { %8323 = vmatprep.subr.bf16.mxu0 %v8728_v0  ;;  %v866_v41 = vunpack.c.0.s8 %v865_v37  ;;  %s10014_s29 = smov 120   ;;  %p10019_p9 = scmp.ne.s32.totalorder %s10001_s28, 0 }
  0x47   : > { %7924 = vmatmul.mubr.msk.f32.vlgmr.msra.gmra.mrb[0].mxu1 %vm598_vm1, %v8924_v14  ;;  %v8966_v42 = vsub.s32 %v834_v38, %v8936_v16 }
  0x48   : > { %7913 = vmatmul.mubr.msk.f32.vlgmr.msra.gmra.mrb[0].mxu0 %vm598_vm1, %v8924_v14  ;;  %7939 = vmatprep.mubr.msk.f32.mxu1 %vm8729_vm0, %v8730_v1  ;;  %v8969_v49 = vsub.s32 %v866_v41, %v8936_v16  ;;  %s560_s30 = scalar_lea.vmem %s10010_s2, %s8916_s27 }
  0x49   : > { %7934 = vmatprep.mubr.msk.f32.mxu0 %vm8729_vm0, %v8730_v1  ;;  %8325 = vmatpush3.bf16.msra.mxu0 %v8324_v31 }
  0x4a   : > { %8326 = vmatprep.subr.bf16.mxu0 %v8728_v0 }
  0x4b   : > { %s563_s26 = scalar_lea.vmem %s10012_s3, %s8913_s18 }
  0x4d   : > { %8328 = vmatpush3.bf16.msra.mxu0 %v8327_v33 }
  0x4e   : > { %7957 = vmatprep.subr.mxu0 %v8730_v1 }
  0x50   : > { %7935 = vmatmul.mubr.msk.f32.vlgmr.msra.gmra.mrb[2].mxu0 %vm598_vm1, %v8924_v14 }
  0x51   : > { %7959 = vmatprep.mubr.msk.f32.mxu0 %vm8729_vm0, %v8730_v1 }
 0x11a   : > { %v742_v22 = vpop.f32.mrb[0].mxu1 }
 0x11b   : > { %v743_v23 = vadd.f32 %v742_v22, %v675_v20  ;;  %v7925_v24 = vpop.f32.mrb[1].mxu1  ;;  %v668_v25 = vpop.f32.mrb[0].mxu0 }
 0x11c   : > { %v7914_v26 = vpop.f32.mrb[1].mxu0  ;;  %v669_v27 = vadd.f32 %v668_v25, %v597_v21 }
 0x11d   : > { %973 = vrot.lane.b32.xlu1 %v743_v23, %s9987_s20  ;;  %967 = vrot.lane.b32.xlu0 %v743_v23, %s9991_s24 }
 0x121   : > { %970 = vrot.lane.b32.xlu0 %v743_v23, %s9989_s25  ;;  %821 = vrot.lane.b32.xlu1 %v669_v27, %s9991_s24 }
 0x125   : > { %824 = vrot.lane.b32.xlu0 %v669_v27, %s9989_s25  ;;  %827 = vrot.lane.b32.xlu1 %v669_v27, %s9987_s20 }
 0x18f   : > { %v974_v39 = vpop.permute.xlu1 %973  ;;  %v968_v40 = vpop.permute.xlu0 %967 }
 0x190   : > { %v992_v43 = vcombine.low %v968_v40, %v974_v39  ;;  %v993_v44 = vcombine.high %v968_v40, %v974_v39 }
 0x192   : > { %v1000_v50 = vrot.slane %v992_v43, %v8966_v42  ;;  %v1007_v51 = vrot.slane %v993_v44, %v8966_v42 }
 0x193   : > { %v971_v45 = vpop.permute.xlu0 %970  ;;  %v822_v46 = vpop.permute.xlu1 %821 }
 0x194   : > { %v976_v47 = vcombine.low %v743_v23, %v971_v45  ;;  %v977_v48 = vcombine.high %v743_v23, %v971_v45 }
 0x196   : > { %v984_v52 = vrot.slane %v976_v47, %v8966_v42  ;;  %v991_v53 = vrot.slane %v977_v48, %v8966_v42 }
 0x197   : > { %v825_v54 = vpop.permute.xlu0 %824  ;;  %v828_v55 = vpop.permute.xlu1 %827 }
 0x198   : > { %v1008_v56 = vcombine.low %v984_v52, %v1000_v50  ;;  %v1009_v57 = vcombine.high %v984_v52, %v1000_v50  ;;  %v1024_v58 = vcombine.low %v991_v53, %v1007_v51  ;;  %v1025_v59 = vcombine.high %v991_v53, %v1007_v51 }
 0x199   : > { %v830_v60 = vcombine.low %v669_v27, %v825_v54  ;;  %v831_v61 = vcombine.high %v669_v27, %v825_v54  ;;  %v846_v62 = vcombine.low %v822_v46, %v828_v55  ;;  %v847_v63 = vcombine.high %v822_v46, %v828_v55 }
 0x19a   : > { %v1016_v2 = vrot.slane %v1008_v56, %v8969_v49  ;;  %v1023_v3 = vrot.slane %v1009_v57, %v8969_v49  ;;  %v1032_v4 = vrot.slane %v1024_v58, %v8969_v49  ;;  %v1039_v5 = vrot.slane %v1025_v59, %v8969_v49 }
 0x19b   : > { %v838_v6 = vrot.slane %v830_v60, %v8966_v42  ;;  %v845_v7 = vrot.slane %v831_v61, %v8966_v42  ;;  %v854_v8 = vrot.slane %v846_v62, %v8966_v42  ;;  %v861_v9 = vrot.slane %v847_v63, %v8966_v42 }
 0x19c   : > { %v1044_v10 = vcombine.low %v1016_v2, %v1023_v3  ;;  %v7601_v11 = vcombine.high %v1016_v2, %v1023_v3  ;;  %v1060_v12 = vcombine.low %v1032_v4, %v1039_v5  ;;  %v7602_v13 = vcombine.high %v1032_v4, %v1039_v5  ;;  %v816_v3 = vpop.f32.mrb[2].mxu0  ;;  %v566_v5 = vld [vmem:[%s560_s30] sm:$0xff]  ;;  %s9132_s30 = scalar_lea.vmem %s10011_s1, %s8916_s27 }
 0x19d   : > { %v862_v15 = vcombine.low %v838_v6, %v854_v8  ;;  %v863_v20 = vcombine.high %v838_v6, %v854_v8  ;;  %v878_v21 = vcombine.low %v845_v7, %v861_v9  ;;  %v879_v22 = vcombine.high %v845_v7, %v861_v9  ;;  %v7936_v4 = vpop.f32.mrb[3].mxu0 }
 0x19e   : > { %v1051_v23 = vrot.slane %v1044_v10, %v8966_v42  ;;  %v1059_v24 = vrot.slane %v7601_v11, %v8966_v42  ;;  %v1067_v25 = vrot.slane %v1060_v12, %v8966_v42  ;;  %v1075_v26 = vrot.slane %v7602_v13, %v8966_v42 }
 0x19f   : > { %v870_v27 = vrot.slane %v862_v15, %v8969_v49  ;;  %v877_v28 = vrot.slane %v863_v20, %v8969_v49  ;;  %v886_v29 = vrot.slane %v878_v21, %v8969_v49  ;;  %v893_v30 = vrot.slane %v879_v22, %v8969_v49 }
 0x1a0   : > { %v1076_v31 = vcombine.low %v1051_v23, %v1059_v24  ;;  %v1092_v32 = vcombine.low %v1067_v25, %v1075_v26  ;;  %v1077_v47 = vcombine.high %v1051_v23, %v1059_v24  ;;  %v1093_v48 = vcombine.high %v1067_v25, %v1075_v26 }
 0x1a1   : > { %v898_v33 = vcombine.low %v870_v27, %v877_v28  ;;  %v7599_v34 = vcombine.high %v870_v27, %v877_v28  ;;  %v914_v35 = vcombine.low %v886_v29, %v893_v30  ;;  %v7600_v36 = vcombine.high %v886_v29, %v893_v30 }
 0x1a2   : > { %v1084_v37 = vrot.slane %v1076_v31, %v8969_v49  ;;  %v1100_v38 = vrot.slane %v1092_v32, %v8969_v49  ;;  %v1091_v56 = vrot.slane %v1077_v47, %v8969_v49  ;;  %v1107_v57 = vrot.slane %v1093_v48, %v8969_v49 }
 0x1a3   : > { %v905_v39 = vrot.slane %v898_v33, %v8966_v42  ;;  %v913_v40 = vrot.slane %v7599_v34, %v8966_v42  ;;  %v921_v41 = vrot.slane %v914_v35, %v8966_v42  ;;  %v929_v43 = vrot.slane %v7600_v36, %v8966_v42 }
 0x1a4   : > { %v1108_v44 = vcombine.low %v1084_v37, %v1100_v38  ;;  %v1109_v55 = vcombine.high %v1084_v37, %v1100_v38  ;;  %v1110_v61 = vcombine.low %v1091_v56, %v1107_v57  ;;  %v1111_v63 = vcombine.high %v1091_v56, %v1107_v57 }
 0x1a5   : > { %v930_v45 = vcombine.low %v905_v39, %v913_v40  ;;  %v946_v46 = vcombine.low %v921_v41, %v929_v43  ;;  %v931_v52 = vcombine.high %v905_v39, %v913_v40  ;;  %v947_v53 = vcombine.high %v921_v41, %v929_v43 }
 0x1a6   : > { %7938 = vmatpush3.xpose.msk.msra.mxu1 %vm1258_vm2, %v1108_v44  ;;  %vm567_vm3 = vcmp.eq.f32.partialorder %v566_v5, 0.0  ;;  %v9038_v31 = vsub.s32 2, %v8936_v16 }
 0x1a7   : > { %7942 = vmatprep.subr.mxu1 %v8730_v1  ;;  %v938_v50 = vrot.slane %v930_v45, %v8969_v49  ;;  %v954_v51 = vrot.slane %v946_v46, %v8969_v49  ;;  %v945_v59 = vrot.slane %v931_v52, %v8969_v49  ;;  %v961_v60 = vrot.slane %v947_v53, %v8969_v49 }
 0x1a8   : > { %v9028_v6 = vsel %vm567_vm3, -1e+10, %v8730_v1  ;;  %v749_v33 = vrot.slane %v8944_v18, %v9038_v31 }
 0x1a9   : > { %v962_v54 = vcombine.low %v938_v50, %v954_v51  ;;  %v963_v58 = vcombine.high %v938_v50, %v954_v51  ;;  %v964_v62 = vcombine.low %v945_v59, %v961_v60  ;;  %v965_v2 = vcombine.high %v945_v59, %v961_v60 }
 0x1aa   : > { %v817_v34 = vadd.f32 %v816_v3, %v749_v33 }
 0x1ab   : > { %7940 = vmatmul.mubr.msk.f32.vlgmr.msra.gmra.mrb[2].mxu1 %vm1258_vm2, %v962_v54 }
 0x1ac   : > { %7943 = vmatpush3.xpose.msk.msra.mxu1 %vm1258_vm2, %v1109_v55  ;;  %7944 = vmatprep.mubr.msk.f32.mxu1 %vm8729_vm0, %v8730_v1 }
 0x1ad   : > { %7947 = vmatprep.subr.mxu1 %v8730_v1 }
 0x1af   : > { %7945 = vmatmul.mubr.msk.f32.vlgmr.msra.gmra.mrb[4].mxu1 %vm1258_vm2, %v963_v58 }
 0x1b0   : > { %7948 = vmatpush3.xpose.msk.msra.mxu1 %vm1258_vm2, %v1110_v61  ;;  %7949 = vmatprep.mubr.msk.f32.mxu1 %vm8729_vm0, %v8730_v1 }
 0x1b1   : > { %7952 = vmatprep.subr.mxu1 %v8730_v1 }
 0x1b3   : > { %7950 = vmatmul.mubr.msk.f32.vlgmr.msra.gmra.mrb[6].mxu1 %vm1258_vm2, %v964_v62 }
 0x1b4   : > { %7953 = vmatpush3.xpose.msk.msra.mxu1 %vm1258_vm2, %v1111_v63  ;;  %7954 = vmatprep.mubr.msk.f32.mxu1 %vm8729_vm0, %v8730_v1 }
 0x1b5   : > { %7962 = vmatprep.subr.mxu1 %v8730_v1 }
 0x1b7   : > { %7955 = vmatmul.mubr.msk.f32.vlgmr.msra.gmra.mrb[8].mxu1 %vm1258_vm2, %v965_v2 }
 0x1b8   : > { %7964 = vmatprep.mubr.msk.f32.mxu1 %vm8729_vm0, %v8730_v1 }
 0x27e   : > { %v1331_v7 = vpop.f32.mrb[2].mxu1 }
 0x27f   : > { %v1563_v8 = vmul.f32 0.35355338, %v1331_v7  ;;  %v7941_v9 = vpop.f32.mrb[3].mxu1 }
 0x281   : > { %v1567_v10 = vadd.f32 %v1563_v8, %v9028_v6 }
 0x282   : > { %v1407_v11 = vpop.f32.mrb[4].mxu1 }
 0x283   : > { %v1564_v12 = vmul.f32 0.35355338, %v1407_v11  ;;  %v7946_v13 = vpop.f32.mrb[5].mxu1  ;;  %v1571_v15 = vsel %vm1258_vm2, %v1567_v10, -inf }
 0x284   : > { %1572 = vmax.xlane.f32.xlu0 %v1571_v15 }
 0x285   : > { %v1568_v20 = vadd.f32 %v1564_v12, %v9028_v6 }
 0x286   : > { %v1483_v21 = vpop.f32.mrb[6].mxu1 }
 0x287   : > { %v1565_v22 = vmul.f32 0.35355338, %v1483_v21  ;;  %v7951_v23 = vpop.f32.mrb[7].mxu1  ;;  %v1574_v24 = vsel %vm1258_vm2, %v1568_v20, -inf }
 0x288   : > { %1575 = vmax.xlane.f32.xlu1 %v1574_v24 }
 0x289   : > { %v1569_v25 = vadd.f32 %v1565_v22, %v9028_v6 }
 0x28a   : > { %v1559_v26 = vpop.f32.mrb[8].mxu1 }
 0x28b   : > { %v1566_v27 = vmul.f32 0.35355338, %v1559_v26  ;;  %v7956_v28 = vpop.f32.mrb[9].mxu1  ;;  %v1577_v29 = vsel %vm1258_vm2, %v1569_v25, -inf }
 0x28c   : > { %1578 = vmax.xlane.f32.xlu0 %v1577_v29 }
 0x28d   : > { %v1570_v30 = vadd.f32 %v1566_v27, %v9028_v6 }
 0x28f   : > { %v1580_v32 = vsel %vm1258_vm2, %v1570_v30, -inf }
 0x290   : > { %1581 = vmax.xlane.f32.xlu0 %v1580_v32 }
 0x299   : > { %1113 = vrot.lane.b32.xlu1 %v817_v34, %s9991_s24 }
 0x311   : > { %v1573_v35 = vpop.xlane.xlu0 %1572 }
 0x312   : > { %v1583_v36 = vsub.f32 %v1567_v10, %v1573_v35 }
 0x314   : > { %v1587_v37 = vmul.f32 1.442695, %v1583_v36 }
 0x315   : > { %v1576_v38 = vpop.xlane.xlu1 %1575 }
 0x316   : > { %8518 = vpow2.f32 %v1587_v37  ;;  %v1584_v39 = vsub.f32 %v1568_v20, %v1576_v38 }
 0x318   : > { %v1589_v40 = vmul.f32 1.442695, %v1584_v39 }
 0x319   : > { %v1579_v41 = vpop.xlane.xlu0 %1578  ;;  %v1114_v57 = vpop.permute.xlu1 %1113 }
 0x31a   : > { %8520 = vpow2.f32 %v1589_v40  ;;  %v1585_v43 = vsub.f32 %v1569_v25, %v1579_v41 }
 0x31c   : > { %v1591_v44 = vmul.f32 1.442695, %v1585_v43 }
 0x31d   : > { %v1582_v45 = vpop.xlane.xlu0 %1581 }
 0x31e   : > { %8522 = vpow2.f32 %v1591_v44  ;;  %v1586_v46 = vsub.f32 %v1570_v30, %v1582_v45 }
 0x320   : > { %v9044_v47 = vpop.eup %8518  ;;  %v1593_v48 = vmul.f32 1.442695, %v1586_v46 }
 0x321   : > { %v1595_v50 = vsel %vm1258_vm2, %v9044_v47, 0.0 }
 0x322   : > { %8524 = vpow2.f32 %v1593_v48  ;;  %1596 = vadd.xlane.f32.xlu1 %v1595_v50 }
 0x324   : > { %v8521_v51 = vpop.eup %8520 }
 0x325   : > { %v1598_v52 = vsel %vm1258_vm2, %v8521_v51, 0.0 }
 0x326   : > { %1599 = vadd.xlane.f32.xlu0 %v1598_v52 }
 0x328   : > { %v9049_v53 = vpop.eup %8522 }
 0x329   : > { %v1601_v54 = vsel %vm1258_vm2, %v9049_v53, 0.0 }
 0x32a   : > { %1602 = vadd.xlane.f32.xlu1 %v1601_v54 }
 0x32c   : > { %v9053_v55 = vpop.eup %8524 }
 0x32d   : > { %v1604_v56 = vsel %vm1258_vm2, %v9053_v55, 0.0 }
 0x32e   : > { %1605 = vadd.xlane.f32.xlu0 %v1604_v56 }
 0x33b   : > { %1119 = vrot.lane.b32.xlu1 %v817_v34, %s9987_s20 }
 0x344   : > { %1116 = vrot.lane.b32.xlu0 %v817_v34, %s9989_s25 }
 0x3af   : > { %v1597_v58 = vpop.xlane.xlu1 %1596 }
 0x3b0   : > { %8526 = vrcp.f32 %v1597_v58 }
 0x3b3   : > { %v1600_v59 = vpop.xlane.xlu0 %1599 }
 0x3b4   : > { %8528 = vrcp.f32 %v1600_v59 }
 0x3b7   : > { %v1603_v60 = vpop.xlane.xlu1 %1602 }
 0x3b8   : > { %8530 = vrcp.f32 %v1603_v60 }
 0x3ba   : > { %v8527_v33 = vpop.eup %8526 }
 0x3bb   : > { %v1606_v61 = vpop.xlane.xlu0 %1605  ;;  %v1120_v62 = vpop.permute.xlu1 %1119  ;;  %v1608_v50 = vmul.f32 %v8527_v33, %v9044_v47  ;;  %v590_v47 = vld [vmem:[#allocation2 + $0x60] sm:$0xff] }
 0x3bc   : > { %v1138_v63 = vcombine.low %v1114_v57, %v1120_v62  ;;  %v1139_v2 = vcombine.high %v1114_v57, %v1120_v62  ;;  %8532 = vrcp.f32 %v1606_v61 }
 0x3be   : > { %v1146_v7 = vrot.slane %v1138_v63, %v8966_v42  ;;  %v1153_v8 = vrot.slane %v1139_v2, %v8966_v42  ;;  %v8529_v38 = vpop.eup %8528 }
 0x3bf   : > { %v1117_v3 = vpop.permute.xlu0 %1116  ;;  %v1610_v52 = vmul.f32 %v8529_v38, %v8521_v51  ;;  %v591_v51 = vld [vmem:[#allocation2 + $0x68] sm:$0xff] }
 0x3c0   : > { %v1122_v4 = vcombine.low %v817_v34, %v1117_v3  ;;  %v1123_v5 = vcombine.high %v817_v34, %v1117_v3 }
 0x3c2   : > { %v1130_v9 = vrot.slane %v1122_v4, %v8966_v42  ;;  %v1137_v10 = vrot.slane %v1123_v5, %v8966_v42  ;;  %v8531_v41 = vpop.eup %8530 }
 0x3c3   : > { %v1612_v57 = vmul.f32 %v8531_v41, %v9049_v53  ;;  %v8330_v53 = vpack.c.bf16 %v591_v51, %v590_v47 }
 0x3c4   : > { %v1154_v11 = vcombine.low %v1130_v9, %v1146_v7  ;;  %v1155_v12 = vcombine.high %v1130_v9, %v1146_v7  ;;  %v1170_v13 = vcombine.low %v1137_v10, %v1153_v8  ;;  %v1171_v15 = vcombine.high %v1137_v10, %v1153_v8 }
 0x3c6   : > { %v1162_v20 = vrot.slane %v1154_v11, %v8969_v49  ;;  %v1169_v21 = vrot.slane %v1155_v12, %v8969_v49  ;;  %v1178_v22 = vrot.slane %v1170_v13, %v8969_v49  ;;  %v1185_v23 = vrot.slane %v1171_v15, %v8969_v49  ;;  %v8533_v48 = vpop.eup %8532 }
 0x3c7   : > { %v1614_v58 = vmul.f32 %v8533_v48, %v9053_v55 }
 0x3c8   : > { %v1190_v24 = vcombine.low %v1162_v20, %v1169_v21  ;;  %v7603_v25 = vcombine.high %v1162_v20, %v1169_v21  ;;  %v1206_v26 = vcombine.low %v1178_v22, %v1185_v23  ;;  %v7604_v27 = vcombine.high %v1178_v22, %v1185_v23  ;;  %v592_v22 = vld [vmem:[#allocation2 + $0x70] sm:$0xff]  ;;  %v593_v23 = vld [vmem:[#allocation2 + $0x78] sm:$0xff] }
 0x3ca   : > { %v1197_v28 = vrot.slane %v1190_v24, %v8966_v42  ;;  %v1205_v29 = vrot.slane %v7603_v25, %v8966_v42  ;;  %v1213_v30 = vrot.slane %v1206_v26, %v8966_v42  ;;  %v1221_v32 = vrot.slane %v7604_v27, %v8966_v42 }
 0x3cc   : > { %v1222_v34 = vcombine.low %v1197_v28, %v1205_v29  ;;  %v1238_v35 = vcombine.low %v1213_v30, %v1221_v32  ;;  %v1223_v36 = vcombine.high %v1197_v28, %v1205_v29  ;;  %v1239_v37 = vcombine.high %v1213_v30, %v1221_v32 }
 0x3cd   : > { %v8333_v28 = vpack.c.bf16 %v593_v23, %v592_v22  ;;  %v2165_v23 = vld [vmem:[#allocation2 + $0x90] sm:$0xff] }
 0x3ce   : > { %v1230_v39 = vrot.slane %v1222_v34, %v8969_v49  ;;  %v1246_v40 = vrot.slane %v1238_v35, %v8969_v49  ;;  %v1237_v43 = vrot.slane %v1223_v36, %v8969_v49  ;;  %v1253_v44 = vrot.slane %v1239_v37, %v8969_v49 }
 0x3d0   : > { %v1254_v45 = vcombine.low %v1230_v39, %v1246_v40  ;;  %v1255_v46 = vcombine.high %v1230_v39, %v1246_v40  ;;  %v1256_v54 = vcombine.low %v1237_v43, %v1253_v44  ;;  %v1257_v56 = vcombine.high %v1237_v43, %v1253_v44 }
 0x3d2   : > { %7958 = vmatpush3.msra.mxu0 %v1254_v45  ;;  %7963 = vmatpush3.msra.mxu1 %v1255_v46 }
 0x3d3   : > { %7960 = vmatmul.mubr.msk.f32.vlgmr.msra.gmra.mrb[4].mxu0 %vm1258_vm2, %v1608_v50  ;;  %7965 = vmatmul.mubr.msk.f32.vlgmr.msra.gmra.mrb[10].mxu1 %vm1258_vm2, %v1610_v52 }
 0x3d4   : > { %7967 = vmatprep.subr.mxu0 %v8730_v1  ;;  %7972 = vmatprep.subr.mxu1 %v8730_v1 }
 0x3d5   : > { %7968 = vmatpush3.msra.mxu0 %v1256_v54  ;;  %7973 = vmatpush3.msra.mxu1 %v1257_v56 }
 0x3d6   : > { %7969 = vmatprep.mubr.msk.f32.mxu0 %vm8729_vm0, %v8730_v1  ;;  %7974 = vmatprep.mubr.msk.f32.mxu1 %vm8729_vm0, %v8730_v1 }
 0x3d7   : > { %7970 = vmatmul.mubr.msk.f32.vlgmr.msra.gmra.mrb[6].mxu0 %vm1258_vm2, %v1612_v57  ;;  %7975 = vmatmul.mubr.msk.f32.vlgmr.msra.gmra.mrb[12].mxu1 %vm1258_vm2, %v1614_v58 }
 0x3d8   : > { %8329 = vmatprep.subr.bf16.mxu0 %v8728_v0  ;;  %7985 = vmatprep.mubr.msk.f32.mxu0 %vm8729_vm0, %v8730_v1 }
 0x3d9   : > { %8335 = vmatprep.subr.bf16.mxu1 %v8728_v0  ;;  %7996 = vmatprep.mubr.msk.f32.mxu1 %vm8729_vm0, %v8730_v1 }
 0x3da   : > { %8331 = vmatpush3.bf16.msra.mxu0 %v8330_v53 }
 0x3db   : > { %8332 = vmatprep.subr.bf16.mxu0 %v8728_v0 }
 0x3de   : > { %8334 = vmatpush3.bf16.msra.mxu0 %v8333_v28 }
 0x3df   : > { %8341 = vmatprep.subr.bf16.mxu0 %v8728_v0 }
 0x4a6   : > { %v1684_v55 = vpop.f32.mrb[4].mxu0  ;;  %v1757_v59 = vpop.f32.mrb[10].mxu1 }
 0x4a7   : > { %v7961_v60 = vpop.f32.mrb[5].mxu0  ;;  %v7966_v61 = vpop.f32.mrb[11].mxu1 }
 0x4aa   : > { %v1830_v62 = vpop.f32.mrb[6].mxu0  ;;  %v1903_v63 = vpop.f32.mrb[12].mxu1 }
 0x4ab   : > { %v1907_v2 = vcombine.low %v1684_v55, %v1830_v62  ;;  %v1908_v3 = vcombine.high %v1684_v55, %v1830_v62  ;;  %v1923_v4 = vcombine.low %v1757_v59, %v1903_v63  ;;  %v1924_v5 = vcombine.high %v1757_v59, %v1903_v63  ;;  %v7971_v7 = vpop.f32.mrb[7].mxu0  ;;  %v7976_v8 = vpop.f32.mrb[13].mxu1 }
 0x4ac   : > { %v2062_v55 = vsub.s32 3, %v8936_v16  ;;  %v2171_v8 = vld [vmem:[#allocation2 + $0xb8] sm:$0xff] }
 0x4ad   : > { %v1915_v9 = vrot.slane %v1907_v2, %v8966_v42  ;;  %v1922_v10 = vrot.slane %v1908_v3, %v8966_v42  ;;  %v1931_v11 = vrot.slane %v1923_v4, %v8966_v42  ;;  %v1938_v12 = vrot.slane %v1924_v5, %v8966_v42  ;;  %v2168_v3 = vld [vmem:[#allocation2 + $0xa0] sm:$0xff]  ;;  %v2169_v4 = vld [vmem:[#allocation2 + $0xa8] sm:$0xff]  ;;  %v2170_v5 = vld [vmem:[#allocation2 + $0xb0] sm:$0xff] }
 0x4ae   : > { %v2063_v59 = vrot.slane %v8944_v18, %v2062_v55  ;;  %v8342_v7 = vpack.c.bf16 %v2169_v4, %v2168_v3 }
 0x4af   : > { %v1939_v13 = vcombine.low %v1915_v9, %v1931_v11  ;;  %v1940_v15 = vcombine.high %v1915_v9, %v1931_v11  ;;  %v1955_v20 = vcombine.low %v1922_v10, %v1938_v12  ;;  %v1956_v21 = vcombine.high %v1922_v10, %v1938_v12 }
 0x4b0   : > { %v8345_v9 = vpack.c.bf16 %v2171_v8, %v2170_v5 }
 0x4b1   : > { %v1947_v24 = vrot.slane %v1939_v13, %v8969_v49  ;;  %v1954_v25 = vrot.slane %v1940_v15, %v8969_v49  ;;  %v1963_v26 = vrot.slane %v1955_v20, %v8969_v49  ;;  %v1970_v27 = vrot.slane %v1956_v21, %v8969_v49  ;;  %v2163_v20 = vld [vmem:[#allocation2 + $0x80] sm:$0xff]  ;;  %v2164_v21 = vld [vmem:[#allocation2 + $0x88] sm:$0xff] }
 0x4b2   : > { %v8336_v22 = vpack.c.bf16 %v2164_v21, %v2163_v20  ;;  %v2174_v20 = vld [vmem:[#allocation2 + $0xc8] sm:$0xff] }
 0x4b3   : > { %v1975_v29 = vcombine.low %v1947_v24, %v1954_v25  ;;  %v7617_v30 = vcombine.high %v1947_v24, %v1954_v25  ;;  %v1991_v32 = vcombine.low %v1963_v26, %v1970_v27  ;;  %v7618_v33 = vcombine.high %v1963_v26, %v1970_v27  ;;  %v2166_v24 = vld [vmem:[#allocation2 + $0x98] sm:$0xff] }
 0x4b4   : > { %8337 = vmatpush3.bf16.msra.mxu1 %v8336_v22  ;;  %v8339_v25 = vpack.c.bf16 %v2166_v24, %v2165_v23  ;;  %v2261_v26 = vsub.s32 5, %v8936_v16  ;;  %v2175_v24 = vld [vmem:[#allocation2 + $0xd0] sm:$0xff] }
 0x4b5   : > { %v1982_v34 = vrot.slane %v1975_v29, %v8966_v42  ;;  %v1990_v35 = vrot.slane %v7617_v30, %v8966_v42  ;;  %v1998_v36 = vrot.slane %v1991_v32, %v8966_v42  ;;  %v2006_v37 = vrot.slane %v7618_v33, %v8966_v42  ;;  %8338 = vmatprep.subr.bf16.mxu1 %v8728_v0 }
 0x4b6   : > { %v2262_v27 = vrot.slane %v8944_v18, %v2261_v26 }
 0x4b7   : > { %v2008_v38 = vcombine.high %v1982_v34, %v1990_v35  ;;  %v2024_v39 = vcombine.high %v1998_v36, %v2006_v37  ;;  %v2007_v40 = vcombine.low %v1982_v34, %v1990_v35  ;;  %v2023_v41 = vcombine.low %v1998_v36, %v2006_v37  ;;  %v9155_v35 = vld [vmem:[%s9967_s10] sm:$0x7] }
 0x4b8   : > { %8340 = vmatpush3.bf16.msra.mxu1 %v8339_v25  ;;  %v9160_v36 = vld [vmem:[%s9968_s11] sm:$0x7]  ;;  %v2155_v37 = vrot.slane %v9155_v35, %v8947_v19  ;;  %v2176_v25 = vld [vmem:[#allocation2 + $0xd8] sm:$0xff] }
 0x4b9   : > { %v2022_v43 = vrot.slane %v2008_v38, %v8969_v49  ;;  %v2038_v44 = vrot.slane %v2024_v39, %v8969_v49  ;;  %v2015_v45 = vrot.slane %v2007_v40, %v8969_v49  ;;  %v2031_v46 = vrot.slane %v2023_v41, %v8969_v49  ;;  %8347 = vmatprep.subr.bf16.mxu1 %v8728_v0 }
 0x4ba   : > { %v2160_v40 = vrot.slane %v9160_v36, %v8947_v19 }
 0x4bb   : > { %v2041_v48 = vcombine.low %v2022_v43, %v2038_v44  ;;  %v2040_v50 = vcombine.high %v2015_v45, %v2031_v46  ;;  %v2042_v52 = vcombine.high %v2022_v43, %v2038_v44  ;;  %v2039_v54 = vcombine.low %v2015_v45, %v2031_v46 }
 0x4bd   : > { %2048 = vrot.lane.b32.xlu0 %v2041_v48, %s9985_s17  ;;  %2044 = vrot.lane.b32.xlu1 %v2040_v50, %s9983_s23 }
 0x4c1   : > { %2052 = vrot.lane.b32.xlu1 %v2042_v52, %s9981_s16  ;;  %s10013_s16 = smov 24  }
 0x52f   : > { %v2045_v56 = vpop.permute.xlu1 %2044  ;;  %v2049_v57 = vpop.permute.xlu0 %2048 }
 0x530   : > { %v2055_v58 = vsel %vm1258_vm2, %v2039_v54, %v2045_v56 }
 0x531   : > { %v2057_v51 = vsel %vm2056_vm4, %v2055_v58, %v2049_v57 }
 0x533   : > { %v2053_v47 = vpop.permute.xlu1 %2052 }
 0x534   : > { %v2059_v53 = vsel %vm2058_vm5, %v2057_v51, %v2053_v47 }
 0x535   : > { %7986 = vmatmul.mubr.msk.f32.vlgmr.msra.gmra.mrb[8].mxu0 %vm598_vm1, %v2059_v53 }
 0x536   : > { %8007 = vmatprep.mubr.msk.f32.mxu0 %vm8729_vm0, %v8730_v1  ;;  %8343 = vmatpush3.bf16.msra.mxu0 %v8342_v7 }
 0x537   : > { %8344 = vmatprep.subr.bf16.mxu0 %v8728_v0 }
 0x53a   : > { %8346 = vmatpush3.bf16.msra.mxu0 %v8345_v9 }
 0x53b   : > { %8021 = vmatprep.subr.mxu0 %v8730_v1 }
 0x608   : > { %v2133_v60 = vpop.f32.mrb[8].mxu0 }
 0x609   : > { %v2134_v61 = vadd.f32 %v2133_v60, %v2063_v59  ;;  %v7987_v62 = vpop.f32.mrb[9].mxu0 }
 0x60b   : > { %v2137_v63 = vadd.f32 %v2134_v61, %v8924_v14  ;;  %v9135_v14 = vld [vmem:[%s9132_s30] sm:$0xff] }
 0x60c   : > { %8008 = vmatmul.mubr.msk.f32.vlgmr.msra.gmra.mrb[10].mxu0 %vm598_vm1, %v9135_v14 }
 0x60d   : > { %v2138_v2 = vsel %vm598_vm1, %v2137_v63, 0.0  ;;  %8023 = vmatprep.mubr.msk.f32.mxu0 %vm8729_vm0, %v8730_v1 }
 0x60e   : > { %2139 = vadd.xlane.f32.xlu0 %v2138_v2 }
 0x69b   : > { %v2140_v10 = vpop.xlane.xlu0 %2139 }
 0x69c   : > { %v2142_v11 = vmul.f32 0.03125, %v2140_v10 }
 0x69e   : > { %v2143_v12 = vsub.f32 %v2137_v63, %v2142_v11 }
 0x6a0   : > { %v2144_v13 = vmul.f32 %v2143_v12, %v2143_v12 }
 0x6a2   : > { %v2145_v15 = vsel %vm598_vm1, %v2144_v13, 0.0 }
 0x6a3   : > { %2146 = vadd.xlane.f32.xlu1 %v2145_v15  ;;  %v2173_v15 = vld [vmem:[#allocation2 + $0xc0] sm:$0xff] }
 0x6a4   : > { %v8348_v23 = vpack.c.bf16 %v2174_v20, %v2173_v15 }
 0x6df   : > { %v2332_v28 = vpop.f32.mrb[10].mxu0 }
 0x6e0   : > { %v2333_v29 = vadd.f32 %v2332_v28, %v2262_v27  ;;  %v8009_v30 = vpop.f32.mrb[11].mxu0  ;;  %v8351_v27 = vpack.c.bf16 %v2176_v25, %v2175_v24 }
 0x6e2   : > { %2557 = vrot.lane.b32.xlu0 %v2333_v29, %s9991_s24  ;;  %2560 = vrot.lane.b32.xlu1 %v2333_v29, %s9989_s25 }
 0x6e6   : > { %2563 = vrot.lane.b32.xlu0 %v2333_v29, %s9987_s20 }
 0x730   : > { %v2147_v32 = vpop.xlane.xlu1 %2146 }
 0x731   : > { %v2148_v33 = vmul.f32 0.03125, %v2147_v32 }
 0x733   : > { %v2149_v34 = vadd.f32 1e-05, %v2148_v33 }
 0x735   : > { %8534 = vrsqrt.f32 %v2149_v34 }
 0x73f   : > { %v8535_v38 = vpop.eup %8534 }
 0x740   : > { %v2151_v39 = vmul.f32 %v8535_v38, %v2143_v12 }
 0x742   : > { %v2156_v41 = vmul.f32 %v2155_v37, %v2151_v39  ;;  %v2184_v39 = vsub.s32 4, %v8936_v16 }
 0x744   : > { %v9166_v43 = vadd.f32 %v2160_v40, %v2156_v41 }
 0x746   : > { %7997 = vmatmul.mubr.msk.f32.vlgmr.msra.gmra.mrb[14].mxu1 %vm598_vm1, %v9166_v43 }
 0x747   : > { %8018 = vmatprep.mubr.msk.f32.mxu1 %vm8729_vm0, %v8730_v1  ;;  %8349 = vmatpush3.bf16.msra.mxu1 %v8348_v23 }
 0x748   : > { %8350 = vmatprep.subr.bf16.mxu1 %v8728_v0 }
 0x74b   : > { %8352 = vmatpush3.bf16.msra.mxu1 %v8351_v27 }
 0x74c   : > { %8026 = vmatprep.subr.mxu1 %v8730_v1 }
 0x74e   : > { %8019 = vmatmul.mubr.msk.f32.vlgmr.msra.gmra.mrb[16].mxu1 %vm598_vm1, %v9135_v14  ;;  %v2185_v14 = vrot.slane %v8944_v18, %v2184_v39 }
 0x74f   : > { %8028 = vmatprep.mubr.msk.f32.mxu1 %vm8729_vm0, %v8730_v1 }
 0x754   : > { %v2558_v44 = vpop.permute.xlu0 %2557  ;;  %v2561_v45 = vpop.permute.xlu1 %2560 }
 0x755   : > { %v2566_v46 = vcombine.low %v2333_v29, %v2561_v45  ;;  %v2567_v48 = vcombine.high %v2333_v29, %v2561_v45 }
 0x757   : > { %v2574_v52 = vrot.slane %v2566_v46, %v8966_v42  ;;  %v2581_v54 = vrot.slane %v2567_v48, %v8966_v42 }
 0x758   : > { %v2564_v50 = vpop.permute.xlu0 %2563 }
 0x759   : > { %v2582_v56 = vcombine.low %v2558_v44, %v2564_v50  ;;  %v2583_v57 = vcombine.high %v2558_v44, %v2564_v50 }
 0x75b   : > { %v2590_v58 = vrot.slane %v2582_v56, %v8966_v42  ;;  %v2597_v47 = vrot.slane %v2583_v57, %v8966_v42 }
 0x75d   : > { %v2598_v51 = vcombine.low %v2574_v52, %v2590_v58  ;;  %v2599_v53 = vcombine.high %v2574_v52, %v2590_v58  ;;  %v2614_v59 = vcombine.low %v2581_v54, %v2597_v47  ;;  %v2615_v60 = vcombine.high %v2581_v54, %v2597_v47 }
 0x75f   : > { %v2606_v61 = vrot.slane %v2598_v51, %v8969_v49  ;;  %v2613_v62 = vrot.slane %v2599_v53, %v8969_v49  ;;  %v2622_v63 = vrot.slane %v2614_v59, %v8969_v49  ;;  %v2629_v2 = vrot.slane %v2615_v60, %v8969_v49 }
 0x761   : > { %v2634_v3 = vcombine.low %v2606_v61, %v2613_v62  ;;  %v7625_v4 = vcombine.high %v2606_v61, %v2613_v62  ;;  %v2650_v5 = vcombine.low %v2622_v63, %v2629_v2  ;;  %v7626_v7 = vcombine.high %v2622_v63, %v2629_v2 }
 0x763   : > { %v2641_v8 = vrot.slane %v2634_v3, %v8966_v42  ;;  %v2649_v9 = vrot.slane %v7625_v4, %v8966_v42  ;;  %v2657_v10 = vrot.slane %v2650_v5, %v8966_v42  ;;  %v2665_v11 = vrot.slane %v7626_v7, %v8966_v42 }
 0x765   : > { %v2667_v12 = vcombine.high %v2641_v8, %v2649_v9  ;;  %v2683_v13 = vcombine.high %v2657_v10, %v2665_v11  ;;  %v2666_v21 = vcombine.low %v2641_v8, %v2649_v9  ;;  %v2682_v22 = vcombine.low %v2657_v10, %v2665_v11 }
 0x767   : > { %v2674_v28 = vrot.slane %v2666_v21, %v8969_v49  ;;  %v2690_v29 = vrot.slane %v2682_v22, %v8969_v49  ;;  %v2681_v33 = vrot.slane %v2667_v12, %v8969_v49  ;;  %v2697_v34 = vrot.slane %v2683_v13, %v8969_v49 }
 0x769   : > { %v2698_v30 = vcombine.low %v2674_v28, %v2690_v29  ;;  %v2699_v32 = vcombine.high %v2674_v28, %v2690_v29  ;;  %v2700_v37 = vcombine.low %v2681_v33, %v2697_v34  ;;  %v2701_v38 = vcombine.high %v2681_v33, %v2697_v34  ;;  %v569_v33 = vld [vmem:[%s563_s26] sm:$0x1]  ;;  %s8739_s26 = smov [#allocation6]  }
 0x76a   : > { %vm570_vm6 = vcmp.eq.f32.partialorder %v569_v33, 0.0  ;;  %s8629_s18 = sshll.u32 %s8739_s26, 4  ;;  %s8630_s18 = int_to_ptr.vmem [resolvable:$false] %s8629_s18 }
 0x76b   : > { %8022 = vmatpush3.xpose.msk.msra.mxu0 %vm1258_vm2, %v2698_v30  ;;  %8027 = vmatpush3.xpose.msk.msra.mxu1 %vm1258_vm2, %v2699_v32  ;;  %v571_v34 = vsel %vm570_vm6, -1e+10, %v8730_v1 }
 0x76c   : > { %8031 = vmatprep.subr.mxu0 %v8730_v1  ;;  %8036 = vmatprep.subr.mxu1 %v8730_v1 }
 0x819   : > { %v2255_v40 = vpop.f32.mrb[14].mxu1 }
 0x81a   : > { %v2256_v41 = vadd.f32 %v2255_v40, %v2185_v14  ;;  %v7998_v44 = vpop.f32.mrb[15].mxu1 }
 0x81c   : > { %2411 = vrot.lane.b32.xlu1 %v2256_v41, %s9991_s24  ;;  %2414 = vrot.lane.b32.xlu0 %v2256_v41, %s9989_s25 }
 0x820   : > { %2417 = vrot.lane.b32.xlu1 %v2256_v41, %s9987_s20 }
 0x821   : > { %v9205_v45 = vpop.f32.mrb[16].mxu1 }
 0x822   : > { %v8020_v46 = vpop.f32.mrb[17].mxu1 }
 0x88e   : > { %v2412_v48 = vpop.permute.xlu1 %2411  ;;  %v2415_v50 = vpop.permute.xlu0 %2414 }
 0x88f   : > { %v2420_v52 = vcombine.low %v2256_v41, %v2415_v50  ;;  %v2421_v54 = vcombine.high %v2256_v41, %v2415_v50 }
 0x891   : > { %v2428_v18 = vrot.slane %v2420_v52, %v8966_v42  ;;  %v2435_v47 = vrot.slane %v2421_v54, %v8966_v42 }
 0x892   : > { %v2418_v56 = vpop.permute.xlu1 %2417 }
 0x893   : > { %v2436_v57 = vcombine.low %v2412_v48, %v2418_v56  ;;  %v2437_v58 = vcombine.high %v2412_v48, %v2418_v56 }
 0x895   : > { %v2444_v51 = vrot.slane %v2436_v57, %v8966_v42  ;;  %v2451_v53 = vrot.slane %v2437_v58, %v8966_v42 }
 0x897   : > { %v2452_v59 = vcombine.low %v2428_v18, %v2444_v51  ;;  %v2453_v60 = vcombine.high %v2428_v18, %v2444_v51  ;;  %v2468_v61 = vcombine.low %v2435_v47, %v2451_v53  ;;  %v2469_v62 = vcombine.high %v2435_v47, %v2451_v53 }
 0x899   : > { %v2460_v63 = vrot.slane %v2452_v59, %v8969_v49  ;;  %v2467_v2 = vrot.slane %v2453_v60, %v8969_v49  ;;  %v2476_v3 = vrot.slane %v2468_v61, %v8969_v49  ;;  %v2483_v4 = vrot.slane %v2469_v62, %v8969_v49 }
 0x89a   : > { %v2338_v61 = vsub.s32 6, %v8936_v16 }
 0x89b   : > { %v2488_v5 = vcombine.low %v2460_v63, %v2467_v2  ;;  %v7623_v7 = vcombine.high %v2460_v63, %v2467_v2  ;;  %v2504_v8 = vcombine.low %v2476_v3, %v2483_v4  ;;  %v7624_v9 = vcombine.high %v2476_v3, %v2483_v4  ;;  %v9259_v63 = vld [vmem:[%s9962_s5] sm:$0xff] }
 0x89c   : > { %v2339_v2 = vrot.slane %v9259_v63, %v2338_v61 }
 0x89d   : > { %v2495_v10 = vrot.slane %v2488_v5, %v8966_v42  ;;  %v2503_v11 = vrot.slane %v7623_v7, %v8966_v42  ;;  %v2511_v12 = vrot.slane %v2504_v8, %v8966_v42  ;;  %v2519_v13 = vrot.slane %v7624_v9, %v8966_v42 }
 0x89e   : > { %v2407_v3 = vadd.f32 %v9205_v45, %v2339_v2 }
 0x89f   : > { %v2520_v15 = vcombine.low %v2495_v10, %v2503_v11  ;;  %v2521_v20 = vcombine.high %v2495_v10, %v2503_v11  ;;  %v2536_v21 = vcombine.low %v2511_v12, %v2519_v13  ;;  %v2537_v22 = vcombine.high %v2511_v12, %v2519_v13 }
 0x8a1   : > { %v2528_v23 = vrot.slane %v2520_v15, %v8969_v49  ;;  %v2544_v24 = vrot.slane %v2536_v21, %v8969_v49  ;;  %v2535_v28 = vrot.slane %v2521_v20, %v8969_v49  ;;  %v2551_v29 = vrot.slane %v2537_v22, %v8969_v49 }
 0x8a3   : > { %v2552_v25 = vcombine.low %v2528_v23, %v2544_v24  ;;  %v2553_v27 = vcombine.high %v2528_v23, %v2544_v24  ;;  %v2554_v30 = vcombine.low %v2535_v28, %v2551_v29  ;;  %v2555_v32 = vcombine.high %v2535_v28, %v2551_v29 }
 0x8a5   : > { %8024 = vmatmul.mubr.msk.f32.vlgmr.msra.gmra.mrb[12].mxu0 %vm1258_vm2, %v2552_v25  ;;  %8029 = vmatmul.mubr.msk.f32.vlgmr.msra.gmra.mrb[18].mxu1 %vm1258_vm2, %v2553_v27 }
 0x8a6   : > { %8032 = vmatpush3.xpose.msk.msra.mxu0 %vm1258_vm2, %v2700_v37  ;;  %8037 = vmatpush3.xpose.msk.msra.mxu1 %vm1258_vm2, %v2701_v38  ;;  %v9245_v37 = vrot.slane %v571_v34, %v8947_v19 }
 0x8a7   : > { %8033 = vmatprep.mubr.msk.f32.mxu0 %vm8729_vm0, %v8730_v1  ;;  %8038 = vmatprep.mubr.msk.f32.mxu1 %vm8729_vm0, %v8730_v1 }
 0x8a8   : > { %8041 = vmatprep.subr.mxu0 %v8730_v1  ;;  %8046 = vmatprep.subr.mxu1 %v8730_v1 }
 0x8a9   : > { %8034 = vmatmul.mubr.msk.f32.vlgmr.msra.gmra.mrb[14].mxu0 %vm1258_vm2, %v2554_v30  ;;  %8039 = vmatmul.mubr.msk.f32.vlgmr.msra.gmra.mrb[20].mxu1 %vm1258_vm2, %v2555_v32 }
 0x8aa   : > { %8043 = vmatprep.mubr.msk.f32.mxu0 %vm8729_vm0, %v8730_v1  ;;  %8048 = vmatprep.mubr.msk.f32.mxu1 %vm8729_vm0, %v8730_v1 }
 0x978   : > { %v2920_v38 = vpop.f32.mrb[12].mxu0  ;;  %v2996_v14 = vpop.f32.mrb[18].mxu1 }
 0x979   : > { %v3152_v40 = vmul.f32 0.35355338, %v2920_v38  ;;  %v3153_v41 = vmul.f32 0.35355338, %v2996_v14  ;;  %v8025_v44 = vpop.f32.mrb[13].mxu0  ;;  %v8030_v46 = vpop.f32.mrb[19].mxu1 }
 0x97b   : > { %v3163_v48 = vadd.f32 %v9245_v37, %v3153_v41  ;;  %v3162_v50 = vadd.f32 %v9245_v37, %v3152_v40 }
 0x97c   : > { %v3072_v52 = vpop.f32.mrb[14].mxu0  ;;  %v3148_v54 = vpop.f32.mrb[20].mxu1 }
 0x97d   : > { %v3154_v56 = vmul.f32 0.35355338, %v3072_v52  ;;  %v8035_v57 = vpop.f32.mrb[15].mxu0  ;;  %v8040_v58 = vpop.f32.mrb[21].mxu1  ;;  %v3155_v18 = vmul.f32 0.35355338, %v3148_v54 }
 0x97e   : > { %v3169_v47 = vsel %vm1258_vm2, %v3163_v48, -inf  ;;  %v3166_v51 = vsel %vm1258_vm2, %v3162_v50, -inf }
 0x97f   : > { %3170 = vmax.xlane.f32.xlu1 %v3169_v47  ;;  %3167 = vmax.xlane.f32.xlu0 %v3166_v51  ;;  %v3164_v53 = vadd.f32 %v9245_v37, %v3154_v56  ;;  %v3165_v60 = vadd.f32 %v9245_v37, %v3155_v18 }
 0x981   : > { %v3172_v59 = vsel %vm1258_vm2, %v3164_v53, -inf  ;;  %v3175_v62 = vsel %vm1258_vm2, %v3165_v60, -inf }
 0x983   : > { %3173 = vmax.xlane.f32.xlu0 %v3172_v59 }
 0x987   : > { %3176 = vmax.xlane.f32.xlu0 %v3175_v62 }
 0x990   : > { %2703 = vrot.lane.b32.xlu1 %v2407_v3, %s9991_s24  ;;  %s9717_s24 = sand.u32 1, %s8715_s19  }
 0x991   : > { %s7420_s1 = scalar_lea.sflag [#allocation7], %s9717_s24 }
 0xa0c   : > { %v3171_v4 = vpop.xlane.xlu1 %3170  ;;  %v3168_v5 = vpop.xlane.xlu0 %3167 }
 0xa0d   : > { %v3179_v7 = vsub.f32 %v3163_v48, %v3171_v4  ;;  %v3178_v8 = vsub.f32 %v3162_v50, %v3168_v5 }
 0xa0f   : > { %v3184_v9 = vmul.f32 1.442695, %v3179_v7  ;;  %v3182_v10 = vmul.f32 1.442695, %v3178_v8 }
 0xa10   : > { %v3174_v11 = vpop.xlane.xlu0 %3173  ;;  %v2704_v30 = vpop.permute.xlu1 %2703 }
 0xa11   : > { %8536 = vpow2.f32 %v3184_v9  ;;  %v3180_v12 = vsub.f32 %v3164_v53, %v3174_v11 }
 0xa12   : > { %8538 = vpow2.f32 %v3182_v10 }
 0xa13   : > { %v3186_v13 = vmul.f32 1.442695, %v3180_v12 }
 0xa14   : > { %v3177_v15 = vpop.xlane.xlu0 %3176 }
 0xa15   : > { %8540 = vpow2.f32 %v3186_v13  ;;  %v3181_v20 = vsub.f32 %v3165_v60, %v3177_v15 }
 0xa17   : > { %v3188_v21 = vmul.f32 1.442695, %v3181_v20 }
 0xa19   : > { %8542 = vpow2.f32 %v3188_v21 }
 0xa1b   : > { %v9266_v22 = vpop.eup %8536 }
 0xa1c   : > { %v8539_v45 = vpop.eup %8538  ;;  %v3193_v23 = vsel %vm1258_vm2, %v9266_v22, 0.0 }
 0xa1d   : > { %v3190_v24 = vsel %vm1258_vm2, %v8539_v45, 0.0  ;;  %3194 = vadd.xlane.f32.xlu0 %v3193_v23 }
 0xa1e   : > { %3191 = vadd.xlane.f32.xlu1 %v3190_v24 }
 0xa1f   : > { %v9271_v25 = vpop.eup %8540 }
 0xa20   : > { %v3196_v27 = vsel %vm1258_vm2, %v9271_v25, 0.0 }
 0xa22   : > { %3197 = vadd.xlane.f32.xlu1 %v3196_v27 }
 0xa23   : > { %v9275_v28 = vpop.eup %8542 }
 0xa24   : > { %v3199_v29 = vsel %vm1258_vm2, %v9275_v28, 0.0 }
 0xa25   : > { %3200 = vadd.xlane.f32.xlu0 %v3199_v29 }
 0xa33   : > { %2709 = vrot.lane.b32.xlu1 %v2407_v3, %s9987_s20  ;;  %s10017_s20 = smov 16  }
 0xa3b   : > { %2706 = vrot.lane.b32.xlu0 %v2407_v3, %s9989_s25  ;;  %s10018_s25 = smov 8  }
 0xaaa   : > { %v3195_v33 = vpop.xlane.xlu0 %3194 }
 0xaab   : > { %v3192_v32 = vpop.xlane.xlu1 %3191  ;;  %8544 = vrcp.f32 %v3195_v33 }
 0xaac   : > { %8546 = vrcp.f32 %v3192_v32 }
 0xaaf   : > { %v3198_v34 = vpop.xlane.xlu1 %3197 }
 0xab0   : > { %8548 = vrcp.f32 %v3198_v34 }
 0xab2   : > { %v3201_v38 = vpop.xlane.xlu0 %3200 }
 0xab3   : > { %v2710_v14 = vpop.permute.xlu1 %2709  ;;  %8550 = vrcp.f32 %v3201_v38 }
 0xab4   : > { %v2728_v40 = vcombine.low %v2704_v30, %v2710_v14  ;;  %v2729_v41 = vcombine.high %v2704_v30, %v2710_v14 }
 0xab5   : > { %v8545_v15 = vpop.eup %8544 }
 0xab6   : > { %v2707_v44 = vpop.permute.xlu0 %2706  ;;  %v2736_v50 = vrot.slane %v2728_v40, %v8966_v42  ;;  %v2743_v52 = vrot.slane %v2729_v41, %v8966_v42  ;;  %v8547_v21 = vpop.eup %8546  ;;  %v3205_v34 = vmul.f32 %v8545_v15, %v9266_v22  ;;  %v2178_v22 = vld [vmem:[#allocation2 + $0xe0] sm:$0xff] }
 0xab7   : > { %v2712_v46 = vcombine.low %v2407_v3, %v2707_v44  ;;  %v2713_v48 = vcombine.high %v2407_v3, %v2707_v44  ;;  %v3203_v33 = vmul.f32 %v8547_v21, %v8539_v45  ;;  %v2179_v45 = vld [vmem:[#allocation2 + $0xe8] sm:$0xff] }
 0xab9   : > { %v2720_v54 = vrot.slane %v2712_v46, %v8966_v42  ;;  %v2727_v56 = vrot.slane %v2713_v48, %v8966_v42 }
 0xaba   : > { %v8549_v32 = vpop.eup %8548 }
 0xabb   : > { %v2744_v57 = vcombine.low %v2720_v54, %v2736_v50  ;;  %v2745_v58 = vcombine.high %v2720_v54, %v2736_v50  ;;  %v2760_v18 = vcombine.low %v2727_v56, %v2743_v52  ;;  %v2761_v47 = vcombine.high %v2727_v56, %v2743_v52 }
 0xabc   : > { %v3207_v41 = vmul.f32 %v8549_v32, %v9271_v25  ;;  %v8354_v25 = vpack.c.bf16 %v2179_v45, %v2178_v22 }
 0xabd   : > { %v2752_v51 = vrot.slane %v2744_v57, %v8969_v49  ;;  %v2759_v53 = vrot.slane %v2745_v58, %v8969_v49  ;;  %v2768_v59 = vrot.slane %v2760_v18, %v8969_v49  ;;  %v2775_v60 = vrot.slane %v2761_v47, %v8969_v49  ;;  %v8551_v38 = vpop.eup %8550 }
 0xabe   : > { %v3209_v44 = vmul.f32 %v8551_v38, %v9275_v28 }
 0xabf   : > { %v2780_v62 = vcombine.low %v2752_v51, %v2759_v53  ;;  %v7627_v2 = vcombine.high %v2752_v51, %v2759_v53  ;;  %v2796_v3 = vcombine.low %v2768_v59, %v2775_v60  ;;  %v7628_v4 = vcombine.high %v2768_v59, %v2775_v60 }
 0xac1   : > { %v2787_v5 = vrot.slane %v2780_v62, %v8966_v42  ;;  %v2795_v7 = vrot.slane %v7627_v2, %v8966_v42  ;;  %v2803_v8 = vrot.slane %v2796_v3, %v8966_v42  ;;  %v2811_v9 = vrot.slane %v7628_v4, %v8966_v42 }
 0xac3   : > { %v2812_v10 = vcombine.low %v2787_v5, %v2795_v7  ;;  %v2813_v11 = vcombine.high %v2787_v5, %v2795_v7  ;;  %v2828_v12 = vcombine.low %v2803_v8, %v2811_v9  ;;  %v2829_v13 = vcombine.high %v2803_v8, %v2811_v9  ;;  %v2180_v7 = vld [vmem:[#allocation2 + $0xf0] sm:$0xff]  ;;  %v2181_v8 = vld [vmem:[#allocation2 + $0xf8] sm:$0xff] }
 0xac5   : > { %v2820_v20 = vrot.slane %v2812_v10, %v8969_v49  ;;  %v2836_v23 = vrot.slane %v2828_v12, %v8969_v49  ;;  %v2827_v24 = vrot.slane %v2813_v11, %v8969_v49  ;;  %v2843_v27 = vrot.slane %v2829_v13, %v8969_v49 }
 0xac6   : > { %v8357_v13 = vpack.c.bf16 %v2181_v8, %v2180_v7  ;;  %v3757_v8 = vld [vmem:[%s9963_s6 + $0x18] sm:$0xff] }
 0xac7   : > { %v2844_v29 = vcombine.low %v2820_v20, %v2836_v23  ;;  %v2845_v30 = vcombine.high %v2820_v20, %v2836_v23  ;;  %v2846_v14 = vcombine.low %v2827_v24, %v2843_v27  ;;  %v2847_v40 = vcombine.high %v2827_v24, %v2843_v27 }
 0xac9   : > { %8042 = vmatpush3.msra.mxu0 %v2844_v29  ;;  %8047 = vmatpush3.msra.mxu1 %v2845_v30 }
 0xaca   : > { %8044 = vmatmul.mubr.msk.f32.vlgmr.msra.gmra.mrb[16].mxu0 %vm1258_vm2, %v3203_v33  ;;  %8049 = vmatmul.mubr.msk.f32.vlgmr.msra.gmra.mrb[22].mxu1 %vm1258_vm2, %v3205_v34 }
 0xacb   : > { %8051 = vmatprep.subr.mxu0 %v8730_v1  ;;  %8056 = vmatprep.subr.mxu1 %v8730_v1 }
 0xacc   : > { %8052 = vmatpush3.msra.mxu0 %v2846_v14  ;;  %8057 = vmatpush3.msra.mxu1 %v2847_v40 }
 0xacd   : > { %8053 = vmatprep.mubr.msk.f32.mxu0 %vm8729_vm0, %v8730_v1  ;;  %8058 = vmatprep.mubr.msk.f32.mxu1 %vm8729_vm0, %v8730_v1 }
 0xace   : > { %8054 = vmatmul.mubr.msk.f32.vlgmr.msra.gmra.mrb[18].mxu0 %vm1258_vm2, %v3207_v41  ;;  %8059 = vmatmul.mubr.msk.f32.vlgmr.msra.gmra.mrb[24].mxu1 %vm1258_vm2, %v3209_v44 }
 0xacf   : > { %8353 = vmatprep.subr.bf16.mxu0 %v8728_v0  ;;  %8069 = vmatprep.mubr.msk.f32.mxu0 %vm8729_vm0, %v8730_v1 }
 0xad0   : > { %8359 = vmatprep.subr.bf16.mxu1 %v8728_v0  ;;  %8080 = vmatprep.mubr.msk.f32.mxu1 %vm8729_vm0, %v8730_v1 }
 0xad1   : > { %8355 = vmatpush3.bf16.msra.mxu0 %v8354_v25 }
 0xad2   : > { %8356 = vmatprep.subr.bf16.mxu0 %v8728_v0 }
 0xad5   : > { %8358 = vmatpush3.bf16.msra.mxu0 %v8357_v13 }
 0xad6   : > { %8365 = vmatprep.subr.bf16.mxu0 %v8728_v0 }
 0xb9d   : > { %v3279_v28 = vpop.f32.mrb[16].mxu0  ;;  %v3352_v46 = vpop.f32.mrb[22].mxu1 }
 0xb9e   : > { %v8045_v48 = vpop.f32.mrb[17].mxu0  ;;  %v8050_v50 = vpop.f32.mrb[23].mxu1 }
 0xba1   : > { %v3425_v52 = vpop.f32.mrb[18].mxu0  ;;  %v3498_v54 = vpop.f32.mrb[24].mxu1 }
 0xba2   : > { %v3502_v56 = vcombine.low %v3279_v28, %v3425_v52  ;;  %v3503_v57 = vcombine.high %v3279_v28, %v3425_v52  ;;  %v3518_v58 = vcombine.low %v3352_v46, %v3498_v54  ;;  %v3519_v18 = vcombine.high %v3352_v46, %v3498_v54  ;;  %v8055_v47 = vpop.f32.mrb[19].mxu0  ;;  %v8060_v51 = vpop.f32.mrb[25].mxu1 }
 0xba4   : > { %v3510_v53 = vrot.slane %v3502_v56, %v8966_v42  ;;  %v3517_v59 = vrot.slane %v3503_v57, %v8966_v42  ;;  %v3526_v60 = vrot.slane %v3518_v58, %v8966_v42  ;;  %v3533_v62 = vrot.slane %v3519_v18, %v8966_v42 }
 0xba5   : > { %v3655_v57 = vsub.s32 7, %v8936_v16  ;;  %v7699_v16 = vld [vmem:[%s9963_s6 + $0x20] sm:$0xff] }
 0xba6   : > { %v3534_v2 = vcombine.low %v3510_v53, %v3526_v60  ;;  %v3535_v3 = vcombine.high %v3510_v53, %v3526_v60  ;;  %v3550_v4 = vcombine.low %v3517_v59, %v3533_v62  ;;  %v3551_v5 = vcombine.high %v3517_v59, %v3533_v62 }
 0xba7   : > { %v3656_v58 = vrot.slane %v9259_v63, %v3655_v57  ;;  %v3755_v63 = vld [vmem:[%s9963_s6 + $0x8] sm:$0xff] }
 0xba8   : > { %v3542_v9 = vrot.slane %v3534_v2, %v8969_v49  ;;  %v3549_v10 = vrot.slane %v3535_v3, %v8969_v49  ;;  %v3558_v11 = vrot.slane %v3550_v4, %v8969_v49  ;;  %v3565_v12 = vrot.slane %v3551_v5, %v8969_v49  ;;  %v3754_v5 = vld [vmem:[%s9963_s6] sm:$0xff] }
 0xba9   : > { %v8360_v7 = vpack.c.bf16 %v3755_v63, %v3754_v5  ;;  %v3970_v5 = vld [vmem:[#allocation2 + $0x148] sm:$0xff] }
 0xbaa   : > { %v3570_v15 = vcombine.low %v3542_v9, %v3549_v10  ;;  %v7641_v20 = vcombine.high %v3542_v9, %v3549_v10  ;;  %v3586_v21 = vcombine.low %v3558_v11, %v3565_v12  ;;  %v7642_v23 = vcombine.high %v3558_v11, %v3565_v12  ;;  %v3839_v10 = vld [vmem:[%s9965_s8] sm:$0xff]  ;;  %v3840_v11 = vld [vmem:[%s9965_s8 + $0x8] sm:$0xff]  ;;  %v3841_v12 = vld [vmem:[%s9965_s8 + $0x10] sm:$0xff] }
 0xbab   : > { %8361 = vmatpush3.bf16.msra.mxu1 %v8360_v7  ;;  %v8366_v13 = vpack.c.bf16 %v3840_v11, %v3839_v10  ;;  %v3961_v7 = vld [vmem:[#allocation2 + $0x110] sm:$0xff]  ;;  %v3972_v10 = vld [vmem:[#allocation2 + $0x158] sm:$0xff] }
 0xbac   : > { %v3577_v24 = vrot.slane %v3570_v15, %v8966_v42  ;;  %v3585_v27 = vrot.slane %v7641_v20, %v8966_v42  ;;  %v3593_v29 = vrot.slane %v3586_v21, %v8966_v42  ;;  %v3601_v30 = vrot.slane %v7642_v23, %v8966_v42  ;;  %8362 = vmatprep.subr.bf16.mxu1 %v8728_v0  ;;  %v3842_v15 = vld [vmem:[%s9965_s8 + $0x18] sm:$0xff]  ;;  %v3843_v21 = vld [vmem:[%s9965_s8 + $0x20] sm:$0xff]  ;;  %v3844_v23 = vld [vmem:[%s9965_s8 + $0x28] sm:$0xff] }
 0xbad   : > { %v8369_v20 = vpack.c.bf16 %v3842_v15, %v3841_v12 }
 0xbae   : > { %v3603_v32 = vcombine.high %v3577_v24, %v3585_v27  ;;  %v3619_v33 = vcombine.high %v3593_v29, %v3601_v30  ;;  %v3602_v34 = vcombine.low %v3577_v24, %v3585_v27  ;;  %v3618_v38 = vcombine.low %v3593_v29, %v3601_v30 }
 0xbaf   : > { %v8372_v24 = vpack.c.bf16 %v3844_v23, %v3843_v21 }
 0xbb0   : > { %v3617_v14 = vrot.slane %v3603_v32, %v8969_v49  ;;  %v3633_v40 = vrot.slane %v3619_v33, %v8969_v49  ;;  %v3610_v41 = vrot.slane %v3602_v34, %v8969_v49  ;;  %v3626_v44 = vrot.slane %v3618_v38, %v8969_v49 }
 0xbb1   : > { %v3747_v32 = vrot.slane %v9155_v35, %v8939_v17  ;;  %v3752_v38 = vrot.slane %v9160_v36, %v8939_v17 }
 0xbb2   : > { %v3636_v22 = vcombine.low %v3617_v14, %v3633_v40  ;;  %v3635_v45 = vcombine.high %v3610_v41, %v3626_v44  ;;  %v3637_v25 = vcombine.high %v3617_v14, %v3633_v40  ;;  %v3634_v28 = vcombine.low %v3610_v41, %v3626_v44  ;;  %v3845_v41 = vld [vmem:[%s9965_s8 + $0x30] sm:$0xff]  ;;  %v3846_v44 = vld [vmem:[%s9965_s8 + $0x38] sm:$0xff] }
 0xbb4   : > { %3643 = vrot.lane.b32.xlu0 %v3636_v22, %s9985_s17  ;;  %3639 = vrot.lane.b32.xlu1 %v3635_v45, %s9983_s23  ;;  %v8375_v22 = vpack.c.bf16 %v3846_v44, %v3845_v41  ;;  %v7644_v45 = vld [vmem:[%s9964_s7] ss:$0 sm:$0xff]  ;;  %s10015_s17 = smov 112   ;;  %s10016_s23 = smov 104  }
 0xbb8   : > { %3647 = vrot.lane.b32.xlu1 %v3637_v25, %s10013_s16 }
 0xc26   : > { %v3640_v46 = vpop.permute.xlu1 %3639  ;;  %v3644_v48 = vpop.permute.xlu0 %3643 }
 0xc27   : > { %v3650_v50 = vsel %vm1258_vm2, %v3634_v28, %v3640_v46 }
 0xc28   : > { %v3651_v54 = vsel %vm2056_vm4, %v3650_v50, %v3644_v48  ;;  %v7646_v50 = vld [vmem:[%s9966_s9] ss:$0 sm:$0xff] }
 0xc2a   : > { %v3648_v52 = vpop.permute.xlu1 %3647 }
 0xc2b   : > { %v3652_v56 = vsel %vm2058_vm5, %v3651_v54, %v3648_v52 }
 0xc2c   : > { %8070 = vmatmul.mubr.msk.f32.vlgmr.msra.gmra.mrb[20].mxu0 %vm598_vm1, %v3652_v56 }
 0xc2d   : > { %8099 = vmatprep.mubr.msk.f32.mxu0 %vm8729_vm0, %v8730_v1  ;;  %8367 = vmatpush3.bf16.msra.mxu0 %v8366_v13 }
 0xc2e   : > { %8368 = vmatprep.subr.bf16.mxu0 %v8728_v0 }
 0xc31   : > { %8370 = vmatpush3.bf16.msra.mxu0 %v8369_v20  ;;  %v3945_v20 = vrot.slane %v9155_v35, %v9038_v31 }
 0xc32   : > { %8371 = vmatprep.subr.bf16.mxu0 %v8728_v0 }
 0xc35   : > { %8373 = vmatpush3.bf16.msra.mxu0 %v8372_v24  ;;  %v3950_v24 = vrot.slane %v9160_v36, %v9038_v31  ;;  %v9437_v36 = vld [vmem:[%s9962_s5 + $0x8] sm:$0xff] }
 0xc36   : > { %8374 = vmatprep.subr.bf16.mxu0 %v8728_v0 }
 0xc39   : > { %8376 = vmatpush3.bf16.msra.mxu0 %v8375_v22 }
 0xc3a   : > { %8389 = vmatprep.subr.bf16.mxu0 %v8728_v0 }
 0xcff   : > { %v3726_v18 = vpop.f32.mrb[20].mxu0 }
 0xd00   : > { %v3727_v47 = vadd.f32 %v3726_v18, %v3656_v58  ;;  %v8071_v51 = vpop.f32.mrb[21].mxu0 }
 0xd02   : > { %v3730_v53 = vadd.f32 %v3727_v47, %v9166_v43  ;;  %v3756_v43 = vld [vmem:[%s9963_s6 + $0x10] sm:$0xff] }
 0xd03   : > { %v8363_v9 = vpack.c.bf16 %v3757_v8, %v3756_v43  ;;  %v3962_v43 = vld [vmem:[#allocation2 + $0x118] sm:$0xff]  ;;  %v3971_v8 = vld [vmem:[#allocation2 + $0x150] sm:$0xff] }
 0xd04   : > { %v3731_v59 = vsel %vm598_vm1, %v3730_v53, 0.0  ;;  %v8393_v11 = vpack.c.bf16 %v3972_v10, %v3971_v8 }
 0xd05   : > { %3732 = vadd.xlane.f32.xlu0 %v3731_v59  ;;  %8364 = vmatpush3.bf16.msra.mxu1 %v8363_v9  ;;  %v8381_v9 = vpack.c.bf16 %v3962_v43, %v3961_v7 }
 0xd06   : > { %8377 = vmatprep.subr.bf16.mxu1 %v8728_v0 }
 0xd92   : > { %v3733_v60 = vpop.xlane.xlu0 %3732 }
 0xd93   : > { %v3734_v62 = vmul.f32 0.03125, %v3733_v60 }
 0xd95   : > { %v3735_v2 = vsub.f32 %v3730_v53, %v3734_v62  ;;  %v3959_v62 = vld [vmem:[#allocation2 + $0x100] sm:$0xff] }
 0xd97   : > { %v3736_v3 = vmul.f32 %v3735_v2, %v3735_v2 }
 0xd99   : > { %v3737_v4 = vsel %vm598_vm1, %v3736_v3, 0.0 }
 0xd9a   : > { %3738 = vadd.xlane.f32.xlu1 %v3737_v4  ;;  %v3969_v4 = vld [vmem:[#allocation2 + $0x140] sm:$0xff] }
 0xd9b   : > { %v8390_v63 = vpack.c.bf16 %v3970_v5, %v3969_v4 }
 0xe27   : > { %v3739_v27 = vpop.xlane.xlu1 %3738 }
 0xe28   : > { %v3740_v29 = vmul.f32 0.03125, %v3739_v27  ;;  %v3964_v27 = vld [vmem:[#allocation2 + $0x120] sm:$0xff] }
 0xe2a   : > { %v3741_v30 = vadd.f32 1e-05, %v3740_v29  ;;  %v3965_v29 = vld [vmem:[#allocation2 + $0x128] sm:$0xff] }
 0xe2c   : > { %8552 = vrsqrt.f32 %v3741_v30 }
 0xe36   : > { %v8553_v33 = vpop.eup %8552 }
 0xe37   : > { %v3743_v34 = vmul.f32 %v8553_v33, %v3735_v2  ;;  %v3960_v2 = vld [vmem:[#allocation2 + $0x108] sm:$0xff] }
 0xe38   : > { %v8378_v3 = vpack.c.bf16 %v3960_v2, %v3959_v62 }
 0xe39   : > { %v3748_v14 = vmul.f32 %v3747_v32, %v3743_v34  ;;  %v8384_v32 = vpack.c.bf16 %v3965_v29, %v3964_v27  ;;  %v3966_v34 = vld [vmem:[#allocation2 + $0x130] sm:$0xff] }
 0xe3b   : > { %v3753_v40 = vadd.f32 %v3752_v38, %v3748_v14  ;;  %v3967_v38 = vld [vmem:[#allocation2 + $0x138] sm:$0xff]  ;;  %v3981_v14 = vrot.slane %v9437_v36, %v8947_v19 }
 0xe3c   : > { %v8387_v35 = vpack.c.bf16 %v3967_v38, %v3966_v34 }
 0xe3d   : > { %8081 = vmatmul.mubr.msk.f32.vlgmr.msra.gmra.mrb[26].mxu1 %vm598_vm1, %v3753_v40 }
 0xe3e   : > { %8110 = vmatprep.mubr.msk.f32.mxu1 %vm8729_vm0, %v8730_v1  ;;  %8379 = vmatpush3.bf16.msra.mxu1 %v8378_v3 }
 0xe3f   : > { %8380 = vmatprep.subr.bf16.mxu1 %v8728_v0 }
 0xe42   : > { %8382 = vmatpush3.bf16.msra.mxu1 %v8381_v9 }
 0xe43   : > { %8383 = vmatprep.subr.bf16.mxu1 %v8728_v0 }
 0xf10   : > { %v3834_v25 = vpop.f32.mrb[26].mxu1 }
 0xf11   : > { %v3835_v28 = vadd.f32 %v7644_v45, %v3834_v25  ;;  %v8082_v46 = vpop.f32.mrb[27].mxu1  ;;  %v4058_v25 = vrot.slane %v9437_v36, %v8939_v17 }
 0xf13   : > { %v3838_v48 = vmax.f32 %v3835_v28, 0.0 }
 0xf15   : > { %8100 = vmatmul.mubr.msk.f32.vlgmr.msra.gmra.mrb[22].mxu0 %vm3854_vm7, %v3838_v48 }
 0xf16   : > { %8132 = vmatprep.mubr.msk.f32.mxu0 %vm8729_vm0, %v8730_v1  ;;  %8391 = vmatpush3.bf16.msra.mxu0 %v8390_v63 }
 0xf17   : > { %8392 = vmatprep.subr.bf16.mxu0 %v8728_v0 }
 0xf1a   : > { %8394 = vmatpush3.bf16.msra.mxu0 %v8393_v11 }
 0xf1b   : > { %8145 = vmatprep.subr.mxu0 %v8730_v1 }
 0xfe8   : > { %v3924_v52 = vpop.f32.mrb[22].mxu0 }
 0xfe9   : > { %v3925_v54 = vadd.f32 %v7646_v50, %v3924_v52  ;;  %v8101_v56 = vpop.f32.mrb[23].mxu0 }
 0xfeb   : > { %v3928_v58 = vadd.f32 %v3925_v54, %v3753_v40 }
 0xfed   : > { %v3929_v18 = vsel %vm598_vm1, %v3928_v58, 0.0 }
 0xfee   : > { %3930 = vadd.xlane.f32.xlu0 %v3929_v18 }
0x107b   : > { %v3931_v47 = vpop.xlane.xlu0 %3930 }
0x107c   : > { %v3932_v51 = vmul.f32 0.03125, %v3931_v47 }
0x107e   : > { %v3933_v53 = vsub.f32 %v3928_v58, %v3932_v51 }
0x1080   : > { %v3934_v59 = vmul.f32 %v3933_v53, %v3933_v53 }
0x1082   : > { %v3935_v60 = vsel %vm598_vm1, %v3934_v59, 0.0 }
0x1083   : > { %3936 = vadd.xlane.f32.xlu0 %v3935_v60 }
0x1110   : > { %v3937_v12 = vpop.xlane.xlu0 %3936 }
0x1111   : > { %v3938_v13 = vmul.f32 0.03125, %v3937_v12 }
0x1113   : > { %v3939_v15 = vadd.f32 1e-05, %v3938_v13 }
0x1115   : > { %8554 = vrsqrt.f32 %v3939_v15 }
0x111f   : > { %v8555_v21 = vpop.eup %8554 }
0x1120   : > { %v3941_v23 = vmul.f32 %v8555_v21, %v3933_v53 }
0x1122   : > { %v3946_v30 = vmul.f32 %v3945_v20, %v3941_v23 }
0x1124   : > { %v9418_v33 = vadd.f32 %v3950_v24, %v3946_v30 }
0x1126   : > { %8111 = vmatmul.mubr.msk.f32.vlgmr.msra.gmra.mrb[28].mxu1 %vm598_vm1, %v9418_v33  ;;  %8133 = vmatmul.mubr.msk.f32.vlgmr.msra.gmra.mrb[24].mxu0 %vm598_vm1, %v9418_v33 }
0x1127   : > { %8385 = vmatpush3.bf16.msra.mxu1 %v8384_v32  ;;  %8121 = vmatprep.mubr.msk.f32.mxu1 %vm8729_vm0, %v8730_v1 }
0x1128   : > { %8386 = vmatprep.subr.bf16.mxu1 %v8728_v0  ;;  %8147 = vmatprep.mubr.msk.f32.mxu0 %vm8729_vm0, %v8730_v1 }
0x112b   : > { %8388 = vmatpush3.bf16.msra.mxu1 %v8387_v35 }
0x112c   : > { %8135 = vmatprep.subr.mxu1 %v8730_v1 }
0x112e   : > { %8122 = vmatmul.mubr.msk.f32.vlgmr.msra.gmra.mrb[30].mxu1 %vm598_vm1, %v9418_v33 }
0x112f   : > { %8137 = vmatprep.mubr.msk.f32.mxu1 %vm8729_vm0, %v8730_v1 }
0x11f9   : > { %v4051_v40 = vpop.f32.mrb[28].mxu1  ;;  %v9441_v41 = vpop.f32.mrb[24].mxu0 }
0x11fa   : > { %v4052_v44 = vadd.f32 %v4051_v40, %v3981_v14  ;;  %v8112_v22 = vpop.f32.mrb[29].mxu1  ;;  %v8134_v45 = vpop.f32.mrb[25].mxu0 }
0x11fc   : > { %4204 = vrot.lane.b32.xlu1 %v4052_v44, %s10014_s29 }
0x1201   : > { %v4125_v28 = vpop.f32.mrb[30].mxu1 }
0x1202   : > { %v4126_v46 = vadd.f32 %v4125_v28, %v4058_v25  ;;  %v8123_v48 = vpop.f32.mrb[31].mxu1 }
0x1204   : > { %4353 = vrot.lane.b32.xlu0 %v4126_v46, %s10015_s17  ;;  %4350 = vrot.lane.b32.xlu1 %v4126_v46, %s10014_s29 }
0x1208   : > { %4207 = vrot.lane.b32.xlu0 %v4052_v44, %s10015_s17  ;;  %4356 = vrot.lane.b32.xlu1 %v4126_v46, %s10016_s23 }
0x120c   : > { %4210 = vrot.lane.b32.xlu1 %v4052_v44, %s10016_s23 }
0x126e   : > { %v4205_v50 = vpop.permute.xlu1 %4204 }
0x1276   : > { %v4354_v52 = vpop.permute.xlu0 %4353  ;;  %v4351_v54 = vpop.permute.xlu1 %4350 }
0x1277   : > { %v4359_v56 = vcombine.low %v4126_v46, %v4354_v52  ;;  %v4360_v58 = vcombine.high %v4126_v46, %v4354_v52 }
0x1279   : > { %v4367_v59 = vrot.slane %v4359_v56, %v8966_v42  ;;  %v4374_v60 = vrot.slane %v4360_v58, %v8966_v42 }
0x127a   : > { %v4357_v18 = vpop.permute.xlu1 %4356  ;;  %v4208_v47 = vpop.permute.xlu0 %4207 }
0x127b   : > { %v4375_v51 = vcombine.low %v4351_v54, %v4357_v18  ;;  %v4376_v53 = vcombine.high %v4351_v54, %v4357_v18  ;;  %v4213_v3 = vcombine.low %v4052_v44, %v4208_v47  ;;  %v4214_v4 = vcombine.high %v4052_v44, %v4208_v47 }
0x127d   : > { %v4383_v62 = vrot.slane %v4375_v51, %v8966_v42  ;;  %v4390_v2 = vrot.slane %v4376_v53, %v8966_v42  ;;  %v4221_v20 = vrot.slane %v4213_v3, %v8966_v42  ;;  %v4228_v21 = vrot.slane %v4214_v4, %v8966_v42 }
0x127e   : > { %v4211_v5 = vpop.permute.xlu1 %4210 }
0x127f   : > { %v4391_v63 = vcombine.low %v4367_v59, %v4383_v62  ;;  %v4392_v7 = vcombine.high %v4367_v59, %v4383_v62  ;;  %v4407_v43 = vcombine.low %v4374_v60, %v4390_v2  ;;  %v4408_v8 = vcombine.high %v4374_v60, %v4390_v2 }
0x1280   : > { %v4229_v9 = vcombine.low %v4205_v50, %v4211_v5  ;;  %v4230_v10 = vcombine.high %v4205_v50, %v4211_v5 }
0x1281   : > { %v4399_v11 = vrot.slane %v4391_v63, %v8969_v49  ;;  %v4406_v12 = vrot.slane %v4392_v7, %v8969_v49  ;;  %v4415_v13 = vrot.slane %v4407_v43, %v8969_v49  ;;  %v4422_v15 = vrot.slane %v4408_v8, %v8969_v49 }
0x1282   : > { %v4237_v23 = vrot.slane %v4229_v9, %v8966_v42  ;;  %v4244_v24 = vrot.slane %v4230_v10, %v8966_v42 }
0x1283   : > { %v4427_v27 = vcombine.low %v4399_v11, %v4406_v12  ;;  %v7656_v29 = vcombine.high %v4399_v11, %v4406_v12  ;;  %v4443_v30 = vcombine.low %v4415_v13, %v4422_v15  ;;  %v7657_v32 = vcombine.high %v4415_v13, %v4422_v15 }
0x1284   : > { %v4245_v34 = vcombine.low %v4221_v20, %v4237_v23  ;;  %v4246_v38 = vcombine.high %v4221_v20, %v4237_v23  ;;  %v4261_v35 = vcombine.low %v4228_v21, %v4244_v24  ;;  %v4262_v14 = vcombine.high %v4228_v21, %v4244_v24 }
0x1285   : > { %v4434_v40 = vrot.slane %v4427_v27, %v8966_v42  ;;  %v4442_v44 = vrot.slane %v7656_v29, %v8966_v42  ;;  %v4450_v22 = vrot.slane %v4443_v30, %v8966_v42  ;;  %v4458_v45 = vrot.slane %v7657_v32, %v8966_v42 }
0x1286   : > { %v4253_v25 = vrot.slane %v4245_v34, %v8969_v49  ;;  %v4260_v28 = vrot.slane %v4246_v38, %v8969_v49  ;;  %v4269_v46 = vrot.slane %v4261_v35, %v8969_v49  ;;  %v4276_v48 = vrot.slane %v4262_v14, %v8969_v49 }
0x1287   : > { %v4459_v50 = vcombine.low %v4434_v40, %v4442_v44  ;;  %v4460_v52 = vcombine.high %v4434_v40, %v4442_v44  ;;  %v4475_v54 = vcombine.low %v4450_v22, %v4458_v45  ;;  %v4476_v56 = vcombine.high %v4450_v22, %v4458_v45 }
0x1288   : > { %v4281_v58 = vcombine.low %v4253_v25, %v4260_v28  ;;  %v7654_v18 = vcombine.high %v4253_v25, %v4260_v28  ;;  %v4297_v47 = vcombine.low %v4269_v46, %v4276_v48  ;;  %v7655_v51 = vcombine.high %v4269_v46, %v4276_v48 }
0x1289   : > { %v4467_v53 = vrot.slane %v4459_v50, %v8969_v49  ;;  %v4483_v59 = vrot.slane %v4475_v54, %v8969_v49  ;;  %v4474_v60 = vrot.slane %v4460_v52, %v8969_v49  ;;  %v4490_v62 = vrot.slane %v4476_v56, %v8969_v49 }
0x128a   : > { %v4288_v2 = vrot.slane %v4281_v58, %v8966_v42  ;;  %v4296_v3 = vrot.slane %v7654_v18, %v8966_v42  ;;  %v4304_v4 = vrot.slane %v4297_v47, %v8966_v42  ;;  %v4312_v5 = vrot.slane %v7655_v51, %v8966_v42 }
0x128b   : > { %v4491_v63 = vcombine.low %v4467_v53, %v4483_v59  ;;  %v4493_v7 = vcombine.low %v4474_v60, %v4490_v62  ;;  %v4492_v23 = vcombine.high %v4467_v53, %v4483_v59  ;;  %v4494_v27 = vcombine.high %v4474_v60, %v4490_v62 }
0x128c   : > { %v4313_v43 = vcombine.low %v4288_v2, %v4296_v3  ;;  %v4314_v8 = vcombine.high %v4288_v2, %v4296_v3  ;;  %v4329_v9 = vcombine.low %v4304_v4, %v4312_v5  ;;  %v4330_v10 = vcombine.high %v4304_v4, %v4312_v5 }
0x128d   : > { %8136 = vmatpush3.xpose.msk.msra.mxu1 %vm1258_vm2, %v4491_v63  ;;  %8146 = vmatpush3.xpose.msk.msra.mxu0 %vm1258_vm2, %v4493_v7  ;;  %v4132_v47 = vrot.slane %v9437_v36, %v9038_v31 }
0x128e   : > { %8140 = vmatprep.subr.mxu1 %v8730_v1  ;;  %v4321_v11 = vrot.slane %v4313_v43, %v8969_v49  ;;  %v4337_v12 = vrot.slane %v4329_v9, %v8969_v49  ;;  %v4328_v13 = vrot.slane %v4314_v8, %v8969_v49  ;;  %v4344_v15 = vrot.slane %v4330_v10, %v8969_v49 }
0x128f   : > { %8155 = vmatprep.subr.mxu0 %v8730_v1  ;;  %v4200_v51 = vadd.f32 %v9441_v41, %v4132_v47 }
0x1290   : > { %v4345_v20 = vcombine.low %v4321_v11, %v4337_v12  ;;  %v4347_v21 = vcombine.low %v4328_v13, %v4344_v15  ;;  %v4346_v24 = vcombine.high %v4321_v11, %v4337_v12  ;;  %v4348_v29 = vcombine.high %v4328_v13, %v4344_v15 }
0x1292   : > { %8138 = vmatmul.mubr.msk.f32.vlgmr.msra.gmra.mrb[32].mxu1 %vm1258_vm2, %v4345_v20  ;;  %8148 = vmatmul.mubr.msk.f32.vlgmr.msra.gmra.mrb[26].mxu0 %vm1258_vm2, %v4347_v21 }
0x1293   : > { %8141 = vmatpush3.xpose.msk.msra.mxu1 %vm1258_vm2, %v4492_v23  ;;  %8142 = vmatprep.mubr.msk.f32.mxu1 %vm8729_vm0, %v8730_v1 }
0x1294   : > { %8150 = vmatprep.subr.mxu1 %v8730_v1  ;;  %8157 = vmatprep.mubr.msk.f32.mxu0 %vm8729_vm0, %v8730_v1 }
0x1296   : > { %8143 = vmatmul.mubr.msk.f32.vlgmr.msra.gmra.mrb[34].mxu1 %vm1258_vm2, %v4346_v24 }
0x1297   : > { %8151 = vmatpush3.xpose.msk.msra.mxu1 %vm1258_vm2, %v4494_v27  ;;  %8152 = vmatprep.mubr.msk.f32.mxu1 %vm8729_vm0, %v8730_v1 }
0x1298   : > { %8160 = vmatprep.subr.mxu1 %v8730_v1 }
0x129a   : > { %8153 = vmatmul.mubr.msk.f32.vlgmr.msra.gmra.mrb[36].mxu1 %vm1258_vm2, %v4348_v29 }
0x129b   : > { %8162 = vmatprep.mubr.msk.f32.mxu1 %vm8729_vm0, %v8730_v1 }
0x1365   : > { %v4713_v30 = vpop.f32.mrb[32].mxu1  ;;  %v4865_v32 = vpop.f32.mrb[26].mxu0 }
0x1366   : > { %v4945_v34 = vmul.f32 0.35355338, %v4713_v30  ;;  %v4947_v38 = vmul.f32 0.35355338, %v4865_v32  ;;  %v8139_v35 = vpop.f32.mrb[33].mxu1  ;;  %v8149_v14 = vpop.f32.mrb[27].mxu0 }
0x1368   : > { %v4949_v40 = vadd.f32 %v4945_v34, %v9028_v6  ;;  %v4951_v28 = vadd.f32 %v4947_v38, %v9028_v6 }
0x1369   : > { %v4789_v44 = vpop.f32.mrb[34].mxu1 }
0x136a   : > { %v4946_v22 = vmul.f32 0.35355338, %v4789_v44  ;;  %v8144_v45 = vpop.f32.mrb[35].mxu1  ;;  %v4953_v25 = vsel %vm1258_vm2, %v4949_v40, -inf  ;;  %v4959_v56 = vsel %vm1258_vm2, %v4951_v28, -inf }
0x136b   : > { %4954 = vmax.xlane.f32.xlu0 %v4953_v25 }
0x136c   : > { %v4950_v46 = vadd.f32 %v4946_v22, %v9028_v6 }
0x136d   : > { %v4941_v48 = vpop.f32.mrb[36].mxu1 }
0x136e   : > { %v4948_v50 = vmul.f32 0.35355338, %v4941_v48  ;;  %v8154_v52 = vpop.f32.mrb[37].mxu1  ;;  %v4956_v54 = vsel %vm1258_vm2, %v4950_v46, -inf }
0x136f   : > { %4957 = vmax.xlane.f32.xlu1 %v4956_v54  ;;  %4960 = vmax.xlane.f32.xlu0 %v4959_v56 }
0x1370   : > { %v4952_v58 = vadd.f32 %v4948_v50, %v9028_v6 }
0x1372   : > { %v4962_v18 = vsel %vm1258_vm2, %v4952_v58, -inf }
0x1373   : > { %4963 = vmax.xlane.f32.xlu0 %v4962_v18 }
0x1380   : > { %4496 = vrot.lane.b32.xlu1 %v4200_v51, %s10014_s29 }
0x13f8   : > { %v4955_v53 = vpop.xlane.xlu0 %4954 }
0x13f9   : > { %v4965_v59 = vsub.f32 %v4949_v40, %v4955_v53 }
0x13fb   : > { %v4969_v60 = vmul.f32 1.442695, %v4965_v59 }
0x13fc   : > { %v4958_v62 = vpop.xlane.xlu1 %4957  ;;  %v4961_v2 = vpop.xlane.xlu0 %4960 }
0x13fd   : > { %8556 = vpow2.f32 %v4969_v60  ;;  %v4966_v3 = vsub.f32 %v4950_v46, %v4958_v62  ;;  %v4967_v4 = vsub.f32 %v4951_v28, %v4961_v2 }
0x13ff   : > { %v4971_v5 = vmul.f32 1.442695, %v4966_v3  ;;  %v4973_v6 = vmul.f32 1.442695, %v4967_v4 }
0x1400   : > { %v4964_v63 = vpop.xlane.xlu0 %4963  ;;  %v4497_v20 = vpop.permute.xlu1 %4496 }
0x1401   : > { %8558 = vpow2.f32 %v4971_v5  ;;  %v4968_v7 = vsub.f32 %v4952_v58, %v4964_v63 }
0x1402   : > { %8560 = vpow2.f32 %v4973_v6 }
0x1403   : > { %v4975_v43 = vmul.f32 1.442695, %v4968_v7 }
0x1405   : > { %8562 = vpow2.f32 %v4975_v43 }
0x1407   : > { %v8557_v8 = vpop.eup %8556 }
0x1408   : > { %v4977_v41 = vsel %vm1258_vm2, %v8557_v8, 0.0 }
0x1409   : > { %4978 = vadd.xlane.f32.xlu1 %v4977_v41 }
0x140b   : > { %v8559_v9 = vpop.eup %8558 }
0x140c   : > { %v9516_v10 = vpop.eup %8560  ;;  %v4980_v11 = vsel %vm1258_vm2, %v8559_v9, 0.0 }
0x140d   : > { %4981 = vadd.xlane.f32.xlu0 %v4980_v11  ;;  %v4983_v12 = vsel %vm1258_vm2, %v9516_v10, 0.0 }
0x140e   : > { %4984 = vadd.xlane.f32.xlu1 %v4983_v12 }
0x140f   : > { %v9521_v13 = vpop.eup %8562 }
0x1410   : > { %v4986_v15 = vsel %vm1258_vm2, %v9521_v13, 0.0 }
0x1411   : > { %4987 = vadd.xlane.f32.xlu0 %v4986_v15 }
0x141f   : > { %4502 = vrot.lane.b32.xlu1 %v4200_v51, %s10016_s23 }
0x1427   : > { %4499 = vrot.lane.b32.xlu0 %v4200_v51, %s10015_s17 }
0x1496   : > { %v4979_v21 = vpop.xlane.xlu1 %4978 }
0x1497   : > { %8564 = vrcp.f32 %v4979_v21 }
0x149a   : > { %v4982_v23 = vpop.xlane.xlu0 %4981 }
0x149b   : > { %v4985_v24 = vpop.xlane.xlu1 %4984  ;;  %8566 = vrcp.f32 %v4982_v23 }
0x149c   : > { %8568 = vrcp.f32 %v4985_v24 }
0x149e   : > { %v4988_v27 = vpop.xlane.xlu0 %4987 }
0x149f   : > { %v4503_v29 = vpop.permute.xlu1 %4502  ;;  %8570 = vrcp.f32 %v4988_v27 }
0x14a0   : > { %v4521_v30 = vcombine.low %v4497_v20, %v4503_v29  ;;  %v4522_v32 = vcombine.high %v4497_v20, %v4503_v29 }
0x14a1   : > { %v8565_v5 = vpop.eup %8564 }
0x14a2   : > { %v4500_v34 = vpop.permute.xlu0 %4499  ;;  %v4529_v14 = vrot.slane %v4521_v30, %v8966_v42  ;;  %v4536_v40 = vrot.slane %v4522_v32, %v8966_v42  ;;  %v4990_v20 = vmul.f32 %v8565_v5, %v8557_v8  ;;  %v3974_v8 = vld [vmem:[#allocation2 + $0x160] sm:$0xff] }
0x14a3   : > { %v4505_v38 = vcombine.low %v4200_v51, %v4500_v34  ;;  %v4506_v35 = vcombine.high %v4200_v51, %v4500_v34 }
0x14a5   : > { %v4513_v44 = vrot.slane %v4505_v38, %v8966_v42  ;;  %v4520_v22 = vrot.slane %v4506_v35, %v8966_v42  ;;  %v8567_v63 = vpop.eup %8566 }
0x14a6   : > { %v8569_v15 = vpop.eup %8568  ;;  %v4992_v21 = vmul.f32 %v8567_v63, %v8559_v9  ;;  %v3975_v9 = vld [vmem:[#allocation2 + $0x168] sm:$0xff] }
0x14a7   : > { %v4537_v45 = vcombine.low %v4513_v44, %v4529_v14  ;;  %v4538_v25 = vcombine.high %v4513_v44, %v4529_v14  ;;  %v4553_v28 = vcombine.low %v4520_v22, %v4536_v40  ;;  %v4554_v46 = vcombine.high %v4520_v22, %v4536_v40 }
0x14a8   : > { %v4994_v29 = vmul.f32 %v8569_v15, %v9516_v10  ;;  %v8396_v10 = vpack.c.bf16 %v3975_v9, %v3974_v8 }
0x14a9   : > { %v4545_v48 = vrot.slane %v4537_v45, %v8969_v49  ;;  %v4552_v50 = vrot.slane %v4538_v25, %v8969_v49  ;;  %v4561_v52 = vrot.slane %v4553_v28, %v8969_v49  ;;  %v4568_v54 = vrot.slane %v4554_v46, %v8969_v49  ;;  %v8571_v23 = vpop.eup %8570 }
0x14aa   : > { %v4996_v30 = vmul.f32 %v8571_v23, %v9521_v13 }
0x14ab   : > { %v4573_v56 = vcombine.low %v4545_v48, %v4552_v50  ;;  %v7658_v58 = vcombine.high %v4545_v48, %v4552_v50  ;;  %v4589_v18 = vcombine.low %v4561_v52, %v4568_v54  ;;  %v7659_v47 = vcombine.high %v4561_v52, %v4568_v54 }
0x14ad   : > { %v4580_v51 = vrot.slane %v4573_v56, %v8966_v42  ;;  %v4588_v53 = vrot.slane %v7658_v58, %v8966_v42  ;;  %v4596_v59 = vrot.slane %v4589_v18, %v8966_v42  ;;  %v4604_v60 = vrot.slane %v7659_v47, %v8966_v42  ;;  %v3976_v47 = vld [vmem:[#allocation2 + $0x170] sm:$0xff] }
0x14af   : > { %v4605_v62 = vcombine.low %v4580_v51, %v4588_v53  ;;  %v4606_v2 = vcombine.high %v4580_v51, %v4588_v53  ;;  %v4621_v3 = vcombine.low %v4596_v59, %v4604_v60  ;;  %v4622_v4 = vcombine.high %v4596_v59, %v4604_v60  ;;  %v3977_v51 = vld [vmem:[#allocation2 + $0x178] sm:$0xff] }
0x14b1   : > { %v4613_v6 = vrot.slane %v4605_v62, %v8969_v49  ;;  %v4629_v7 = vrot.slane %v4621_v3, %v8969_v49  ;;  %v4620_v43 = vrot.slane %v4606_v2, %v8969_v49  ;;  %v4636_v41 = vrot.slane %v4622_v4, %v8969_v49 }
0x14b2   : > { %v8399_v2 = vpack.c.bf16 %v3977_v51, %v3976_v47  ;;  %v5542_v51 = vld [vmem:[#allocation2 + $0x180] sm:$0xff] }
0x14b3   : > { %v4637_v11 = vcombine.low %v4613_v6, %v4629_v7  ;;  %v4638_v12 = vcombine.high %v4613_v6, %v4629_v7  ;;  %v4639_v24 = vcombine.low %v4620_v43, %v4636_v41  ;;  %v4640_v27 = vcombine.high %v4620_v43, %v4636_v41 }
0x14b5   : > { %8156 = vmatpush3.msra.mxu0 %v4637_v11  ;;  %8161 = vmatpush3.msra.mxu1 %v4638_v12 }
0x14b6   : > { %8158 = vmatmul.mubr.msk.f32.vlgmr.msra.gmra.mrb[28].mxu0 %vm1258_vm2, %v4990_v20  ;;  %8163 = vmatmul.mubr.msk.f32.vlgmr.msra.gmra.mrb[38].mxu1 %vm1258_vm2, %v4992_v21 }
0x14b7   : > { %8165 = vmatprep.subr.mxu0 %v8730_v1  ;;  %8170 = vmatprep.subr.mxu1 %v8730_v1 }
0x14b8   : > { %8166 = vmatpush3.msra.mxu0 %v4639_v24  ;;  %8171 = vmatpush3.msra.mxu1 %v4640_v27 }
0x14b9   : > { %8167 = vmatprep.mubr.msk.f32.mxu0 %vm8729_vm0, %v8730_v1  ;;  %8172 = vmatprep.mubr.msk.f32.mxu1 %vm8729_vm0, %v8730_v1 }
0x14ba   : > { %8168 = vmatmul.mubr.msk.f32.vlgmr.msra.gmra.mrb[30].mxu0 %vm1258_vm2, %v4994_v29  ;;  %8173 = vmatmul.mubr.msk.f32.vlgmr.msra.gmra.mrb[40].mxu1 %vm1258_vm2, %v4996_v30 }
0x14bb   : > { %8395 = vmatprep.subr.bf16.mxu0 %v8728_v0  ;;  %8183 = vmatprep.mubr.msk.f32.mxu0 %vm8729_vm0, %v8730_v1 }
0x14bc   : > { %8401 = vmatprep.subr.bf16.mxu1 %v8728_v0  ;;  %8194 = vmatprep.mubr.msk.f32.mxu1 %vm8729_vm0, %v8730_v1 }
0x14bd   : > { %8397 = vmatpush3.bf16.msra.mxu0 %v8396_v10 }
0x14be   : > { %8398 = vmatprep.subr.bf16.mxu0 %v8728_v0 }
0x14c1   : > { %8400 = vmatpush3.bf16.msra.mxu0 %v8399_v2 }
0x14c2   : > { %8407 = vmatprep.subr.bf16.mxu0 %v8728_v0 }
0x1589   : > { %v5066_v13 = vpop.f32.mrb[28].mxu0  ;;  %v5139_v32 = vpop.f32.mrb[38].mxu1 }
0x158a   : > { %v8159_v34 = vpop.f32.mrb[29].mxu0  ;;  %v8164_v38 = vpop.f32.mrb[39].mxu1 }
0x158d   : > { %v5212_v35 = vpop.f32.mrb[30].mxu0  ;;  %v5285_v14 = vpop.f32.mrb[40].mxu1 }
0x158e   : > { %v5289_v40 = vcombine.low %v5066_v13, %v5212_v35  ;;  %v5290_v44 = vcombine.high %v5066_v13, %v5212_v35  ;;  %v5305_v22 = vcombine.low %v5139_v32, %v5285_v14  ;;  %v5306_v45 = vcombine.high %v5139_v32, %v5285_v14  ;;  %v8169_v25 = vpop.f32.mrb[31].mxu0  ;;  %v8174_v28 = vpop.f32.mrb[41].mxu1 }
0x158f   : > { %v5443_v14 = vrot.slane %v9437_v36, %v2062_v55  ;;  %v5547_v28 = vld [vmem:[#allocation2 + $0x1a0] sm:$0xff] }
0x1590   : > { %v5297_v46 = vrot.slane %v5289_v40, %v8966_v42  ;;  %v5304_v48 = vrot.slane %v5290_v44, %v8966_v42  ;;  %v5313_v50 = vrot.slane %v5305_v22, %v8966_v42  ;;  %v5320_v52 = vrot.slane %v5306_v45, %v8966_v42  ;;  %v9596_v55 = vld [vmem:[%s9132_s30] sm:$0xff] }
0x1592   : > { %v5321_v54 = vcombine.low %v5297_v46, %v5313_v50  ;;  %v5322_v56 = vcombine.high %v5297_v46, %v5313_v50  ;;  %v5337_v58 = vcombine.low %v5304_v48, %v5320_v52  ;;  %v5338_v18 = vcombine.high %v5304_v48, %v5320_v52  ;;  %v5548_v46 = vld [vmem:[#allocation2 + $0x1a8] sm:$0xff]  ;;  %v5549_v48 = vld [vmem:[#allocation2 + $0x1b0] sm:$0xff]  ;;  %v5550_v52 = vld [vmem:[#allocation2 + $0x1b8] sm:$0xff] }
0x1593   : > { %v8408_v50 = vpack.c.bf16 %v5548_v46, %v5547_v28 }
0x1594   : > { %v5329_v53 = vrot.slane %v5321_v54, %v8969_v49  ;;  %v5336_v59 = vrot.slane %v5322_v56, %v8969_v49  ;;  %v5345_v60 = vrot.slane %v5337_v58, %v8969_v49  ;;  %v5352_v62 = vrot.slane %v5338_v18, %v8969_v49 }
0x1595   : > { %v8411_v54 = vpack.c.bf16 %v5550_v52, %v5549_v48 }
0x1596   : > { %v5357_v3 = vcombine.low %v5329_v53, %v5336_v59  ;;  %v7672_v4 = vcombine.high %v5329_v53, %v5336_v59  ;;  %v5373_v5 = vcombine.low %v5345_v60, %v5352_v62  ;;  %v7673_v6 = vcombine.high %v5345_v60, %v5352_v62  ;;  %v5543_v53 = vld [vmem:[#allocation2 + $0x188] sm:$0xff]  ;;  %v5544_v60 = vld [vmem:[#allocation2 + $0x190] sm:$0xff]  ;;  %v5545_v62 = vld [vmem:[#allocation2 + $0x198] sm:$0xff] }
0x1597   : > { %v8402_v59 = vpack.c.bf16 %v5543_v53, %v5542_v51  ;;  %v8405_v2 = vpack.c.bf16 %v5545_v62, %v5544_v60  ;;  %v5553_v51 = vld [vmem:[#allocation2 + $0x1c8] sm:$0xff]  ;;  %v5554_v62 = vld [vmem:[#allocation2 + $0x1d0] sm:$0xff] }
0x1598   : > { %v5364_v63 = vrot.slane %v5357_v3, %v8966_v42  ;;  %v5372_v7 = vrot.slane %v7672_v4, %v8966_v42  ;;  %v5380_v43 = vrot.slane %v5373_v5, %v8966_v42  ;;  %v5388_v41 = vrot.slane %v7673_v6, %v8966_v42 }
0x1599   : > { %8403 = vmatpush3.bf16.msra.mxu1 %v8402_v59  ;;  %v5641_v3 = vrot.slane %v9437_v36, %v2261_v26  ;;  %v9619_v26 = vld [vmem:[%s9968_s11 + $0x4] sm:$0x7] }
0x159a   : > { %v5390_v11 = vcombine.high %v5364_v63, %v5372_v7  ;;  %v5406_v12 = vcombine.high %v5380_v43, %v5388_v41  ;;  %v5389_v15 = vcombine.low %v5364_v63, %v5372_v7  ;;  %v5405_v20 = vcombine.low %v5380_v43, %v5388_v41  ;;  %8404 = vmatprep.subr.bf16.mxu1 %v8728_v0  ;;  %v9614_v41 = vld [vmem:[%s9967_s10 + $0x4] sm:$0x7] }
0x159c   : > { %v5404_v21 = vrot.slane %v5390_v11, %v8969_v49  ;;  %v5420_v23 = vrot.slane %v5406_v12, %v8969_v49  ;;  %v5397_v24 = vrot.slane %v5389_v15, %v8969_v49  ;;  %v5413_v27 = vrot.slane %v5405_v20, %v8969_v49 }
0x159d   : > { %8406 = vmatpush3.bf16.msra.mxu1 %v8405_v2  ;;  %v5534_v11 = vrot.slane %v9614_v41, %v8947_v19  ;;  %v5539_v20 = vrot.slane %v9619_v26, %v8947_v19  ;;  %v5555_v2 = vld [vmem:[#allocation2 + $0x1d8] sm:$0xff] }
0x159e   : > { %v5423_v29 = vcombine.low %v5404_v21, %v5420_v23  ;;  %v5422_v30 = vcombine.high %v5397_v24, %v5413_v27  ;;  %v5424_v8 = vcombine.high %v5404_v21, %v5420_v23  ;;  %v5421_v9 = vcombine.low %v5397_v24, %v5413_v27  ;;  %8413 = vmatprep.subr.bf16.mxu1 %v8728_v0 }
0x15a0   : > { %5430 = vrot.lane.b32.xlu0 %v5423_v29, %s10017_s20  ;;  %5426 = vrot.lane.b32.xlu1 %v5422_v30, %s10018_s25 }
0x15a4   : > { %5434 = vrot.lane.b32.xlu1 %v5424_v8, %s10013_s16 }
0x1612   : > { %v5427_v10 = vpop.permute.xlu1 %5426  ;;  %v5431_v13 = vpop.permute.xlu0 %5430 }
0x1613   : > { %v5437_v32 = vsel %vm1258_vm2, %v5421_v9, %v5427_v10 }
0x1614   : > { %v5438_v38 = vsel %vm2056_vm4, %v5437_v32, %v5431_v13 }
0x1616   : > { %v5435_v34 = vpop.permute.xlu1 %5434 }
0x1617   : > { %v5439_v35 = vsel %vm2058_vm5, %v5438_v38, %v5435_v34 }
0x1618   : > { %8184 = vmatmul.mubr.msk.f32.vlgmr.msra.gmra.mrb[32].mxu0 %vm598_vm1, %v5439_v35 }
0x1619   : > { %8205 = vmatprep.mubr.msk.f32.mxu0 %vm8729_vm0, %v8730_v1  ;;  %8409 = vmatpush3.bf16.msra.mxu0 %v8408_v50 }
0x161a   : > { %8410 = vmatprep.subr.bf16.mxu0 %v8728_v0 }
0x161d   : > { %8412 = vmatpush3.bf16.msra.mxu0 %v8411_v54 }
0x161e   : > { %8219 = vmatprep.subr.mxu0 %v8730_v1 }
0x1620   : > { %8206 = vmatmul.mubr.msk.f32.vlgmr.msra.gmra.mrb[34].mxu0 %vm598_vm1, %v9596_v55 }
0x1621   : > { %8221 = vmatprep.mubr.msk.f32.mxu0 %vm8729_vm0, %v8730_v1 }
0x16eb   : > { %v5513_v40 = vpop.f32.mrb[32].mxu0 }
0x16ec   : > { %v5514_v44 = vadd.f32 %v5513_v40, %v5443_v14  ;;  %v8185_v22 = vpop.f32.mrb[33].mxu0 }
0x16ee   : > { %v5517_v45 = vadd.f32 %v5514_v44, %v9418_v33 }
0x16f0   : > { %v5518_v25 = vsel %vm598_vm1, %v5517_v45, 0.0 }
0x16f1   : > { %5519 = vadd.xlane.f32.xlu0 %v5518_v25 }
0x16f3   : > { %v5708_v4 = vpop.f32.mrb[34].mxu0 }
0x16f4   : > { %v5709_v5 = vadd.f32 %v5708_v4, %v5641_v3  ;;  %v8207_v6 = vpop.f32.mrb[35].mxu0  ;;  %v8417_v3 = vpack.c.bf16 %v5555_v2, %v5554_v62 }
0x1707   : > { %5933 = vrot.lane.b32.xlu0 %v5709_v5, %s10014_s29 }
0x170b   : > { %5939 = vrot.lane.b32.xlu0 %v5709_v5, %s10016_s23 }
0x177e   : > { %v5520_v33 = vpop.xlane.xlu0 %5519 }
0x177f   : > { %v5521_v56 = vmul.f32 0.03125, %v5520_v33 }
0x1781   : > { %v5522_v58 = vsub.f32 %v5517_v45, %v5521_v56 }
0x1782   : > { %v5934_v24 = vpop.permute.xlu0 %5933 }
0x1783   : > { %v5523_v18 = vmul.f32 %v5522_v58, %v5522_v58 }
0x1785   : > { %v5524_v47 = vsel %vm598_vm1, %v5523_v18, 0.0 }
0x1786   : > { %5525 = vadd.xlane.f32.xlu1 %v5524_v47  ;;  %v5940_v8 = vpop.permute.xlu0 %5939  ;;  %v5552_v47 = vld [vmem:[#allocation2 + $0x1c0] sm:$0xff] }
0x1787   : > { %v5958_v13 = vcombine.low %v5934_v24, %v5940_v8  ;;  %v5959_v19 = vcombine.high %v5934_v24, %v5940_v8  ;;  %v8414_v60 = vpack.c.bf16 %v5553_v51, %v5552_v47 }
0x1789   : > { %v5966_v32 = vrot.slane %v5958_v13, %v8966_v42  ;;  %v5973_v34 = vrot.slane %v5959_v19, %v8966_v42 }
0x1797   : > { %5936 = vrot.lane.b32.xlu1 %v5709_v5, %s10015_s17 }
0x1813   : > { %v5526_v63 = vpop.xlane.xlu1 %5525 }
0x1814   : > { %v5527_v7 = vmul.f32 0.03125, %v5526_v63 }
0x1816   : > { %v5528_v43 = vadd.f32 1e-05, %v5527_v7 }
0x1817   : > { %v5937_v27 = vpop.permute.xlu1 %5936 }
0x1818   : > { %8572 = vrsqrt.f32 %v5528_v43  ;;  %v5942_v29 = vcombine.low %v5709_v5, %v5937_v27  ;;  %v5943_v30 = vcombine.high %v5709_v5, %v5937_v27 }
0x181a   : > { %v5950_v9 = vrot.slane %v5942_v29, %v8966_v42  ;;  %v5957_v10 = vrot.slane %v5943_v30, %v8966_v42 }
0x181c   : > { %v5974_v38 = vcombine.low %v5950_v9, %v5966_v32  ;;  %v5975_v35 = vcombine.high %v5950_v9, %v5966_v32  ;;  %v5990_v14 = vcombine.low %v5957_v10, %v5973_v34  ;;  %v5991_v40 = vcombine.high %v5957_v10, %v5973_v34 }
0x181e   : > { %v5982_v44 = vrot.slane %v5974_v38, %v8969_v49  ;;  %v5989_v22 = vrot.slane %v5975_v35, %v8969_v49  ;;  %v5998_v45 = vrot.slane %v5990_v14, %v8969_v49  ;;  %v6005_v25 = vrot.slane %v5991_v40, %v8969_v49 }
0x1820   : > { %v6010_v28 = vcombine.low %v5982_v44, %v5989_v22  ;;  %v7680_v46 = vcombine.high %v5982_v44, %v5989_v22  ;;  %v6026_v48 = vcombine.low %v5998_v45, %v6005_v25  ;;  %v7681_v50 = vcombine.high %v5998_v45, %v6005_v25 }
0x1822   : > { %v8573_v12 = vpop.eup %8572  ;;  %v6017_v52 = vrot.slane %v6010_v28, %v8966_v42  ;;  %v6025_v54 = vrot.slane %v7680_v46, %v8966_v42  ;;  %v6033_v33 = vrot.slane %v6026_v48, %v8966_v42  ;;  %v6041_v56 = vrot.slane %v7681_v50, %v8966_v42 }
0x1823   : > { %v5530_v15 = vmul.f32 %v8573_v12, %v5522_v58 }
0x1824   : > { %v6043_v58 = vcombine.high %v6017_v52, %v6025_v54  ;;  %v6059_v18 = vcombine.high %v6033_v33, %v6041_v56  ;;  %v6042_v53 = vcombine.low %v6017_v52, %v6025_v54  ;;  %v6058_v59 = vcombine.low %v6033_v33, %v6041_v56 }
0x1825   : > { %v5535_v21 = vmul.f32 %v5534_v11, %v5530_v15 }
0x1826   : > { %v6050_v4 = vrot.slane %v6042_v53, %v8969_v49  ;;  %v6066_v5 = vrot.slane %v6058_v59, %v8969_v49  ;;  %v6057_v7 = vrot.slane %v6043_v58, %v8969_v49  ;;  %v6073_v43 = vrot.slane %v6059_v18, %v8969_v49 }
0x1827   : > { %v9625_v23 = vadd.f32 %v5539_v20, %v5535_v21 }
0x1828   : > { %v6074_v6 = vcombine.low %v6050_v4, %v6066_v5  ;;  %v6075_v63 = vcombine.high %v6050_v4, %v6066_v5  ;;  %v6076_v11 = vcombine.low %v6057_v7, %v6073_v43  ;;  %v6077_v12 = vcombine.high %v6057_v7, %v6073_v43 }
0x1829   : > { %8195 = vmatmul.mubr.msk.f32.vlgmr.msra.gmra.mrb[42].mxu1 %vm598_vm1, %v9625_v23 }
0x182a   : > { %8216 = vmatprep.mubr.msk.f32.mxu1 %vm8729_vm0, %v8730_v1  ;;  %8415 = vmatpush3.bf16.msra.mxu1 %v8414_v60 }
0x182b   : > { %8416 = vmatprep.subr.bf16.mxu1 %v8728_v0  ;;  %8220 = vmatpush3.xpose.msk.msra.mxu0 %vm1258_vm2, %v6074_v6 }
0x182c   : > { %8229 = vmatprep.subr.mxu0 %v8730_v1 }
0x182e   : > { %8418 = vmatpush3.bf16.msra.mxu1 %v8417_v3 }
0x182f   : > { %8224 = vmatprep.subr.mxu1 %v8730_v1 }
0x1831   : > { %8217 = vmatmul.mubr.msk.f32.vlgmr.msra.gmra.mrb[44].mxu1 %vm598_vm1, %v9596_v55  ;;  %v5564_v55 = vrot.slane %v9437_v36, %v2184_v39 }
0x1832   : > { %8226 = vmatprep.mubr.msk.f32.mxu1 %vm8729_vm0, %v8730_v1 }
0x1837   : > { %8225 = vmatpush3.xpose.msk.msra.mxu1 %vm1258_vm2, %v6075_v63 }
0x1838   : > { %8234 = vmatprep.subr.mxu1 %v8730_v1 }
0x18fc   : > { %v5634_v15 = vpop.f32.mrb[42].mxu1 }
0x18fd   : > { %v5635_v20 = vadd.f32 %v5634_v15, %v5564_v55  ;;  %v8196_v21 = vpop.f32.mrb[43].mxu1 }
0x18ff   : > { %5787 = vrot.lane.b32.xlu1 %v5635_v20, %s10014_s29  ;;  %5790 = vrot.lane.b32.xlu0 %v5635_v20, %s10015_s17 }
0x1903   : > { %5793 = vrot.lane.b32.xlu1 %v5635_v20, %s10016_s23 }
0x1904   : > { %v9663_v24 = vpop.f32.mrb[44].mxu1 }
0x1905   : > { %v8218_v27 = vpop.f32.mrb[45].mxu1 }
0x1971   : > { %v5788_v29 = vpop.permute.xlu1 %5787  ;;  %v5791_v30 = vpop.permute.xlu0 %5790 }
0x1972   : > { %v5796_v8 = vcombine.low %v5635_v20, %v5791_v30  ;;  %v5797_v9 = vcombine.high %v5635_v20, %v5791_v30 }
0x1974   : > { %v5804_v39 = vrot.slane %v5796_v8, %v8966_v42  ;;  %v5811_v32 = vrot.slane %v5797_v9, %v8966_v42 }
0x1975   : > { %v5794_v10 = vpop.permute.xlu1 %5793 }
0x1976   : > { %v5812_v13 = vcombine.low %v5788_v29, %v5794_v10  ;;  %v5813_v19 = vcombine.high %v5788_v29, %v5794_v10 }
0x1978   : > { %v5820_v34 = vrot.slane %v5812_v13, %v8966_v42  ;;  %v5827_v38 = vrot.slane %v5813_v19, %v8966_v42 }
0x197a   : > { %v5828_v35 = vcombine.low %v5804_v39, %v5820_v34  ;;  %v5829_v14 = vcombine.high %v5804_v39, %v5820_v34  ;;  %v5844_v40 = vcombine.low %v5811_v32, %v5827_v38  ;;  %v5845_v44 = vcombine.high %v5811_v32, %v5827_v38 }
0x197b   : > { %v5715_v38 = vrot.slane %v9437_v36, %v2338_v61 }
0x197c   : > { %v5836_v22 = vrot.slane %v5828_v35, %v8969_v49  ;;  %v5843_v45 = vrot.slane %v5829_v14, %v8969_v49  ;;  %v5852_v25 = vrot.slane %v5844_v40, %v8969_v49  ;;  %v5859_v28 = vrot.slane %v5845_v44, %v8969_v49 }
0x197d   : > { %v5783_v35 = vadd.f32 %v9663_v24, %v5715_v38 }
0x197e   : > { %v5864_v46 = vcombine.low %v5836_v22, %v5843_v45  ;;  %v7678_v48 = vcombine.high %v5836_v22, %v5843_v45  ;;  %v5880_v50 = vcombine.low %v5852_v25, %v5859_v28  ;;  %v7679_v52 = vcombine.high %v5852_v25, %v5859_v28 }
0x1980   : > { %v5871_v54 = vrot.slane %v5864_v46, %v8966_v42  ;;  %v5879_v33 = vrot.slane %v7678_v48, %v8966_v42  ;;  %v5887_v56 = vrot.slane %v5880_v50, %v8966_v42  ;;  %v5895_v58 = vrot.slane %v7679_v52, %v8966_v42 }
0x1982   : > { %v5896_v18 = vcombine.low %v5871_v54, %v5879_v33  ;;  %v5897_v47 = vcombine.high %v5871_v54, %v5879_v33  ;;  %v5912_v51 = vcombine.low %v5887_v56, %v5895_v58  ;;  %v5913_v53 = vcombine.high %v5887_v56, %v5895_v58 }
0x1984   : > { %v5904_v59 = vrot.slane %v5896_v18, %v8969_v49  ;;  %v5920_v60 = vrot.slane %v5912_v51, %v8969_v49  ;;  %v5911_v3 = vrot.slane %v5897_v47, %v8969_v49  ;;  %v5927_v4 = vrot.slane %v5913_v53, %v8969_v49 }
0x1986   : > { %v5928_v62 = vcombine.low %v5904_v59, %v5920_v60  ;;  %v5929_v2 = vcombine.high %v5904_v59, %v5920_v60  ;;  %v5930_v5 = vcombine.low %v5911_v3, %v5927_v4  ;;  %v5931_v6 = vcombine.high %v5911_v3, %v5927_v4 }
0x1988   : > { %8222 = vmatmul.mubr.msk.f32.vlgmr.msra.gmra.mrb[36].mxu0 %vm1258_vm2, %v5928_v62  ;;  %8227 = vmatmul.mubr.msk.f32.vlgmr.msra.gmra.mrb[46].mxu1 %vm1258_vm2, %v5929_v2 }
0x1989   : > { %8230 = vmatpush3.xpose.msk.msra.mxu0 %vm1258_vm2, %v6076_v11  ;;  %8235 = vmatpush3.xpose.msk.msra.mxu1 %vm1258_vm2, %v6077_v12 }
0x198a   : > { %8231 = vmatprep.mubr.msk.f32.mxu0 %vm8729_vm0, %v8730_v1  ;;  %8236 = vmatprep.mubr.msk.f32.mxu1 %vm8729_vm0, %v8730_v1 }
0x198b   : > { %8239 = vmatprep.subr.mxu0 %v8730_v1  ;;  %8244 = vmatprep.subr.mxu1 %v8730_v1 }
0x198c   : > { %8232 = vmatmul.mubr.msk.f32.vlgmr.msra.gmra.mrb[38].mxu0 %vm1258_vm2, %v5930_v5  ;;  %8237 = vmatmul.mubr.msk.f32.vlgmr.msra.gmra.mrb[48].mxu1 %vm1258_vm2, %v5931_v6 }
0x198d   : > { %8241 = vmatprep.mubr.msk.f32.mxu0 %vm8729_vm0, %v8730_v1  ;;  %8246 = vmatprep.mubr.msk.f32.mxu1 %vm8729_vm0, %v8730_v1 }
0x1a5b   : > { %v6296_v63 = vpop.f32.mrb[36].mxu0  ;;  %v6372_v7 = vpop.f32.mrb[46].mxu1 }
0x1a5c   : > { %v6528_v43 = vmul.f32 0.35355338, %v6296_v63  ;;  %v6529_v11 = vmul.f32 0.35355338, %v6372_v7  ;;  %v8223_v12 = vpop.f32.mrb[37].mxu0  ;;  %v8228_v55 = vpop.f32.mrb[47].mxu1 }
0x1a5e   : > { %v6533_v15 = vadd.f32 %v6529_v11, %v9245_v37  ;;  %v6532_v20 = vadd.f32 %v6528_v43, %v9245_v37 }
0x1a5f   : > { %v6448_v21 = vpop.f32.mrb[38].mxu0  ;;  %v6524_v27 = vpop.f32.mrb[48].mxu1 }
0x1a60   : > { %v6530_v29 = vmul.f32 0.35355338, %v6448_v21  ;;  %v8233_v30 = vpop.f32.mrb[39].mxu0  ;;  %v8238_v8 = vpop.f32.mrb[49].mxu1  ;;  %v6531_v9 = vmul.f32 0.35355338, %v6524_v27 }
0x1a61   : > { %v6539_v10 = vsel %vm1258_vm2, %v6533_v15, -inf  ;;  %v6536_v13 = vsel %vm1258_vm2, %v6532_v20, -inf }
0x1a62   : > { %6540 = vmax.xlane.f32.xlu1 %v6539_v10  ;;  %6537 = vmax.xlane.f32.xlu0 %v6536_v13  ;;  %v6534_v19 = vadd.f32 %v6530_v29, %v9245_v37  ;;  %v6535_v32 = vadd.f32 %v6531_v9, %v9245_v37 }
0x1a64   : > { %v6542_v39 = vsel %vm1258_vm2, %v6534_v19, -inf  ;;  %v6545_v34 = vsel %vm1258_vm2, %v6535_v32, -inf }
0x1a66   : > { %6543 = vmax.xlane.f32.xlu0 %v6542_v39 }
0x1a6a   : > { %6546 = vmax.xlane.f32.xlu0 %v6545_v34 }
0x1a73   : > { %6079 = vrot.lane.b32.xlu1 %v5783_v35, %s10014_s29  ;;  %s7592_s29 = sshll.u32 %s9717_s24, 5 }
0x1aef   : > { %v6541_v14 = vpop.xlane.xlu1 %6540  ;;  %v6538_v40 = vpop.xlane.xlu0 %6537 }
0x1af0   : > { %v6549_v44 = vsub.f32 %v6533_v15, %v6541_v14  ;;  %v6548_v22 = vsub.f32 %v6532_v20, %v6538_v40 }
0x1af2   : > { %v6554_v45 = vmul.f32 1.442695, %v6549_v44  ;;  %v6552_v25 = vmul.f32 1.442695, %v6548_v22 }
0x1af3   : > { %v6544_v28 = vpop.xlane.xlu0 %6543  ;;  %v6080_v47 = vpop.permute.xlu1 %6079 }
0x1af4   : > { %8574 = vpow2.f32 %v6554_v45  ;;  %v6550_v37 = vsub.f32 %v6534_v19, %v6544_v28 }
0x1af5   : > { %8576 = vpow2.f32 %v6552_v25 }
0x1af6   : > { %v6556_v46 = vmul.f32 1.442695, %v6550_v37 }
0x1af7   : > { %v6547_v48 = vpop.xlane.xlu0 %6546 }
0x1af8   : > { %8578 = vpow2.f32 %v6556_v46  ;;  %v6551_v50 = vsub.f32 %v6535_v32, %v6547_v48 }
0x1afa   : > { %v6558_v52 = vmul.f32 1.442695, %v6551_v50 }
0x1afc   : > { %8580 = vpow2.f32 %v6558_v52 }
0x1afe   : > { %v8575_v61 = vpop.eup %8574 }
0x1aff   : > { %v8577_v36 = vpop.eup %8576  ;;  %v6563_v24 = vsel %vm1258_vm2, %v8575_v61, 0.0 }
0x1b00   : > { %v6560_v54 = vsel %vm1258_vm2, %v8577_v36, 0.0  ;;  %6564 = vadd.xlane.f32.xlu0 %v6563_v24 }
0x1b01   : > { %6561 = vadd.xlane.f32.xlu1 %v6560_v54 }
0x1b02   : > { %v8579_v33 = vpop.eup %8578 }
0x1b03   : > { %v6566_v56 = vsel %vm1258_vm2, %v8579_v33, 0.0 }
0x1b05   : > { %6567 = vadd.xlane.f32.xlu1 %v6566_v56 }
0x1b06   : > { %v8581_v58 = vpop.eup %8580 }
0x1b07   : > { %v6569_v18 = vsel %vm1258_vm2, %v8581_v58, 0.0 }
0x1b08   : > { %6570 = vadd.xlane.f32.xlu0 %v6569_v18  ;;  %v5558_v18 = vld [vmem:[#allocation2 + $0x1e8] sm:$0xff] }
0x1b16   : > { %6085 = vrot.lane.b32.xlu1 %v5783_v35, %s10016_s23 }
0x1b1e   : > { %6082 = vrot.lane.b32.xlu0 %v5783_v35, %s10015_s17  ;;  %s9720_s17 = scalar_lea.vmem [#allocation6], %s7592_s29 }
0x1b1f   : > { %s7446_s23 = sshll.u32 %s9720_s17, 4  ;;  %s9873_s23 = int_to_ptr.vmem [resolvable:$true] %s7446_s23 }
0x1b20   : > { %s8625_s27 = scalar_lea.vmem %s9873_s23, 512  ;;  %p8632_p2 = scmp.lt.s32.totalorder %s9873_s23, %s8630_s18 }
0x1b21   : > { %p8626_p6 = scmp.ne.s32.totalorder %s9873_s23, %s8625_s27 }
0x1b23   : > { %p8627_p10 = pnand %p8626_p6, %p10019_p9 }
0x1b25   : > { %p8628_p12 = pneg %p8627_p10 }
0x1b8d   : > { %v6565_v51 = vpop.xlane.xlu0 %6564 }
0x1b8e   : > { %v6562_v53 = vpop.xlane.xlu1 %6561  ;;  %8582 = vrcp.f32 %v6565_v51 }
0x1b8f   : > { %8584 = vrcp.f32 %v6562_v53 }
0x1b92   : > { %v6568_v59 = vpop.xlane.xlu1 %6567 }
0x1b93   : > { %8586 = vrcp.f32 %v6568_v59 }
0x1b95   : > { %v6571_v60 = vpop.xlane.xlu0 %6570 }
0x1b96   : > { %v6086_v62 = vpop.permute.xlu1 %6085  ;;  %8588 = vrcp.f32 %v6571_v60 }
0x1b97   : > { %v6104_v3 = vcombine.low %v6080_v47, %v6086_v62  ;;  %v6105_v4 = vcombine.high %v6080_v47, %v6086_v62 }
0x1b98   : > { %v8583_v2 = vpop.eup %8582 }
0x1b99   : > { %v8585_v5 = vpop.eup %8584  ;;  %v6575_v6 = vmul.f32 %v8583_v2, %v8575_v61  ;;  %v6083_v63 = vpop.permute.xlu0 %6082  ;;  %v6112_v12 = vrot.slane %v6104_v3, %v8966_v42  ;;  %v6119_v55 = vrot.slane %v6105_v4, %v8966_v42 }
0x1b9a   : > { %v6573_v7 = vmul.f32 %v8585_v5, %v8577_v36  ;;  %v6088_v43 = vcombine.low %v5783_v35, %v6083_v63  ;;  %v6089_v11 = vcombine.high %v5783_v35, %v6083_v63 }
0x1b9b   : > { %7101 = vst.msk [vmem:[%s9720_s17 + $0x8] sm:$0xff] %vm1258_vm2, %v6575_v6 }
0x1b9c   : > { %v6096_v15 = vrot.slane %v6088_v43, %v8966_v42  ;;  %v6103_v20 = vrot.slane %v6089_v11, %v8966_v42  ;;  %7100 = vst.msk [vmem:[%s9720_s17] sm:$0xff] %vm1258_vm2, %v6573_v7 }
0x1b9d   : > { %v8587_v21 = vpop.eup %8586 }
0x1b9e   : > { %v6577_v27 = vmul.f32 %v8587_v21, %v8579_v33  ;;  %v6120_v29 = vcombine.low %v6096_v15, %v6112_v12  ;;  %v6121_v30 = vcombine.high %v6096_v15, %v6112_v12  ;;  %v6136_v8 = vcombine.low %v6103_v20, %v6119_v55 }
0x1b9f   : > { %v6137_v9 = vcombine.high %v6103_v20, %v6119_v55 }
0x1ba0   : > { %v8589_v10 = vpop.eup %8588  ;;  %v6128_v13 = vrot.slane %v6120_v29, %v8969_v49  ;;  %v6135_v19 = vrot.slane %v6121_v30, %v8969_v49  ;;  %v6144_v39 = vrot.slane %v6136_v8, %v8969_v49  ;;  %7102 = vst.msk [vmem:[%s9720_s17 + $0x10] sm:$0xff] %vm1258_vm2, %v6577_v27  ;;  %v5559_v29 = vld [vmem:[#allocation2 + $0x1f0] sm:$0xff]  ;;  %v5560_v30 = vld [vmem:[#allocation2 + $0x1f8] sm:$0xff] }
0x1ba1   : > { %v6579_v32 = vmul.f32 %v8589_v10, %v8581_v58  ;;  %v6151_v34 = vrot.slane %v6137_v9, %v8969_v49  ;;  %v5557_v58 = vld [vmem:[#allocation2 + $0x1e0] sm:$0xff] }
0x1ba2   : > { %v6156_v38 = vcombine.low %v6128_v13, %v6135_v19  ;;  %v7682_v35 = vcombine.high %v6128_v13, %v6135_v19  ;;  %v8420_v47 = vpack.c.bf16 %v5558_v18, %v5557_v58  ;;  %v8423_v19 = vpack.c.bf16 %v5560_v30, %v5559_v29  ;;  %v7711_v29 = vld [vmem:[%s9965_s8 + $0x68] sm:$0xff] }
0x1ba3   : > { %v6172_v14 = vcombine.low %v6144_v39, %v6151_v34  ;;  %v7683_v40 = vcombine.high %v6144_v39, %v6151_v34  ;;  %7103 = vst.msk [vmem:[%s9720_s17 + $0x18] sm:$0xff] %vm1258_vm2, %v6579_v32  ;;  %s8631_s17 = scalar_lea.vmem %s8630_s18, 1024 }
0x1ba4   : > { %v6163_v44 = vrot.slane %v6156_v38, %v8966_v42  ;;  %v6171_v22 = vrot.slane %v7682_v35, %v8966_v42  ;;  %p8633_p3 = scmp.lt.s32.totalorder %s8631_s17, %s8625_s27 }
0x1ba5   : > { %v6179_v45 = vrot.slane %v6172_v14, %v8966_v42  ;;  %v6187_v25 = vrot.slane %v7683_v40, %v8966_v42 }
0x1ba6   : > { %v6188_v28 = vcombine.low %v6163_v44, %v6171_v22  ;;  %v6189_v37 = vcombine.high %v6163_v44, %v6171_v22  ;;  %p8634_p4 = por %p8633_p3, %p8632_p2 }
0x1ba7   : > { %v6204_v46 = vcombine.low %v6179_v45, %v6187_v25  ;;  %v6205_v48 = vcombine.high %v6179_v45, %v6187_v25 }
0x1ba8   : > { %v6196_v50 = vrot.slane %v6188_v28, %v8969_v49  ;;  %v6203_v61 = vrot.slane %v6189_v37, %v8969_v49  ;;  %p8635_p7 = pnand %p8634_p4, %p8628_p12 }
0x1ba9   : > { %v6212_v52 = vrot.slane %v6204_v46, %v8969_v49  ;;  %v6219_v36 = vrot.slane %v6205_v48, %v8969_v49 }
0x1bab   : > { %v6220_v24 = vcombine.low %v6196_v50, %v6212_v52  ;;  %v6221_v54 = vcombine.high %v6196_v50, %v6212_v52  ;;  %v6222_v33 = vcombine.low %v6203_v61, %v6219_v36  ;;  %v6223_v56 = vcombine.high %v6203_v61, %v6219_v36 }
0x1bad   : > { %8240 = vmatpush3.msra.mxu0 %v6220_v24  ;;  %8245 = vmatpush3.msra.mxu1 %v6221_v54 }
0x1bae   : > { %8242 = vmatmul.mubr.msk.f32.vlgmr.msra.gmra.mrb[40].mxu0 %vm1258_vm2, %v6573_v7  ;;  %8247 = vmatmul.mubr.msk.f32.vlgmr.msra.gmra.mrb[50].mxu1 %vm1258_vm2, %v6575_v6 }
0x1baf   : > { %8249 = vmatprep.subr.mxu0 %v8730_v1  ;;  %8254 = vmatprep.subr.mxu1 %v8730_v1 }
0x1bb0   : > { %8250 = vmatpush3.msra.mxu0 %v6222_v33  ;;  %8255 = vmatpush3.msra.mxu1 %v6223_v56 }
0x1bb1   : > { %8251 = vmatprep.mubr.msk.f32.mxu0 %vm8729_vm0, %v8730_v1  ;;  %8256 = vmatprep.mubr.msk.f32.mxu1 %vm8729_vm0, %v8730_v1 }
0x1bb2   : > { %8252 = vmatmul.mubr.msk.f32.vlgmr.msra.gmra.mrb[42].mxu0 %vm1258_vm2, %v6577_v27  ;;  %8257 = vmatmul.mubr.msk.f32.vlgmr.msra.gmra.mrb[52].mxu1 %vm1258_vm2, %v6579_v32 }
0x1bb3   : > { %8419 = vmatprep.subr.bf16.mxu0 %v8728_v0  ;;  %8267 = vmatprep.mubr.msk.f32.mxu0 %vm8729_vm0, %v8730_v1 }
0x1bb4   : > { %8425 = vmatprep.subr.bf16.mxu1 %v8728_v0  ;;  %8278 = vmatprep.mubr.msk.f32.mxu1 %vm8729_vm0, %v8730_v1 }
0x1bb5   : > { %8421 = vmatpush3.bf16.msra.mxu0 %v8420_v47 }
0x1bb6   : > { %8422 = vmatprep.subr.bf16.mxu0 %v8728_v0 }
0x1bb9   : > { %8424 = vmatpush3.bf16.msra.mxu0 %v8423_v19 }
0x1bba   : > { %8431 = vmatprep.subr.bf16.mxu0 %v8728_v0 }
0x1c81   : > { %v6649_v51 = vpop.f32.mrb[40].mxu0  ;;  %v6722_v53 = vpop.f32.mrb[50].mxu1 }
0x1c82   : > { %v8243_v59 = vpop.f32.mrb[41].mxu0  ;;  %v8248_v60 = vpop.f32.mrb[51].mxu1 }
0x1c85   : > { %v6795_v62 = vpop.f32.mrb[42].mxu0  ;;  %v6868_v2 = vpop.f32.mrb[52].mxu1 }
0x1c86   : > { %v6872_v3 = vcombine.low %v6649_v51, %v6795_v62  ;;  %v6873_v4 = vcombine.high %v6649_v51, %v6795_v62  ;;  %v6888_v5 = vcombine.low %v6722_v53, %v6868_v2  ;;  %v6889_v6 = vcombine.high %v6722_v53, %v6868_v2  ;;  %v8253_v63 = vpop.f32.mrb[43].mxu0  ;;  %v8258_v7 = vpop.f32.mrb[53].mxu1 }
0x1c87   : > { %v7702_v7 = vld [vmem:[%s9963_s6 + $0x38] sm:$0xff] }
0x1c88   : > { %v6880_v43 = vrot.slane %v6872_v3, %v8966_v42  ;;  %v6887_v11 = vrot.slane %v6873_v4, %v8966_v42  ;;  %v6896_v12 = vrot.slane %v6888_v5, %v8966_v42  ;;  %v6903_v55 = vrot.slane %v6889_v6, %v8966_v42 }
0x1c8a   : > { %v6904_v15 = vcombine.low %v6880_v43, %v6896_v12  ;;  %v6905_v20 = vcombine.high %v6880_v43, %v6896_v12  ;;  %v6920_v21 = vcombine.low %v6887_v11, %v6903_v55  ;;  %v6921_v27 = vcombine.high %v6887_v11, %v6903_v55  ;;  %v7706_v11 = vld [vmem:[%s9965_s8 + $0x40] sm:$0xff]  ;;  %v7707_v12 = vld [vmem:[%s9965_s8 + $0x48] sm:$0xff]  ;;  %v7708_v55 = vld [vmem:[%s9965_s8 + $0x50] sm:$0xff] }
0x1c8c   : > { %v6912_v8 = vrot.slane %v6904_v15, %v8969_v49  ;;  %v6919_v9 = vrot.slane %v6905_v20, %v8969_v49  ;;  %v6928_v10 = vrot.slane %v6920_v21, %v8969_v49  ;;  %v6935_v13 = vrot.slane %v6921_v27, %v8969_v49  ;;  %v7709_v20 = vld [vmem:[%s9965_s8 + $0x58] sm:$0xff]  ;;  %v7710_v27 = vld [vmem:[%s9965_s8 + $0x60] sm:$0xff] }
0x1c8d   : > { %v8432_v15 = vpack.c.bf16 %v7707_v12, %v7706_v11  ;;  %v8435_v21 = vpack.c.bf16 %v7709_v20, %v7708_v55  ;;  %v8438_v30 = vpack.c.bf16 %v7711_v29, %v7710_v27 }
0x1c8e   : > { %v6940_v39 = vcombine.low %v6912_v8, %v6919_v9  ;;  %v7696_v32 = vcombine.high %v6912_v8, %v6919_v9  ;;  %v6956_v34 = vcombine.low %v6928_v10, %v6935_v13  ;;  %v7697_v38 = vcombine.high %v6928_v10, %v6935_v13 }
0x1c8f   : > { %v7121_v13 = vrot.slane %v9614_v41, %v8939_v17 }
0x1c90   : > { %v6947_v35 = vrot.slane %v6940_v39, %v8966_v42  ;;  %v6955_v14 = vrot.slane %v7696_v32, %v8966_v42  ;;  %v6963_v40 = vrot.slane %v6956_v34, %v8966_v42  ;;  %v6971_v44 = vrot.slane %v7697_v38, %v8966_v42 }
0x1c91   : > { %v7126_v32 = vrot.slane %v9619_v26, %v8939_v17  ;;  %v7704_v17 = vld [vmem:[%s9964_s7 + $0x1] ss:$0 sm:$0xff] }
0x1c92   : > { %v6973_v22 = vcombine.high %v6947_v35, %v6955_v14  ;;  %v6989_v45 = vcombine.high %v6963_v40, %v6971_v44  ;;  %v6972_v25 = vcombine.low %v6947_v35, %v6955_v14  ;;  %v6988_v28 = vcombine.low %v6963_v40, %v6971_v44  ;;  %v7712_v35 = vld [vmem:[%s9965_s8 + $0x70] sm:$0xff]  ;;  %v7713_v14 = vld [vmem:[%s9965_s8 + $0x78] sm:$0xff] }
0x1c93   : > { %v8441_v40 = vpack.c.bf16 %v7713_v14, %v7712_v35 }
0x1c94   : > { %v6987_v37 = vrot.slane %v6973_v22, %v8969_v49  ;;  %v7003_v46 = vrot.slane %v6989_v45, %v8969_v49  ;;  %v6980_v48 = vrot.slane %v6972_v25, %v8969_v49  ;;  %v6996_v50 = vrot.slane %v6988_v28, %v8969_v49  ;;  %v8596_v49 = vld [vmem:[%s9962_s5 + $0x8] sm:$0xff] }
0x1c95   : > { %v7026_v47 = vrot.slane %v8596_v49, %v3655_v57  ;;  %v7700_v57 = vld [vmem:[%s9963_s6 + $0x28] sm:$0xff] }
0x1c96   : > { %v7006_v52 = vcombine.low %v6987_v37, %v7003_v46  ;;  %v7005_v61 = vcombine.high %v6980_v48, %v6996_v50  ;;  %v7007_v36 = vcombine.high %v6987_v37, %v7003_v46  ;;  %v7004_v24 = vcombine.low %v6980_v48, %v6996_v50 }
0x1c97   : > { %v8426_v63 = vpack.c.bf16 %v7700_v57, %v7699_v16 }
0x1c98   : > { %7013 = vrot.lane.b32.xlu0 %v7006_v52, %s10017_s20  ;;  %7009 = vrot.lane.b32.xlu1 %v7005_v61, %s10018_s25  ;;  %s7726_s20 = sshll.u32 %s8843_s22, 9 }
0x1c99   : > { %8427 = vmatpush3.bf16.msra.mxu1 %v8426_v63  ;;  %s9879_s0 = scalar_lea.hbm %s9972_s15, %s7726_s20 }
0x1c9a   : > { %8428 = vmatprep.subr.bf16.mxu1 %v8728_v0 }
0x1c9c   : > { %7017 = vrot.lane.b32.xlu1 %v7007_v36, %s10013_s16 }
0x1d0a   : > { %v7010_v42 = vpop.permute.xlu1 %7009  ;;  %v7014_v54 = vpop.permute.xlu0 %7013 }
0x1d0b   : > { %v7020_v33 = vsel %vm1258_vm2, %v7004_v24, %v7010_v42 }
0x1d0c   : > { %v7021_v58 = vsel %vm2056_vm4, %v7020_v33, %v7014_v54  ;;  %v7329_v54 = vld [vmem:[%s9969_s12] sm:$0xff]  ;;  %v7330_v33 = vld [vmem:[%s9969_s12 + $0x8] sm:$0xff] }
0x1d0e   : > { %v7018_v56 = vpop.permute.xlu1 %7017 }
0x1d0f   : > { %v7022_v18 = vsel %vm2058_vm5, %v7021_v58, %v7018_v56  ;;  %v8444_v56 = vpack.c.bf16 %v7330_v33, %v7329_v54  ;;  %v7331_v58 = vld [vmem:[%s9969_s12 + $0x10] sm:$0xff] }
0x1d10   : > { %8268 = vmatmul.mubr.msk.f32.vlgmr.msra.gmra.mrb[44].mxu0 %vm598_vm1, %v7022_v18  ;;  %v7332_v18 = vld [vmem:[%s9969_s12 + $0x18] sm:$0xff] }
0x1d11   : > { %8297 = vmatprep.mubr.msk.f32.mxu0 %vm8729_vm0, %v8730_v1  ;;  %8433 = vmatpush3.bf16.msra.mxu0 %v8432_v15  ;;  %v8447_v49 = vpack.c.bf16 %v7332_v18, %v7331_v58 }
0x1d12   : > { %8434 = vmatprep.subr.bf16.mxu0 %v8728_v0 }
0x1d15   : > { %8436 = vmatpush3.bf16.msra.mxu0 %v8435_v21 }
0x1d16   : > { %8437 = vmatprep.subr.bf16.mxu0 %v8728_v0 }
0x1d19   : > { %8439 = vmatpush3.bf16.msra.mxu0 %v8438_v30 }
0x1d1a   : > { %8440 = vmatprep.subr.bf16.mxu0 %v8728_v0 }
0x1d1d   : > { %8442 = vmatpush3.bf16.msra.mxu0 %v8441_v40 }
0x1de3   : > { %v7096_v51 = vpop.f32.mrb[44].mxu0 }
0x1de4   : > { %v7097_v53 = vadd.f32 %v7096_v51, %v7026_v47  ;;  %v8269_v59 = vpop.f32.mrb[45].mxu0 }
0x1de6   : > { %v7104_v60 = vadd.f32 %v7097_v53, %v9625_v23  ;;  %v7701_v23 = vld [vmem:[%s9963_s6 + $0x30] sm:$0xff] }
0x1de7   : > { %v8429_v43 = vpack.c.bf16 %v7702_v7, %v7701_v23 }
0x1de8   : > { %v7105_v62 = vsel %vm598_vm1, %v7104_v60, 0.0 }
0x1de9   : > { %7106 = vadd.xlane.f32.xlu0 %v7105_v62  ;;  %8430 = vmatpush3.bf16.msra.mxu1 %v8429_v43  ;;  %v7327_v62 = vrot.slane %v9619_v26, %v9038_v31 }
0x1dea   : > { %8443 = vmatprep.subr.bf16.mxu1 %v8728_v0 }
0x1e76   : > { %v7107_v2 = vpop.xlane.xlu0 %7106 }
0x1e77   : > { %v7108_v3 = vmul.f32 0.03125, %v7107_v2 }
0x1e79   : > { %v7109_v4 = vsub.f32 %v7104_v60, %v7108_v3 }
0x1e7b   : > { %v7110_v5 = vmul.f32 %v7109_v4, %v7109_v4 }
0x1e7d   : > { %v7111_v6 = vsel %vm598_vm1, %v7110_v5, 0.0 }
0x1e7e   : > { %7112 = vadd.xlane.f32.xlu1 %v7111_v6 }
0x1f0b   : > { %v7113_v8 = vpop.xlane.xlu1 %7112 }
0x1f0c   : > { %v7114_v9 = vmul.f32 0.03125, %v7113_v8 }
0x1f0e   : > { %v7115_v10 = vadd.f32 1e-05, %v7114_v9 }
0x1f10   : > { %8590 = vrsqrt.f32 %v7115_v10 }
0x1f1a   : > { %v8591_v19 = vpop.eup %8590 }
0x1f1b   : > { %v7117_v39 = vmul.f32 %v8591_v19, %v7109_v4 }
0x1f1d   : > { %v7122_v34 = vmul.f32 %v7121_v13, %v7117_v39 }
0x1f1f   : > { %v7127_v38 = vadd.f32 %v7126_v32, %v7122_v34 }
0x1f21   : > { %8279 = vmatmul.mubr.msk.f32.vlgmr.msra.gmra.mrb[54].mxu1 %vm598_vm1, %v7127_v38 }
0x1f22   : > { %8308 = vmatprep.mubr.msk.f32.mxu1 %vm8729_vm0, %v8730_v1  ;;  %v7715_v1 = vld [vmem:[%s9966_s9 + $0x1] ss:$0 sm:$0xff]  ;;  %8445 = vmatpush3.bf16.msra.mxu1 %v8444_v56 }
0x1f23   : > { %8446 = vmatprep.subr.bf16.mxu1 %v8728_v0  ;;  %v7322_v0 = vrot.slane %v9614_v41, %v9038_v31 }
0x1f26   : > { %8448 = vmatpush3.bf16.msra.mxu1 %v8447_v49 }
0x1ff4   : > { %v7210_v44 = vpop.f32.mrb[54].mxu1 }
0x1ff5   : > { %v7211_v22 = vadd.f32 %v7704_v17, %v7210_v44  ;;  %v8280_v45 = vpop.f32.mrb[55].mxu1 }
0x1ff7   : > { %v7214_v25 = vmax.f32 %v7211_v22, 0.0 }
0x1ff9   : > { %8298 = vmatmul.mubr.msk.f32.vlgmr.msra.gmra.mrb[46].mxu0 %vm3854_vm7, %v7214_v25 }
0x20cc   : > { %v7301_v28 = vpop.f32.mrb[46].mxu0 }
0x20cd   : > { %v7302_v37 = vadd.f32 %v7715_v1, %v7301_v28  ;;  %v8299_v46 = vpop.f32.mrb[47].mxu0 }
0x20cf   : > { %v7305_v48 = vadd.f32 %v7302_v37, %v7127_v38 }
0x20d1   : > { %v7306_v50 = vsel %vm598_vm1, %v7305_v48, 0.0 }
0x20d2   : > { %7307 = vadd.xlane.f32.xlu0 %v7306_v50 }
0x215f   : > { %v7308_v52 = vpop.xlane.xlu0 %7307 }
0x2160   : > { %v7309_v61 = vmul.f32 0.03125, %v7308_v52 }
0x2162   : > { %v7310_v36 = vsub.f32 %v7305_v48, %v7309_v61 }
0x2164   : > { %v7311_v24 = vmul.f32 %v7310_v36, %v7310_v36 }
0x2166   : > { %v7312_v42 = vsel %vm598_vm1, %v7311_v24, 0.0 }
0x2167   : > { %7313 = vadd.xlane.f32.xlu0 %v7312_v42 }
0x21f4   : > { %v7314_v47 = vpop.xlane.xlu0 %7313 }
0x21f5   : > { %v7315_v51 = vmul.f32 0.03125, %v7314_v47 }
0x21f7   : > { %v7316_v53 = vadd.f32 1e-05, %v7315_v51 }
0x21f9   : > { %8592 = vrsqrt.f32 %v7316_v53 }
0x2203   : > { %v8593_v59 = vpop.eup %8592 }
0x2204   : > { %v7318_v60 = vmul.f32 %v8593_v59, %v7310_v36 }
0x2206   : > { %v7323_v2 = vmul.f32 %v7322_v0, %v7318_v60 }
0x2208   : > { %v7328_v3 = vadd.f32 %v7327_v62, %v7323_v2 }
0x220a   : > { %8309 = vmatmul.mubr.msk.f32.vlgmr.msra.gmra.mrb[56].mxu1 %vm598_vm1, %v7328_v3 }
0x220b   : > { %8638 = shalt.err (!%p8635_p7)
}
0x220c   : > { %s8639_s29 = scalar_lea.hbm %s9879_s0, 512  ;;  %s8643_s30 = scalar_lea.hbm %s9972_s15, 1024 }
0x220d   : > { %p8640_p8 = scmp.ne.s32.totalorder %s9879_s0, %s8639_s29  ;;  %p8644_p1 = scmp.lt.u32.totalorder %s9879_s0, %s9972_s15 }
0x220e   : > { %p8645_p0 = scmp.lt.u32.totalorder %s8643_s30, %s8639_s29  ;;  %p8647_p6 = scmp.lt.u32.totalorder %s8639_s29, %s9879_s0 }
0x220f   : > { %p8641_p11 = pnand %p8640_p8, %p10019_p9 }
0x2210   : > { %p8646_p5 = por %p8645_p0, %p8644_p1 }
0x2211   : > { %p8642_p13 = pneg %p8641_p11 }
0x2212   : > { %p8648_p10 = por %p8647_p6, %p8646_p5 }
0x2214   : > { %p8649_p12 = pnand %p8648_p10, %p8642_p13 }
0x2216   : > { %8652 = shalt.err (!%p8649_p12)
}
0x2217   : > { %s8740_s27 = smov 128   ;;  %s7591_s17 = sshll.u32 %s9717_s24, 3  ;;  %v7717_v31 = vld [vmem:[%s9970_s13] ss:$0 sm:$0xff] }
0x2218   : > { %8454 = dma.vmem_to_hbm [thread:$0]  (%p10019_p9), %s9873_s23, 512, %s9879_s0, %s7420_s1, %s8740_s27, %s8740_s27, %s10018_s25  }
0x2219   : > { %s7721_s29 = sshll.u32 %s8843_s22, 7  ;;  %s541_s30 = scalar_lea.vmem [#allocation5], %s7591_s17 }
0x221a   : > { %s7433_s26 = sshll.u32 %s541_s30, 4  ;;  %s9914_s3 = scalar_lea.hbm %s9971_s14, %s7721_s29  ;;  %s9916_s26 = int_to_ptr.vmem [resolvable:$true] %s7433_s26 }
0x221b   : > { %s7415_s25 = scalar_lea.sflag [#allocation4], %s9717_s24  ;;  %s8653_s23 = scalar_lea.vmem %s9916_s26, 128 }
0x221c   : > { %p8654_p2 = scmp.ne.s32.totalorder %s9916_s26, %s8653_s23  ;;  %s8741_s22 = smov [#allocation5]  }
0x221d   : > { %s8657_s0 = sshll.u32 %s8741_s22, 4  ;;  %s8658_s0 = int_to_ptr.vmem [resolvable:$false] %s8657_s0 }
0x221e   : > { %p8655_p3 = pnand %p8654_p2, %p10019_p9  ;;  %s8659_s1 = scalar_lea.vmem %s8658_s0, 256 }
0x221f   : > { %p8660_p7 = scmp.lt.s32.totalorder %s9916_s26, %s8658_s0  ;;  %p8661_p8 = scmp.lt.s32.totalorder %s8659_s1, %s8653_s23 }
0x2220   : > { %p8656_p4 = pneg %p8655_p3 }
0x2221   : > { %p8662_p11 = por %p8661_p8, %p8660_p7 }
0x2223   : > { %p8663_p13 = pnand %p8662_p11, %p8656_p4 }
0x22dd   : > { %v7409_v41 = vpop.f32.mrb[56].mxu1 }
0x22de   : > { %v7410_v26 = vadd.f32 %v7717_v31, %v7409_v41  ;;  %v8310_v4 = vpop.f32.mrb[57].mxu1 }
0x22e0   : > { %7413 = vst [vmem:[%s541_s30] sm:$0xff] %v7410_v26 }
0x22e1   : > { %8666 = shalt.err (!%p8663_p13)
}
0x22e2   : > { %s8667_s2 = scalar_lea.hbm %s9914_s3, 128  ;;  %s8671_s17 = scalar_lea.hbm %s9971_s14, 256 }
0x22e3   : > { %p8668_p1 = scmp.ne.s32.totalorder %s9914_s3, %s8667_s2  ;;  %p8672_p6 = scmp.lt.u32.totalorder %s9914_s3, %s9971_s14 }
0x22e4   : > { %p8673_p10 = scmp.lt.u32.totalorder %s8671_s17, %s8667_s2  ;;  %p8675_p2 = scmp.lt.u32.totalorder %s8667_s2, %s9914_s3 }
0x22e5   : > { %p8669_p0 = pnand %p8668_p1, %p10019_p9 }
0x22e6   : > { %p8674_p12 = por %p8673_p10, %p8672_p6 }
0x22e7   : > { %p8670_p5 = pneg %p8669_p0 }
0x22e8   : > { %p8676_p3 = por %p8675_p2, %p8674_p12 }
0x22ea   : > { %p8677_p4 = pnand %p8676_p3, %p8670_p5 }
0x22ec   : > { %8680 = shalt.err (!%p8677_p4)
}
0x22ed   : > { %8453 = dma.vmem_to_hbm [thread:$0]  (%p10019_p9), %s9916_s26, 128, %s9914_s3, %s7415_s25  }
0x22ee PF: > { %s10020_s29 = sld [smem:[#allocation11_spill]]  ;;  %s10021_s30 = sld [smem:[#allocation15_spill]] }
0x22ef   : > { %p8470_p7 = scmp.ge.s32.totalorder %s8723_s21, 2 }
0x22f4   : > { %s7461_s18 = sand.u32 1, %s10020_s29   ;;  %p10022_p8 = scmp.ne.s32.totalorder %s10021_s30, 0 }
0x22f5   : > { %s7462_s23 = scalar_lea.sflag [#allocation4], %s7461_s18 }
0x22f6   : > { %p8462_p11 = pnand %p8470_p7, %p10022_p8 }
0x22f8   : > { %8702 = dma.done.wait (!%p8462_p11), %s7462_s23, 128  }
0x22f9   : > { %8704 = vsyncadd (!%p8462_p11), %s7462_s23, 4294967168  ;;  %s7471_s22 = scalar_lea.sflag [#allocation7], %s7461_s18 }
0x22fa   : > { %8706 = dma.done.wait (!%p8462_p11), %s7471_s22, 512  }
0x22fb   : > { %8708 = vsyncadd (!%p8462_p11), %s7471_s22, 4294966784  ;;  %s10023_s21 = sld [smem:[#allocation13_spill]]  ;;  %s10024_s28 = sld [smem:[#allocation12_spill]] }
0x22fc   : > { %s10025_s20 = sld [smem:[#allocation14_spill]]  ;;  %s10026_s18 = smov %s8715_s19 }
0x2301   : > { %p30_p9 = scmp.ge.s32.totalorder %s10023_s21, 4   ;;  %s10027_s19 = smov %s10024_s28 }
0x2303   :  { %32 = sbr.rel (!%p30_p9) target bundleno = 11 (0xb), region = 164 }
0x230a   :  { %7476 = vsyncpa [#allocation3], 1 }
0x230b   :  { %7478 = vsyncpa [#allocation3 + $0x1], 1 }
0x230c   :  { %7479 = vsyncpa [#allocation4], 1 }
0x230d   :  { %7481 = vsyncpa [#allocation4 + $0x1], 1 }
0x230e   :  { %7482 = vsyncpa [#allocation7], 1 }
0x230f   :  { %7484 = vsyncpa [#allocation7 + $0x1], 1 }

</bundles_post_ra>
